<compile_context>
chip_gen: v5e
topology: v5e:2x2
jax: 0.10.0
libtpu: 0.0.40
codegen_flags: <defaults>
</compile_context>

<pallas_src>
import functools

import jax
import jax.numpy as jnp
from jax.experimental import pallas as pl
from jax.experimental.pallas import tpu as pltpu


_TM = 512            # output rows (flattened n*Hp*Wp positions) per grid step
_TH = 128            # halo rows appended to each tile (must be >= 2*Wp + 2)
_RATIO = _TM // _TH
_LANE = 128          # output-channel padding (lane-dense stores / MXU width)
_CDT = jnp.bfloat16  # activation / weight dtype (accumulation is f32)
_VMEM_LIMIT = 64 * 1024 * 1024


def _round_up(x, m):
    return ((x + m - 1) // m) * m


# ----------------------------------------------------------------------------
# Pallas kernels
# ----------------------------------------------------------------------------
def _conv3x3_bn_relu_kernel(xa_ref, xh_ref, w_ref, b_ref, m_ref, o_ref, *, wp, tm):
    """One tile of: mask * relu(conv3x3(x) folded-BN).

    xa_ref: (TM, Ci)    main tile of the flat zero-padded activation buffer
    xh_ref: (TH, Ci)    halo rows immediately following the tile
    w_ref : (9, Ci, Cp) conv weights with BN scale folded in (bf16)
    b_ref : (1, Cp)     folded BN shift (f32)
    m_ref : (TM, 1)     1.0 for valid output rows, 0.0 for padding/border rows
    """
    cp = o_ref.shape[-1]
    win = jnp.concatenate([xa_ref[...], xh_ref[...]], axis=0)        # (TM+TH, Ci)
    acc = jnp.zeros((tm, cp), jnp.float32)
    for t in range(9):                                               # 3x3 taps
        off = (t // 3) * wp + (t % 3)
        acc = acc + jnp.dot(win[off:off + tm, :], w_ref[t],
                            preferred_element_type=jnp.float32)
    acc = jnp.maximum(acc + b_ref[...], 0.0)
    o_ref[...] = (acc * m_ref[...]).astype(o_ref.dtype)


def _conv3x3_bn_add_relu_kernel(ya_ref, yh_ref, ra_ref, rh_ref, *rest,
                                wp, tm, has_proj):
    """One tile of: relu(conv3x3(y1) folded-BN + shortcut(x)).

    The shortcut is computed in-kernel: either an identity add or a fused
    1x1 conv + folded BN (one extra MXU matmul on the same row tile).
    """
    if has_proj:
        wsc_ref, bsc_ref, w_ref, b_ref, o_ref = rest
    else:
        w_ref, b_ref, o_ref = rest
    cp = o_ref.shape[-1]

    win = jnp.concatenate([ya_ref[...], yh_ref[...]], axis=0)        # (TM+TH, Cp)
    acc = jnp.zeros((tm, cp), jnp.float32)
    for t in range(9):
        off = (t // 3) * wp + (t % 3)
        acc = acc + jnp.dot(win[off:off + tm, :], w_ref[t],
                            preferred_element_type=jnp.float32)
    acc = acc + b_ref[...]

    # Residual rows sit at a constant offset (2*Wp + 2) inside the same
    # [tile | halo] window of the shortcut-source buffer.
    roff = 2 * wp + 2
    ra = ra_ref[...]
    rh = rh_ref[...]
    res = jnp.concatenate([ra[roff:, :], rh[:roff, :]], axis=0)       # (TM, Ci)
    if has_proj:
        acc = acc + jnp.dot(res, wsc_ref[...],
                            preferred_element_type=jnp.float32)
        acc = acc + bsc_ref[...]
    else:
        acc = acc + res.astype(jnp.float32)

    o_ref[...] = jnp.maximum(acc, 0.0).astype(o_ref.dtype)


# ----------------------------------------------------------------------------
# pallas_call wrappers
# ----------------------------------------------------------------------------
def _check_geometry(wp):
    if wp + 1 > _TM or 2 * wp + 2 > _TH:
        raise ValueError(f"padded width {wp} too large for TM={_TM}, TH={_TH}")


def _conv3x3_bn_relu(xbuf, w, b, mask, *, wp):
    """xbuf:[Rx,Ci] (flat, front offset 2*(wp+1))  ->  [Ro,Cp] (offset wp+1)."""
    _check_geometry(wp)
    ci = xbuf.shape[1]
    cp = w.shape[2]
    rows_out = mask.shape[0]
    assert rows_out % _TM == 0 and xbuf.shape[0] >= rows_out + _TM
    grid = rows_out // _TM

    kern = functools.partial(_conv3x3_bn_relu_kernel, wp=wp, tm=_TM)
    return pl.pallas_call(
        kern,
        out_shape=jax.ShapeDtypeStruct((rows_out, cp), _CDT),
        grid=(grid,),
        in_specs=[
            pl.BlockSpec((_TM, ci), lambda i: (i, 0)),                 # tile
            pl.BlockSpec((_TH, ci), lambda i: ((i + 1) * _RATIO, 0)),  # halo
            pl.BlockSpec((9, ci, cp), lambda i: (0, 0, 0)),            # weights
            pl.BlockSpec((1, cp), lambda i: (0, 0)),                   # bias
            pl.BlockSpec((_TM, 1), lambda i: (i, 0)),                  # row mask
        ],
        out_specs=pl.BlockSpec((_TM, cp), lambda i: (i, 0)),
        compiler_params=pltpu.CompilerParams(
            dimension_semantics=("parallel",),
            vmem_limit_bytes=_VMEM_LIMIT),
    )(xbuf, xbuf, w, b, mask)


def _conv3x3_bn_add_relu(ybuf, rbuf, w, b, wsc, bsc, *, wp, out_rows, has_proj):
    """conv2 + bn2 + shortcut(+1x1 proj) + add + relu, fully fused."""
    _check_geometry(wp)
    cp = w.shape[2]
    ci = rbuf.shape[1]
    assert out_rows % _TM == 0
    assert ybuf.shape[0] >= out_rows + _TH and rbuf.shape[0] >= out_rows + _TH
    grid = out_rows // _TM

    kern = functools.partial(_conv3x3_bn_add_relu_kernel,
                             wp=wp, tm=_TM, has_proj=has_proj)
    in_specs = [
        pl.BlockSpec((_TM, cp), lambda i: (i, 0)),                 # y1 tile
        pl.BlockSpec((_TH, cp), lambda i: ((i + 1) * _RATIO, 0)),  # y1 halo
        pl.BlockSpec((_TM, ci), lambda i: (i, 0)),                 # residual tile
        pl.BlockSpec((_TH, ci), lambda i: ((i + 1) * _RATIO, 0)),  # residual halo
    ]
    args = [ybuf, ybuf, rbuf, rbuf]
    if has_proj:
        in_specs += [pl.BlockSpec((ci, cp), lambda i: (0, 0)),     # 1x1 proj W
                     pl.BlockSpec((1, cp), lambda i: (0, 0))]      # proj shift
        args += [wsc, bsc]
    in_specs += [pl.BlockSpec((9, cp, cp), lambda i: (0, 0, 0)),   # conv2 W
                 pl.BlockSpec((1, cp), lambda i: (0, 0))]          # conv2 shift
    args += [w, b]

    return pl.pallas_call(
        kern,
        out_shape=jax.ShapeDtypeStruct((out_rows, cp), jnp.float32),
        grid=(grid,),
        in_specs=in_specs,
        out_specs=pl.BlockSpec((_TM, cp), lambda i: (i, 0)),
        compiler_params=pltpu.CompilerParams(
            dimension_semantics=("parallel",),
            vmem_limit_bytes=_VMEM_LIMIT),
    )(*args)


# ----------------------------------------------------------------------------
# Host-side glue: flat padded buffers, BN folding, forward pass
# ----------------------------------------------------------------------------
def fold_bn(gamma, beta, mean, var, eps=1e-5):
    scale = gamma / jnp.sqrt(var + eps)
    return scale, beta - mean * scale


def _row_mask(nrows, off, n, hp, wp, h, w):
    """(nrows,1) f32 mask: 1.0 where the flat row holds a real output pixel."""
    q = jnp.arange(nrows, dtype=jnp.int32)
    p = q - off
    mv = n * hp * wp
    b = p % wp
    a = (p // wp) % hp
    valid = (p >= 0) & (p < mv) & (a >= 1) & (a <= h) & (b >= 1) & (b <= w)
    return valid.astype(jnp.float32)[:, None]


def _flat_buffer(feat_padded, front, total_rows):
    """Place a zero-padded NHWC map into a flat [total_rows, C] buffer."""
    n, hp, wp, c = feat_padded.shape
    flat = feat_padded.reshape(n * hp * wp, c)
    back = total_rows - front - flat.shape[0]
    return jnp.concatenate(
        [jnp.zeros((front, c), flat.dtype), flat,
         jnp.zeros((back, c), flat.dtype)], axis=0)


def basic_block_forward(x_nchw, params, stride):
    """Pallas implementation of BasicBlock.forward (inference-mode BN)."""
    N, cin, H, W = x_nchw.shape
    planes = params["w1"].shape[-1]
    has_proj = params["has_proj"]
    cp = _round_up(planes, _LANE)                       # lane-dense out channels
    ci_p = cp if not has_proj else _round_up(cin, 8)    # identity add needs ci_p==cp

    # ---- fold BN into weights (scale) + bias (shift), pad channels, cast bf16
    s1, b1 = fold_bn(*params["bn1"])
    s2, b2 = fold_bn(*params["bn2"])
    w1k = jnp.pad(params["w1"] * s1,
                  ((0, 0), (0, 0), (0, ci_p - cin), (0, cp - planes)))
    w1k = w1k.reshape(9, ci_p, cp).astype(_CDT)
    b1k = jnp.pad(b1, (0, cp - planes)).reshape(1, cp).astype(jnp.float32)
    w2k = jnp.pad(params["w2"] * s2,
                  ((0, 0), (0, 0), (0, cp - planes), (0, cp - planes)))
    w2k = w2k.reshape(9, cp, cp).astype(_CDT)
    b2k = jnp.pad(b2, (0, cp - planes)).reshape(1, cp).astype(jnp.float32)
    if has_proj:
        ssc, bsc = fold_bn(*params["bnsc"])
        wsck = jnp.pad(params["wsc"] * ssc,
                       ((0, ci_p - cin), (0, cp - planes))).astype(_CDT)
        bsck = jnp.pad(bsc, (0, cp - planes)).reshape(1, cp).astype(jnp.float32)
    else:
        wsck = bsck = None

    # ---- conv1 (+bn1+relu): always evaluated at stride 1 on the full grid
    x_nhwc = jnp.transpose(x_nchw, (0, 2, 3, 1))
    Hp, Wp = H + 2, W + 2
    Mv = N * Hp * Wp
    Q1 = _round_up(Wp + 1 + Mv, _TM)
    x_pad = jnp.pad(x_nhwc, ((0, 0), (1, 1), (1, 1), (0, ci_p - cin))).astype(_CDT)
    x1 = _flat_buffer(x_pad, 2 * (Wp + 1), Q1 + 2 * _TM)        # conv1 in / residual
    mask1 = _row_mask(Q1 + _TM, Wp + 1, N, Hp, Wp, H, W)
    y1 = _conv3x3_bn_relu(x1, w1k, b1k, mask1, wp=Wp)           # flat, offset Wp+1

    # ---- geometry for conv2 / shortcut
    if stride == 1:
        Ho, Wo, Hp2, Wp2 = H, W, Hp, Wp
        y1buf, rbuf = y1, x1
        Mv2 = Mv
        Q2 = _round_up(Mv2, _TM)
    else:
        # Fallback for strided blocks: subsample the stride-1 conv1 result and
        # rebuild the flat buffers in the downsampled geometry.
        Ho, Wo = (H - 1) // stride + 1, (W - 1) // stride + 1
        Hp2, Wp2 = Ho + 2, Wo + 2
        Mv2 = N * Hp2 * Wp2
        Q2 = _round_up(Mv2, _TM)
        y1_map = y1[Wp + 1:Wp + 1 + Mv].reshape(N, Hp, Wp, cp)[:, 1:H + 1, 1:W + 1, :]
        y1_s = y1_map[:, ::stride, ::stride, :]                  # (N, Ho, Wo, cp)
        y1_sp = jnp.pad(y1_s, ((0, 0), (1, 1), (1, 1), (0, 0)))
        y1buf = _flat_buffer(y1_sp, Wp2 + 1, Q2 + _TM)
        x_s = x_nhwc[:, ::stride, ::stride, :]
        x_sp = jnp.pad(x_s, ((0, 0), (1, 1), (1, 1), (0, ci_p - cin))).astype(_CDT)
        rbuf = _flat_buffer(x_sp, 2 * (Wp2 + 1), Q2 + _TM)

    # ---- conv2 + bn2 + shortcut (identity or fused 1x1 proj + bn) + add + relu
    y2 = _conv3x3_bn_add_relu(y1buf, rbuf, w2k, b2k, wsck, bsck,
                              wp=Wp2, out_rows=Q2, has_proj=has_proj)

    out = y2[:Mv2].reshape(N, Hp2, Wp2, cp)[:, 1:Ho + 1, 1:Wo + 1, :planes]
    return jnp.transpose(out, (0, 3, 1, 2))                      # back to NCHW


# ----------------------------------------------------------------------------
# Parameters + pure-JAX reference (lax.conv) for the sanity check
# ----------------------------------------------------------------------------
def init_params(key, in_planes, planes, stride):
    ks = jax.random.split(key, 9)

    def bn_params(k, c):
        k1, k2, k3, k4 = jax.random.split(k, 4)
        gamma = 1.0 + 0.1 * jax.random.normal(k1, (c,), jnp.float32)
        beta = 0.1 * jax.random.normal(k2, (c,), jnp.float32)
        mean = 0.1 * jax.random.normal(k3, (c,), jnp.float32)
        var = jnp.abs(jax.random.normal(k4, (c,), jnp.float32)) + 0.5
        return gamma, beta, mean, var

    p = {}
    # conv weights stored HWIO (= PyTorch OIHW permuted to (2,3,1,0))
    p["w1"] = 0.1 * jax.random.normal(ks[0], (3, 3, in_planes, planes), jnp.float32)
    p["bn1"] = bn_params(ks[1], planes)
    p["w2"] = 0.1 * jax.random.normal(ks[2], (3, 3, planes, planes), jnp.float32)
    p["bn2"] = bn_params(ks[3], planes)
    p["has_proj"] = (stride != 1) or (in_planes != planes)
    if p["has_proj"]:
        p["wsc"] = 0.1 * jax.random.normal(ks[4], (in_planes, planes), jnp.float32)
        p["bnsc"] = bn_params(ks[5], planes)
    return p


def reference_forward(x_nchw, params, stride):
    def conv3x3(x, w_hwio, s):
        w_oihw = jnp.transpose(w_hwio, (3, 2, 0, 1))
        return jax.lax.conv_general_dilated(
            x, w_oihw, (s, s), [(1, 1), (1, 1)],
            dimension_numbers=("NCHW", "OIHW", "NCHW"))

    def conv1x1(x, w_io, s):
        w_oihw = jnp.transpose(w_io, (1, 0))[:, :, None, None]
        return jax.lax.conv_general_dilated(
            x, w_oihw, (s, s), [(0, 0), (0, 0)],
            dimension_numbers=("NCHW", "OIHW", "NCHW"))

    def bn(x, p):
        scale, shift = fold_bn(*p)
        return x * scale[None, :, None, None] + shift[None, :, None, None]

    out = jax.nn.relu(bn(conv3x3(x_nchw, params["w1"], stride), params["bn1"]))
    out = bn(conv3x3(out, params["w2"], 1), params["bn2"])
    if params["has_proj"]:
        sc = bn(conv1x1(x_nchw, params["wsc"], stride), params["bnsc"])
    else:
        sc = x_nchw
    return jax.nn.relu(out + sc)


# ----------------------------------------------------------------------------
if __name__ == "__main__":
    key = jax.random.PRNGKey(0)

    # (N, in_planes, planes, H, W, stride)
    configs = [
        (2, 4, 8, 16, 16, 1),   # projection shortcut (channel change)
        (2, 8, 8, 16, 16, 1),   # identity shortcut
        (2, 4, 8, 16, 16, 2),   # strided block + projection shortcut
    ]
    for idx, (N, cin, planes, H, W, stride) in enumerate(configs):
        kx, kp = jax.random.split(jax.random.fold_in(key, idx))
        x = jax.random.normal(kx, (N, cin, H, W), jnp.float32)
        params = init_params(kp, cin, planes, stride)

        out = jax.block_until_ready(basic_block_forward(x, params, stride))
        ref = jax.block_until_ready(reference_forward(x, params, stride))

        Ho, Wo = (H - 1) // stride + 1, (W - 1) // stride + 1
        assert out.shape == ref.shape == (N, planes, Ho, Wo)
        # bf16 activations/weights with f32 accumulation -> loosened tolerance
        assert jnp.allclose(out, ref, rtol=5e-2, atol=5e-2), f"mismatch (cfg {idx})"

    print("KERNEL_OK")
</pallas_src>

<mosaic_0001>
module attributes {stable_mosaic.version = 11 : i64} {
  func.func @_conv3x3_bn_relu_kernel(%arg0: i32, %arg1: memref<512x8xbf16, #tpu.memory_space<vmem>>, %arg2: memref<128x8xbf16, #tpu.memory_space<vmem>>, %arg3: memref<9x8x128xbf16, #tpu.memory_space<vmem>>, %arg4: memref<1x128xf32, #tpu.memory_space<vmem>>, %arg5: memref<512x1xf32, #tpu.memory_space<vmem>>, %arg6: memref<512x128xbf16, #tpu.memory_space<vmem>>) attributes {dimension_semantics = [#tpu.dimension_semantics<parallel>], iteration_bounds = array<i64: 3>, scalar_prefetch = 0 : i64, scratch_operands = 0 : i64, tpu.core_type = #tpu.core_type<tc>, window_params = [{transform_indices = @transform_0, window_bounds = array<i64: 512, 8>}, {transform_indices = @transform_1, window_bounds = array<i64: 128, 8>}, {pipeline_mode = #tpu.pipeline_mode<synchronous>, transform_indices = @transform_2, window_bounds = array<i64: 9, 8, 128>}, {pipeline_mode = #tpu.pipeline_mode<synchronous>, transform_indices = @transform_3, window_bounds = array<i64: 1, 128>}, {transform_indices = @transform_4, window_bounds = array<i64: 512, 1>}, {transform_indices = @transform_5, window_bounds = array<i64: 512, 128>}]} {
    %c0 = arith.constant 0 : index
    %c0_0 = arith.constant 0 : index
    %0 = vector.load %arg1[%c0, %c0_0] : memref<512x8xbf16, #tpu.memory_space<vmem>>, vector<512x8xbf16>
    %c0_1 = arith.constant 0 : index
    %c0_2 = arith.constant 0 : index
    %1 = vector.load %arg2[%c0_1, %c0_2] : memref<128x8xbf16, #tpu.memory_space<vmem>>, vector<128x8xbf16>
    %2 = tpu.concatenate %0, %1 in 0 : vector<512x8xbf16>, vector<128x8xbf16> -> vector<640x8xbf16>
    %cst = arith.constant 0.000000e+00 : f32
    %3 = vector.broadcast %cst : f32 to vector<512x128xf32>
    %4 = vector.extract_strided_slice %2 {offsets = [0, 0], sizes = [512, 8], strides = [1, 1]} : vector<640x8xbf16> to vector<512x8xbf16>
    %c0_3 = arith.constant 0 : index
    %c0_4 = arith.constant 0 : index
    %c0_5 = arith.constant 0 : index
    %5 = vector.load %arg3[%c0_3, %c0_4, %c0_5] : memref<9x8x128xbf16, #tpu.memory_space<vmem>>, vector<1x8x128xbf16>
    %6 = vector.shape_cast %5 : vector<1x8x128xbf16> to vector<8x128xbf16>
    %cst_6 = arith.constant dense<0.000000e+00> : vector<512x128xf32>
    %7 = tpu.matmul %4, %6, %cst_6 {dimension_numbers = #tpu.dot_dimension_numbers<[1], [0], [0], [1], [0, 0, 1, 1], [], []>} : vector<512x8xbf16>, vector<8x128xbf16>, vector<512x128xf32> -> vector<512x128xf32>
    %8 = arith.addf %3, %7 : vector<512x128xf32>
    %9 = vector.extract_strided_slice %2 {offsets = [1, 0], sizes = [512, 8], strides = [1, 1]} : vector<640x8xbf16> to vector<512x8xbf16>
    %c1 = arith.constant 1 : index
    %c0_7 = arith.constant 0 : index
    %c0_8 = arith.constant 0 : index
    %10 = vector.load %arg3[%c1, %c0_7, %c0_8] : memref<9x8x128xbf16, #tpu.memory_space<vmem>>, vector<1x8x128xbf16>
    %11 = vector.shape_cast %10 : vector<1x8x128xbf16> to vector<8x128xbf16>
    %cst_9 = arith.constant dense<0.000000e+00> : vector<512x128xf32>
    %12 = tpu.matmul %9, %11, %cst_9 {dimension_numbers = #tpu.dot_dimension_numbers<[1], [0], [0], [1], [0, 0, 1, 1], [], []>} : vector<512x8xbf16>, vector<8x128xbf16>, vector<512x128xf32> -> vector<512x128xf32>
    %13 = arith.addf %8, %12 : vector<512x128xf32>
    %14 = vector.extract_strided_slice %2 {offsets = [2, 0], sizes = [512, 8], strides = [1, 1]} : vector<640x8xbf16> to vector<512x8xbf16>
    %c2 = arith.constant 2 : index
    %c0_10 = arith.constant 0 : index
    %c0_11 = arith.constant 0 : index
    %15 = vector.load %arg3[%c2, %c0_10, %c0_11] : memref<9x8x128xbf16, #tpu.memory_space<vmem>>, vector<1x8x128xbf16>
    %16 = vector.shape_cast %15 : vector<1x8x128xbf16> to vector<8x128xbf16>
    %cst_12 = arith.constant dense<0.000000e+00> : vector<512x128xf32>
    %17 = tpu.matmul %14, %16, %cst_12 {dimension_numbers = #tpu.dot_dimension_numbers<[1], [0], [0], [1], [0, 0, 1, 1], [], []>} : vector<512x8xbf16>, vector<8x128xbf16>, vector<512x128xf32> -> vector<512x128xf32>
    %18 = arith.addf %13, %17 : vector<512x128xf32>
    %19 = vector.extract_strided_slice %2 {offsets = [18, 0], sizes = [512, 8], strides = [1, 1]} : vector<640x8xbf16> to vector<512x8xbf16>
    %c3 = arith.constant 3 : index
    %c0_13 = arith.constant 0 : index
    %c0_14 = arith.constant 0 : index
    %20 = vector.load %arg3[%c3, %c0_13, %c0_14] : memref<9x8x128xbf16, #tpu.memory_space<vmem>>, vector<1x8x128xbf16>
    %21 = vector.shape_cast %20 : vector<1x8x128xbf16> to vector<8x128xbf16>
    %cst_15 = arith.constant dense<0.000000e+00> : vector<512x128xf32>
    %22 = tpu.matmul %19, %21, %cst_15 {dimension_numbers = #tpu.dot_dimension_numbers<[1], [0], [0], [1], [0, 0, 1, 1], [], []>} : vector<512x8xbf16>, vector<8x128xbf16>, vector<512x128xf32> -> vector<512x128xf32>
    %23 = arith.addf %18, %22 : vector<512x128xf32>
    %24 = vector.extract_strided_slice %2 {offsets = [19, 0], sizes = [512, 8], strides = [1, 1]} : vector<640x8xbf16> to vector<512x8xbf16>
    %c4 = arith.constant 4 : index
    %c0_16 = arith.constant 0 : index
    %c0_17 = arith.constant 0 : index
    %25 = vector.load %arg3[%c4, %c0_16, %c0_17] : memref<9x8x128xbf16, #tpu.memory_space<vmem>>, vector<1x8x128xbf16>
    %26 = vector.shape_cast %25 : vector<1x8x128xbf16> to vector<8x128xbf16>
    %cst_18 = arith.constant dense<0.000000e+00> : vector<512x128xf32>
    %27 = tpu.matmul %24, %26, %cst_18 {dimension_numbers = #tpu.dot_dimension_numbers<[1], [0], [0], [1], [0, 0, 1, 1], [], []>} : vector<512x8xbf16>, vector<8x128xbf16>, vector<512x128xf32> -> vector<512x128xf32>
    %28 = arith.addf %23, %27 : vector<512x128xf32>
    %29 = vector.extract_strided_slice %2 {offsets = [20, 0], sizes = [512, 8], strides = [1, 1]} : vector<640x8xbf16> to vector<512x8xbf16>
    %c5 = arith.constant 5 : index
    %c0_19 = arith.constant 0 : index
    %c0_20 = arith.constant 0 : index
    %30 = vector.load %arg3[%c5, %c0_19, %c0_20] : memref<9x8x128xbf16, #tpu.memory_space<vmem>>, vector<1x8x128xbf16>
    %31 = vector.shape_cast %30 : vector<1x8x128xbf16> to vector<8x128xbf16>
    %cst_21 = arith.constant dense<0.000000e+00> : vector<512x128xf32>
    %32 = tpu.matmul %29, %31, %cst_21 {dimension_numbers = #tpu.dot_dimension_numbers<[1], [0], [0], [1], [0, 0, 1, 1], [], []>} : vector<512x8xbf16>, vector<8x128xbf16>, vector<512x128xf32> -> vector<512x128xf32>
    %33 = arith.addf %28, %32 : vector<512x128xf32>
    %34 = vector.extract_strided_slice %2 {offsets = [36, 0], sizes = [512, 8], strides = [1, 1]} : vector<640x8xbf16> to vector<512x8xbf16>
    %c6 = arith.constant 6 : index
    %c0_22 = arith.constant 0 : index
    %c0_23 = arith.constant 0 : index
    %35 = vector.load %arg3[%c6, %c0_22, %c0_23] : memref<9x8x128xbf16, #tpu.memory_space<vmem>>, vector<1x8x128xbf16>
    %36 = vector.shape_cast %35 : vector<1x8x128xbf16> to vector<8x128xbf16>
    %cst_24 = arith.constant dense<0.000000e+00> : vector<512x128xf32>
    %37 = tpu.matmul %34, %36, %cst_24 {dimension_numbers = #tpu.dot_dimension_numbers<[1], [0], [0], [1], [0, 0, 1, 1], [], []>} : vector<512x8xbf16>, vector<8x128xbf16>, vector<512x128xf32> -> vector<512x128xf32>
    %38 = arith.addf %33, %37 : vector<512x128xf32>
    %39 = vector.extract_strided_slice %2 {offsets = [37, 0], sizes = [512, 8], strides = [1, 1]} : vector<640x8xbf16> to vector<512x8xbf16>
    %c7 = arith.constant 7 : index
    %c0_25 = arith.constant 0 : index
    %c0_26 = arith.constant 0 : index
    %40 = vector.load %arg3[%c7, %c0_25, %c0_26] : memref<9x8x128xbf16, #tpu.memory_space<vmem>>, vector<1x8x128xbf16>
    %41 = vector.shape_cast %40 : vector<1x8x128xbf16> to vector<8x128xbf16>
    %cst_27 = arith.constant dense<0.000000e+00> : vector<512x128xf32>
    %42 = tpu.matmul %39, %41, %cst_27 {dimension_numbers = #tpu.dot_dimension_numbers<[1], [0], [0], [1], [0, 0, 1, 1], [], []>} : vector<512x8xbf16>, vector<8x128xbf16>, vector<512x128xf32> -> vector<512x128xf32>
    %43 = arith.addf %38, %42 : vector<512x128xf32>
    %44 = vector.extract_strided_slice %2 {offsets = [38, 0], sizes = [512, 8], strides = [1, 1]} : vector<640x8xbf16> to vector<512x8xbf16>
    %c8 = arith.constant 8 : index
    %c0_28 = arith.constant 0 : index
    %c0_29 = arith.constant 0 : index
    %45 = vector.load %arg3[%c8, %c0_28, %c0_29] : memref<9x8x128xbf16, #tpu.memory_space<vmem>>, vector<1x8x128xbf16>
    %46 = vector.shape_cast %45 : vector<1x8x128xbf16> to vector<8x128xbf16>
    %cst_30 = arith.constant dense<0.000000e+00> : vector<512x128xf32>
    %47 = tpu.matmul %44, %46, %cst_30 {dimension_numbers = #tpu.dot_dimension_numbers<[1], [0], [0], [1], [0, 0, 1, 1], [], []>} : vector<512x8xbf16>, vector<8x128xbf16>, vector<512x128xf32> -> vector<512x128xf32>
    %48 = arith.addf %43, %47 : vector<512x128xf32>
    %c0_31 = arith.constant 0 : index
    %c0_32 = arith.constant 0 : index
    %49 = vector.load %arg4[%c0_31, %c0_32] : memref<1x128xf32, #tpu.memory_space<vmem>>, vector<1x128xf32>
    %50 = vector.broadcast %49 : vector<1x128xf32> to vector<512x128xf32>
    %51 = arith.addf %48, %50 : vector<512x128xf32>
    %cst_33 = arith.constant 0.000000e+00 : f32
    %52 = vector.broadcast %cst_33 : f32 to vector<512x128xf32>
    %53 = arith.maximumf %51, %52 : vector<512x128xf32>
    %c0_34 = arith.constant 0 : index
    %c0_35 = arith.constant 0 : index
    %54 = vector.load %arg5[%c0_34, %c0_35] : memref<512x1xf32, #tpu.memory_space<vmem>>, vector<512x1xf32>
    %55 = vector.broadcast %54 : vector<512x1xf32> to vector<512x128xf32>
    %56 = arith.mulf %53, %55 : vector<512x128xf32>
    %57 = arith.truncf %56 : vector<512x128xf32> to vector<512x128xbf16>
    %c0_36 = arith.constant 0 : index
    %c0_37 = arith.constant 0 : index
    %58 = vector.load %arg6[%c0_36, %c0_37] : memref<512x128xbf16, #tpu.memory_space<vmem>>, vector<512x128xbf16>
    tpu.vector_store %arg6[%c0_36, %c0_37], %57 {strides = array<i32>} : memref<512x128xbf16, #tpu.memory_space<vmem>>, vector<512x128xbf16>,
    return
  }
  func.func @transform_0(%arg0: i32) -> (i32, i32) {
    %c0_i32 = arith.constant 0 : i32
    %c0_i32_0 = arith.constant 0 : i32
    return %arg0, %c0_i32 : i32, i32
  }
  func.func @transform_1(%arg0: i32) -> (i32, i32) {
    %c1_i32 = arith.constant 1 : i32
    %0 = arith.addi %arg0, %c1_i32 : i32
    %c4_i32 = arith.constant 4 : i32
    %1 = arith.muli %0, %c4_i32 : i32
    %c0_i32 = arith.constant 0 : i32
    %c0_i32_0 = arith.constant 0 : i32
    return %1, %c0_i32 : i32, i32
  }
  func.func @transform_2(%arg0: i32) -> (i32, i32, i32) {
    %c0_i32 = arith.constant 0 : i32
    %c0_i32_0 = arith.constant 0 : i32
    %c0_i32_1 = arith.constant 0 : i32
    %c0_i32_2 = arith.constant 0 : i32
    return %c0_i32, %c0_i32_0, %c0_i32_1 : i32, i32, i32
  }
  func.func @transform_3(%arg0: i32) -> (i32, i32) {
    %c0_i32 = arith.constant 0 : i32
    %c0_i32_0 = arith.constant 0 : i32
    %c0_i32_1 = arith.constant 0 : i32
    return %c0_i32, %c0_i32_0 : i32, i32
  }
  func.func @transform_4(%arg0: i32) -> (i32, i32) {
    %c0_i32 = arith.constant 0 : i32
    %c0_i32_0 = arith.constant 0 : i32
    return %arg0, %c0_i32 : i32, i32
  }
  func.func @transform_5(%arg0: i32) -> (i32, i32) {
    %c0_i32 = arith.constant 0 : i32
    %c0_i32_0 = arith.constant 0 : i32
    return %arg0, %c0_i32 : i32, i32
  }
}

</mosaic_0001>

<bundles_post_ra>
// kernel: tpu_custom_call.1
= control target key start
LH: loop header
LB: loop body
LE: loop exit
PB: predicated region body
PF: predicated region fallthrough
CT: control target
= control target key end

     0   :  { %10 = vsyncpa [#allocation3], 0  ;;  %s7507_s0 = inlined_call_operand.vmem [shape: bf16[2048,8], index: 0, kind: input, shape index: {}]   ;;  %s7508_s1 = inlined_call_operand.vmem [shape: bf16[2048,8], index: 1, kind: input, shape index: {}]   ;;  %s7509_s2 = inlined_call_operand.vmem [shape: bf16[9,8,128], index: 2, kind: input, shape index: {}]   ;;  %s7510_s3 = inlined_call_operand.vmem [shape: f32[1,128], index: 3, kind: input, shape index: {}]   ;;  %s7511_s4 = inlined_call_operand.vmem [shape: f32[1536,1], index: 4, kind: input, shape index: {}]   ;;  %s7512_s5 = inlined_call_operand.hbm [shape: bf16[1536,128], index: 5, kind: output, shape index: {}]  }
   0x1   :  { %12 = vsyncpa [#allocation3 + $0x1], 0  ;;  %s5629_s18 = smov 0   ;;  %s5631_s19 = smov 0  }
   0x2   :  { %s5633_s20 = smov 0   ;;  %s5635_s21 = smov 0  }
   0x3 LB: > { %s5650_s22 = sadd.s32 4294967295, %s5594_s21   ;;  %s4740_s23 = sadd.s32 4294967294, %s5594_s21   ;;  %s5594_s21 = sphi %s5635_s21, %s7910_s21   ;;  %s5590_s20 = sphi %s5633_s20, %s7909_s20   ;;  %s5586_s19 = sphi %s5631_s19, %s7908_s19   ;;  %s5582_s18 = sphi %s5629_s18, %s7907_s18  }
   0x4   : > { %s5654_s24 = sadd.s32 1, %s5594_s21   ;;  %s149_s25 = sadd.s32 1, %s5590_s20 }
   0x5   : > { %s146_s26 = ssub.s32 %s5594_s21, %s5654_s24  ;;  %p159_p0 = scmp.ne.s32.totalorder %s5590_s20, %s5586_s19 }
   0x6   : > { %p147_p1 = scmp.eq.s32.totalorder %s146_s26, 0  ;;  %p160_p2 = scmp.eq.s32.totalorder %s5650_s22, 2 }
   0x7   : > { %p165_p3 = scmp.ne.s32.totalorder %s5586_s19, %s5582_s18  ;;  %p166_p4 = scmp.eq.s32.totalorder %s4740_s23, 2 }
   0x8   : > { %s5665_s27 = scalar_select %p147_p1, %s5590_s20, %s149_s25  }
   0x9   : > { %p5667_p5 = por %p160_p2, %p159_p0  ;;  %p5671_p6 = por %p166_p4, %p165_p3 }
   0xa   : > { %p4745_p7 = scmp.ge.s32.totalorder %s5594_s21, 1  ;;  %p221_p8 = scmp.lt.s32.totalorder %s5594_s21, 4 }
   0xc   : > { %p222_p9 = pnand %p4745_p7, %p221_p8 }
   0xe   : > { %225 = sbr.rel (%p222_p9) target bundleno = 1329 (0x531), region = 40 }
  0x13   : > { %v4894_v0 = vld [vmem:[%s7509_s2 + $0x4] sm:$0xf]  ;;  %vm891_vm0 = vcmask 1043456   ;;  %s5681_s7 = sshll.u32 %s5650_s22, 6  ;;  %v4959_v2 = vld [vmem:[%s7509_s2 + $0x8] sm:$0xf] }
  0x14   : > { %v893_v1 = vsel %vm891_vm0, %v4894_v0, 0  ;;  %p262_p10 = scmp.lt.s32.totalorder %s5681_s7, 255  ;;  %v1465_v3 = vsel %vm891_vm0, %v4959_v2, 0  ;;  %v4992_v4 = vld [vmem:[%s7509_s2 + $0xc] sm:$0xf]  ;;  %vm794_vm2 = vcmask 64512  }
  0x15   : > { %5431 = vmatpush.bf16.msra.mxu1 %v893_v1  ;;  %5432 = vmatpush.bf16.msra.mxu2 %v893_v1  ;;  %v530_v5 = vld [vmem:[%s7509_s2] sm:$0xf]  ;;  %v1708_v6 = vsel %vm891_vm0, %v4992_v4, 0  ;;  %v5025_v8 = vld [vmem:[%s7509_s2 + $0x10] sm:$0xf]  ;;  %s5399_s30 = sadd.s32 64, %s5681_s7 }
  0x16   : > { %5433 = vmatpush.bf16.msra.mxu3 %v893_v1  ;;  %902 = vmatpush.bf16.msra.mxu0 %v893_v1  ;;  %s263_s14 = scalar_select %p262_p10, %s5681_s7, 255  ;;  %v1129_v7 = vsel %vm891_vm0, %v530_v5, 0  ;;  %v2181_v9 = vsel %vm891_vm0, %v5025_v8, 0  ;;  %vm533_vm1 = vsmask.f32 7424  ;;  %vm1302_vm3 = vcmask 1046528  }
  0x17   : > { %p270_p11 = scmp.lt.s32.totalorder %s5399_s30, 255  ;;  %vm1945_vm4 = vsmask.f32 6400  ;;  %p278_p12 = scmp.lt.s32.totalorder %s5681_s7, 191  ;;  %vm2418_vm5 = vcmask 1045504   ;;  %vm3532_vm7 = vcmask 1044480  }
  0x18   : > { %s4748_s17 = sshll.u32 %s263_s14, 2  ;;  %vm3061_vm6 = vsmask.f32 5376  ;;  %s258_s11 = sand.u32 1, %s5586_s19  }
  0x19   : > { %1474 = vmatpush.bf16.msrb.mxu2 %v1465_v3  ;;  %1138 = vmatpush.bf16.msrb.mxu1 %v1129_v7  ;;  %s5705_s26 = scalar_lea.vmem %s7507_s0, %s4748_s17  ;;  %s7912_s30 = smov (!%p270_p11, %s5399_s30), 255 }
  0x1a   : > { %1717 = vmatpush.bf16.msrb.mxu3 %v1708_v6  ;;  %2190 = vmatpush.bf16.msrb.mxu0 %v2181_v9  ;;  %v5708_v10 = vld [vmem:[%s5705_s26 + $0x40] sm:$0xff]  ;;  %v5711_v11 = vld [vmem:[%s5705_s26 + $0x48] sm:$0xff]  ;;  %v5771_v45 = vld [vmem:[%s5705_s26 + $0x50] sm:$0xff]  ;;  %s4751_s6 = sshll.u32 %s7912_s30, 2  ;;  %s7914_s7 = smov (!%p278_p12, %s5681_s7), 191 }
  0x1b   : > { %v5218_v12 = vld [vmem:[%s5705_s26 + $0x80] sm:$0xff]  ;;  %v5219_v13 = vld [vmem:[%s5705_s26 + $0x88] sm:$0xff]  ;;  %v5718_v16 = vshll.u32 %v5708_v10, 16  ;;  %v5721_v17 = vshrl.u32 %v5708_v10, 16  ;;  %v5724_v18 = vshll.u32 %v5711_v11, 16  ;;  %v5220_v46 = vld [vmem:[%s5705_s26 + $0x90] sm:$0xff]  ;;  %s6034_s10 = scalar_lea.vmem %s7508_s1, %s4751_s6 }
  0x1c   : > { %v5226_v14 = vld [vmem:[%s5705_s26 + $0xc0] sm:$0xff]  ;;  %v5227_v15 = vld [vmem:[%s5705_s26 + $0xc8] sm:$0xff]  ;;  %v5726_v19 = vshll.u32 %v5218_v12, 16  ;;  %v5734_v22 = vshrl.u32 %v5218_v12, 16  ;;  %v5736_v23 = vshll.u32 %v5219_v13, 16  ;;  %v5228_v48 = vld [vmem:[%s5705_s26 + $0xd0] sm:$0xff] }
  0x1d   : > { %7607 = vst [vmem:[#allocation5_spill] sm:$0xff] %v5718_v16  ;;  %v5729_v20 = vld [vmem:[%s5705_s26] sm:$0xff]  ;;  %v5732_v21 = vld [vmem:[%s5705_s26 + $0x8] sm:$0xff]  ;;  %v5738_v24 = vshll.u32 %v5226_v14, 16  ;;  %v5740_v25 = vshrl.u32 %v5226_v14, 16  ;;  %v7515_v26 = vrot.slane %v5718_v16, 1 }
  0x1e   : > { %7608 = vst [vmem:[#allocation6_spill] sm:$0xff] %v5721_v17  ;;  %v608_v27 = vrot.slane %v5724_v18, 1  ;;  %v7517_v28 = vrot.slane %v5726_v19, 1  ;;  %v5745_v29 = vshll.u32 %v5227_v15, 16  ;;  %v672_v30 = vrot.slane %v5736_v23, 1  ;;  %v5778_v49 = vld [vmem:[%s5705_s26 + $0x10] sm:$0xff] }
  0x1f   : > { %7609 = vst [vmem:[#allocation7_spill] sm:$0xff] %v5724_v18  ;;  %v7516_v31 = vrot.slane %v5738_v24, 1  ;;  %v535_v32 = vshrl.u32 %v5729_v20, 16  ;;  %v537_v33 = vshll.u32 %v5729_v20, 16  ;;  %v604_v34 = vor.u32 %v5721_v17, %v7515_v26  ;;  %v5815_v6 = vld [vmem:[%s5705_s26 + $0x58] sm:$0xff]  ;;  %s4753_s25 = sshll.u32 %s7914_s7, 3 }
  0x20   : > { %7610 = vst [vmem:[#allocation8_spill] sm:$0xff] %v5734_v22  ;;  %v668_v35 = vor.u32 %v5734_v22, %v7517_v28  ;;  %v736_v36 = vrot.slane %v5745_v29, 1  ;;  %v7513_v37 = vshll.u32 %v5732_v21, 16  ;;  %v5781_v50 = vshrl.u32 %v5711_v11, 16  ;;  %v5221_v7 = vld [vmem:[%s5705_s26 + $0x98] sm:$0xff]  ;;  %s6749_s8 = scalar_lea.vmem %s7511_s4, %s4753_s25  ;;  %s4746_s12 = sshll.u32 %s258_s11, 8 }
  0x21   : > { %7611 = vst [vmem:[#allocation9_spill] sm:$0xff] %v5736_v23  ;;  %v732_v38 = vor.u32 %v5740_v25, %v7516_v31  ;;  %v539_v39 = vrot.slane %v537_v33, 1  ;;  %v609_v40 = vsel %vm533_vm1, %v604_v34, %v608_v27  ;;  %v5784_v51 = vshll.u32 %v5771_v45, 16  ;;  %v5229_v8 = vld [vmem:[%s5705_s26 + $0xd8] sm:$0xff]  ;;  %s6950_s13 = scalar_lea.vmem [#allocation2], %s4746_s12  ;;  %s5237_s16 = sshll.u32 %s5650_s22, 8 }
  0x22   : > { %7612 = vst [vmem:[#allocation10_spill] sm:$0xff] %v5738_v24  ;;  %v673_v41 = vsel %vm533_vm1, %v668_v35, %v672_v30  ;;  %v544_v42 = vrot.slane %v7513_v37, 1  ;;  %4903 = vmatmul.msk.bf16.vlgmr.msra.gmra.mxu1 %vm794_vm2, %v609_v40  ;;  %v5786_v52 = vshrl.u32 %v5219_v13, 16  ;;  %v5788_v53 = vshll.u32 %v5220_v46, 16  ;;  %v5821_v9 = vld [vmem:[%s5705_s26 + $0x18] sm:$0xff]  ;;  %v5909_v37 = vld [vmem:[%s5705_s26 + $0x28] sm:$0xff]  ;;  %s4650_s25 = scalar_lea.hbm %s7512_s5, %s5237_s16 }
  0x23   : > { %7613 = vst [vmem:[#allocation11_spill] sm:$0xff] %v5740_v25  ;;  %4911 = vmatmul.msk.bf16.vlgmr.msra.gmra.mxu2 %vm794_vm2, %v673_v41  ;;  %v737_v43 = vsel %vm533_vm1, %v732_v38, %v736_v36  ;;  %v540_v44 = vor.u32 %v539_v39, %v535_v32  ;;  %v5790_v54 = vshrl.u32 %v5227_v15, 16  ;;  %v5792_v55 = vshll.u32 %v5228_v48, 16  ;;  %s4651_s30 = sshll.u32 %s6950_s13, 4  ;;  %s4653_s6 = sshll.u32 %s4650_s25, 4  ;;  %s4652_s30 = int_to_ptr.vmem [resolvable:$true] %s4651_s30  ;;  %s4654_s6 = int_to_ptr.hbm [resolvable:$true] %s4653_s6 }
  0x24   : > { %7614 = vst [vmem:[#allocation12_spill] sm:$0xff] %v5745_v29  ;;  %4919 = vmatmul.msk.bf16.vlgmr.msra.gmra.mxu3 %vm794_vm2, %v737_v43  ;;  %v7514_v56 = vshrl.u32 %v5732_v21, 16  ;;  %v5796_v57 = vshll.u32 %v5778_v49, 16  ;;  %v612_v58 = vor.u32 %v5781_v50, %v608_v27  ;;  %v616_v59 = vrot.slane %v5784_v51, 1  ;;  %s4639_s22 = scalar_lea.sflag [#allocation3], %s258_s11  ;;  %s5552_s14 = scalar_lea.hbm %s7512_s5, 768 }
  0x25   : > { %v545_v47 = vsel %vm533_vm1, %v540_v44, %v544_v42  ;;  %7615 = vst [vmem:[#allocation13_spill] sm:$0xff] %v5781_v50  ;;  %v676_v60 = vor.u32 %v5786_v52, %v672_v30  ;;  %v680_v61 = vrot.slane %v5788_v53, 1  ;;  %v740_v62 = vor.u32 %v5790_v54, %v736_v36 }
  0x26   : > { %4895 = vmatmul.msk.bf16.vlgmr.msra.gmra.mxu0 %vm794_vm2, %v545_v47  ;;  %7616 = vst [vmem:[#allocation14_spill] sm:$0xff] %v5784_v51  ;;  %v744_v63 = vrot.slane %v5792_v55, 1  ;;  %v548_v0 = vor.u32 %v7514_v56, %v544_v42  ;;  %v552_v1 = vrot.slane %v5796_v57, 1  ;;  %v617_v2 = vsel %vm533_vm1, %v612_v58, %v616_v59  ;;  %v5222_v58 = vld [vmem:[%s5705_s26 + $0xa0] sm:$0xff] }
  0x27   : > { %7617 = vst [vmem:[#allocation15_spill] sm:$0xff] %v5786_v52  ;;  %v681_v3 = vsel %vm533_vm1, %v676_v60, %v680_v61  ;;  %v5824_v12 = vshrl.u32 %v5771_v45, 16  ;;  %v5827_v13 = vshll.u32 %v5815_v6, 16  ;;  %v5829_v14 = vshrl.u32 %v5220_v46, 16  ;;  %v5865_v60 = vld [vmem:[%s5705_s26 + $0x20] sm:$0xff] }
  0x28   : > { %7618 = vst [vmem:[#allocation16_spill] sm:$0xff] %v5788_v53  ;;  %v745_v4 = vsel %vm533_vm1, %v740_v62, %v744_v63  ;;  %v553_v5 = vsel %vm533_vm1, %v548_v0, %v552_v1  ;;  %v5831_v15 = vshll.u32 %v5221_v7, 16  ;;  %v5833_v27 = vshrl.u32 %v5228_v48, 16  ;;  %v5859_v48 = vld [vmem:[%s5705_s26 + $0x60] sm:$0xff] }
  0x29   : > { %7619 = vst [vmem:[#allocation17_spill] sm:$0xff] %v5790_v54  ;;  %v5835_v30 = vshll.u32 %v5229_v8, 16  ;;  %v5838_v32 = vshrl.u32 %v5778_v49, 16  ;;  %v5841_v33 = vshll.u32 %v5821_v9, 16  ;;  %v620_v34 = vor.u32 %v5824_v12, %v616_v59  ;;  %v5230_v59 = vld [vmem:[%s5705_s26 + $0xe0] sm:$0xff] }
  0x2a   : > { %7620 = vst [vmem:[#allocation18_spill] sm:$0xff] %v5792_v55  ;;  %v624_v35 = vrot.slane %v5827_v13, 1  ;;  %v684_v36 = vor.u32 %v5829_v14, %v680_v61  ;;  %v688_v38 = vrot.slane %v5831_v15, 1  ;;  %v748_v39 = vor.u32 %v5833_v27, %v744_v63 }
  0x2b   : > { %7621 = vst [vmem:[#allocation19_spill] sm:$0xff] %v5796_v57  ;;  %v752_v40 = vrot.slane %v5835_v30, 1  ;;  %v556_v41 = vor.u32 %v5838_v32, %v552_v1  ;;  %v560_v42 = vrot.slane %v5841_v33, 1  ;;  %v5868_v61 = vshrl.u32 %v5815_v6, 16 }
  0x2c   : > { %7622 = vst [vmem:[#allocation20_spill] sm:$0xff] %v5824_v12  ;;  %v625_v43 = vsel %vm533_vm1, %v620_v34, %v624_v35  ;;  %v689_v44 = vsel %vm533_vm1, %v684_v36, %v688_v38  ;;  %v5871_v62 = vshll.u32 %v5859_v48, 16  ;;  %v5873_v63 = vshrl.u32 %v5221_v7, 16 }
  0x2d   : > { %7623 = vst [vmem:[#allocation21_spill] sm:$0xff] %v5829_v14  ;;  %v753_v46 = vsel %vm533_vm1, %v748_v39, %v752_v40  ;;  %v561_v47 = vsel %vm533_vm1, %v556_v41, %v560_v42  ;;  %v5875_v0 = vshll.u32 %v5222_v58, 16  ;;  %v5877_v1 = vshrl.u32 %v5229_v8, 16 }
  0x2e   : > { %7624 = vst [vmem:[#allocation22_spill] sm:$0xff] %v5831_v15  ;;  %v632_v34 = vrot.slane %v5871_v62, 1  ;;  %v692_v7 = vor.u32 %v5873_v63, %v688_v38 }
  0x2f   : > { %7625 = vst [vmem:[#allocation23_spill] sm:$0xff] %v5833_v27  ;;  %v696_v8 = vrot.slane %v5875_v0, 1  ;;  %v756_v36 = vor.u32 %v5877_v1, %v752_v40  ;;  %v5903_v40 = vld [vmem:[%s5705_s26 + $0x68] sm:$0xff] }
  0x30   : > { %7626 = vst [vmem:[#allocation24_spill] sm:$0xff] %v5835_v30 }
  0x31   : > { %7627 = vst [vmem:[#allocation25_spill] sm:$0xff] %v5838_v32 }
  0x32   : > { %4904 = vmatmul.msk.bf16.gmra.mxu1 %vm794_vm2, %v617_v2  ;;  %7628 = vst [vmem:[#allocation26_spill] sm:$0xff] %v5841_v33  ;;  %v5879_v2 = vshll.u32 %v5230_v59, 16 }
  0x33   : > { %4912 = vmatmul.msk.bf16.gmra.mxu2 %vm794_vm2, %v681_v3  ;;  %7629 = vst [vmem:[#allocation27_spill] sm:$0xff] %v5873_v63  ;;  %v5882_v3 = vshrl.u32 %v5821_v9, 16 }
  0x34   : > { %4920 = vmatmul.msk.bf16.gmra.mxu3 %vm794_vm2, %v745_v4  ;;  %7630 = vst [vmem:[#allocation28_spill] sm:$0xff] %v5875_v0  ;;  %v5885_v4 = vshll.u32 %v5865_v60, 16  ;;  %v760_v39 = vrot.slane %v5879_v2, 1 }
  0x35   : > { %7631 = vst [vmem:[#allocation29_spill] sm:$0xff] %v5877_v1  ;;  %v564_v41 = vor.u32 %v5882_v3, %v560_v42  ;;  %v5231_v42 = vld [vmem:[%s5705_s26 + $0xe8] sm:$0xff] }
  0x36   : > { %4896 = vmatmul.msk.bf16.gmra.mxu0 %vm794_vm2, %v553_v5  ;;  %7632 = vst [vmem:[#allocation30_spill] sm:$0xff] %v5879_v2  ;;  %v628_v5 = vor.u32 %v5868_v61, %v624_v35  ;;  %v697_v35 = vsel %vm533_vm1, %v692_v7, %v696_v8  ;;  %v5915_v7 = vshll.u32 %v5903_v40, 16 }
  0x37   : > { %7633 = vst [vmem:[#allocation31_spill] sm:$0xff] %v5882_v3 }
  0x38   : > { %7634 = vst [vmem:[#allocation32_spill] sm:$0xff] %v5885_v4  ;;  %v640_v26 = vrot.slane %v5915_v7, 1 }
  0x42   : > { %4905 = vmatmul.msk.bf16.gmra.mxu1 %vm794_vm2, %v625_v43  ;;  %v568_v43 = vrot.slane %v5885_v4, 1 }
  0x43   : > { %4913 = vmatmul.msk.bf16.gmra.mxu2 %vm794_vm2, %v689_v44  ;;  %v633_v44 = vsel %vm533_vm1, %v628_v5, %v632_v34  ;;  %v5912_v5 = vshrl.u32 %v5859_v48, 16 }
  0x44   : > { %4921 = vmatmul.msk.bf16.gmra.mxu3 %vm794_vm2, %v753_v46  ;;  %v761_v46 = vsel %vm533_vm1, %v756_v36, %v760_v39  ;;  %v569_v38 = vsel %vm533_vm1, %v564_v41, %v568_v43  ;;  %v5917_v36 = vshrl.u32 %v5222_v58, 16  ;;  %v5921_v41 = vshrl.u32 %v5230_v59, 16 }
  0x45   : > { %v636_v56 = vor.u32 %v5912_v5, %v632_v34 }
  0x46   : > { %4897 = vmatmul.msk.bf16.gmra.mxu0 %vm794_vm2, %v561_v47  ;;  %v5223_v47 = vld [vmem:[%s5705_s26 + $0xa8] sm:$0xff]  ;;  %7635 = vst [vmem:[#allocation33_spill] sm:$0xff] %v5917_v36  ;;  %v700_v58 = vor.u32 %v5917_v36, %v696_v8  ;;  %v764_v31 = vor.u32 %v5921_v41, %v760_v39  ;;  %v5947_v39 = vld [vmem:[%s5705_s26 + $0x70] sm:$0xff] }
  0x47   : > { %7637 = vst [vmem:[#allocation35_spill] sm:$0xff] %v5921_v41  ;;  %v641_v1 = vsel %vm533_vm1, %v636_v56, %v640_v26  ;;  %v5953_v41 = vld [vmem:[%s5705_s26 + $0x30] sm:$0xff]  ;;  %v5956_v56 = vshrl.u32 %v5903_v40, 16 }
  0x49   : > { %v644_v27 = vor.u32 %v5956_v56, %v640_v26 }
  0x52   : > { %4906 = vmatmul.msk.bf16.gmra.mxu1 %vm794_vm2, %v633_v44  ;;  %v5919_v44 = vshll.u32 %v5223_v47, 16 }
  0x53   : > { %4914 = vmatmul.msk.bf16.gmra.mxu2 %vm794_vm2, %v697_v35  ;;  %v5923_v35 = vshll.u32 %v5231_v42, 16 }
  0x54   : > { %4922 = vmatmul.msk.bf16.gmra.mxu3 %vm794_vm2, %v761_v46  ;;  %7636 = vst [vmem:[#allocation34_spill] sm:$0xff] %v5919_v44  ;;  %v5926_v46 = vshrl.u32 %v5865_v60, 16  ;;  %v704_v59 = vrot.slane %v5919_v44, 1 }
  0x55   : > { %7638 = vst [vmem:[#allocation36_spill] sm:$0xff] %v5923_v35  ;;  %v768_v28 = vrot.slane %v5923_v35, 1  ;;  %v5224_v35 = vld [vmem:[%s5705_s26 + $0xb0] sm:$0xff] }
  0x56   : > { %4898 = vmatmul.msk.bf16.gmra.mxu0 %vm794_vm2, %v569_v38  ;;  %7639 = vst [vmem:[#allocation37_spill] sm:$0xff] %v5926_v46  ;;  %v5929_v38 = vshll.u32 %v5909_v37, 16  ;;  %v572_v2 = vor.u32 %v5926_v46, %v568_v43  ;;  %v705_v34 = vsel %vm533_vm1, %v700_v58, %v704_v59  ;;  %v5232_v43 = vld [vmem:[%s5705_s26 + $0xf0] sm:$0xff]  ;;  %v5963_v58 = vshll.u32 %v5224_v35, 16 }
  0x57   : > { %v769_v55 = vsel %vm533_vm1, %v764_v31, %v768_v28  ;;  %v5959_v31 = vshll.u32 %v5947_v39, 16 }
  0x58   : > { %7640 = vst [vmem:[#allocation38_spill] sm:$0xff] %v5929_v38  ;;  %v576_v30 = vrot.slane %v5929_v38, 1 }
  0x59   : > { %7642 = vst [vmem:[#allocation40_spill] sm:$0xff] %v5963_v58  ;;  %v648_v29 = vrot.slane %v5959_v31, 1 }
  0x5a   : > { %v577_v8 = vsel %vm533_vm1, %v572_v2, %v576_v30  ;;  %v5965_v2 = vshrl.u32 %v5231_v42, 16  ;;  %v712_v42 = vrot.slane %v5963_v58, 1 }
  0x5b   : > { %v649_v26 = vsel %vm533_vm1, %v644_v27, %v648_v29  ;;  %v5998_v27 = vld [vmem:[%s5705_s26 + $0x38] sm:$0xff] }
  0x5c   : > { %7643 = vst [vmem:[#allocation41_spill] sm:$0xff] %v5965_v2  ;;  %v772_v54 = vor.u32 %v5965_v2, %v768_v28  ;;  %v5991_v28 = vld [vmem:[%s5705_s26 + $0x78] sm:$0xff]  ;;  %v6015_v2 = vshrl.u32 %v5953_v41, 16 }
  0x5e   : > { %7651 = vst [vmem:[#allocation49_spill] sm:$0xff] %v6015_v2 }
  0x62   : > { %4907 = vmatmul.msk.bf16.gmra.mxu1 %vm794_vm2, %v641_v1  ;;  %v5961_v1 = vshrl.u32 %v5223_v47, 16 }
  0x63   : > { %4915 = vmatmul.msk.bf16.gmra.mxu2 %vm794_vm2, %v705_v34  ;;  %v5970_v34 = vshrl.u32 %v5909_v37, 16 }
  0x64   : > { %4923 = vmatmul.msk.bf16.gmra.mxu3 %vm794_vm2, %v769_v55  ;;  %7641 = vst [vmem:[#allocation39_spill] sm:$0xff] %v5961_v1  ;;  %v5967_v55 = vshll.u32 %v5232_v43, 16  ;;  %v708_v47 = vor.u32 %v5961_v1, %v704_v59 }
  0x65   : > { %7645 = vst [vmem:[#allocation43_spill] sm:$0xff] %v5970_v34  ;;  %v580_v44 = vor.u32 %v5970_v34, %v576_v30  ;;  %v5233_v30 = vld [vmem:[%s5705_s26 + $0xf8] sm:$0xff] }
  0x66   : > { %4899 = vmatmul.msk.bf16.gmra.mxu0 %vm794_vm2, %v577_v8  ;;  %7644 = vst [vmem:[#allocation42_spill] sm:$0xff] %v5967_v55  ;;  %v5973_v8 = vshll.u32 %v5953_v41, 16  ;;  %v776_v25 = vrot.slane %v5967_v55, 1  ;;  %v713_v36 = vsel %vm533_vm1, %v708_v47, %v712_v42  ;;  %v5225_v55 = vld [vmem:[%s5705_s26 + $0xb8] sm:$0xff]  ;;  %v6004_v47 = vshll.u32 %v5991_v28, 16 }
  0x68   : > { %7646 = vst [vmem:[#allocation44_spill] sm:$0xff] %v5973_v8  ;;  %v584_v0 = vrot.slane %v5973_v8, 1  ;;  %v777_v15 = vsel %vm533_vm1, %v772_v54, %v776_v25  ;;  %v6001_v54 = vshrl.u32 %v5947_v39, 16  ;;  %v656_v1 = vrot.slane %v6004_v47, 1 }
  0x6a   : > { %v585_v59 = vsel %vm533_vm1, %v580_v44, %v584_v0  ;;  %v6008_v44 = vshll.u32 %v5225_v55, 16  ;;  %v652_v58 = vor.u32 %v6001_v54, %v648_v29  ;;  %v588_v14 = vor.u32 %v6015_v2, %v584_v0  ;;  %v5091_v0 = vld [vmem:[%s7509_s2 + $0x18] sm:$0xf] }
  0x6c   : > { %7648 = vst [vmem:[#allocation46_spill] sm:$0xff] %v6008_v44  ;;  %v720_v63 = vrot.slane %v6008_v44, 1  ;;  %v657_v52 = vsel %vm533_vm1, %v652_v58, %v656_v1  ;;  %v5234_v58 = vld [vmem:[%s6034_s10] sm:$0xff]  ;;  %v7658_v44 = vrot.slane %v5738_v24, 1 }
  0x72   : > { %4908 = vmatmul.msk.bf16.gmra.mxu1 %vm794_vm2, %v649_v26  ;;  %v6012_v26 = vshll.u32 %v5233_v30, 16 }
  0x73   : > { %4916 = vmatmul.msk.bf16.gmra.mxu2 %vm794_vm2, %v713_v36  ;;  %v6006_v36 = vshrl.u32 %v5224_v35, 16 }
  0x74   : > { %4924 = vmatmul.msk.bf16.gmra.mxu3 %vm794_vm2, %v777_v15  ;;  %v6010_v15 = vshrl.u32 %v5232_v43, 16  ;;  %7650 = vst [vmem:[#allocation48_spill] sm:$0xff] %v6012_v26  ;;  %v784_v53 = vrot.slane %v6012_v26, 1 }
  0x75   : > { %7647 = vst [vmem:[#allocation45_spill] sm:$0xff] %v6006_v36  ;;  %v716_v35 = vor.u32 %v6006_v36, %v712_v42  ;;  %v2824_v42 = vsel %vm891_vm0, %v5091_v0, 0  ;;  %v6061_v0 = vshll.u32 %v5234_v58, 16 }
  0x76   : > { %4900 = vmatmul.msk.bf16.gmra.mxu0 %vm794_vm2, %v585_v59  ;;  %7649 = vst [vmem:[#allocation47_spill] sm:$0xff] %v6010_v15  ;;  %v6018_v59 = vshll.u32 %v5998_v27, 16  ;;  %v780_v43 = vor.u32 %v6010_v15, %v776_v25  ;;  %2833 = vmatpush.bf16.msra.mxu2 %v2824_v42  ;;  %v6064_v42 = vshrl.u32 %v5998_v27, 16 }
  0x77   : > { %v721_v22 = vsel %vm533_vm1, %v716_v35, %v720_v63  ;;  %v6054_v35 = vshrl.u32 %v5991_v28, 16  ;;  %7655 = vst [vmem:[#allocation53_spill] sm:$0xff] %v6061_v0 }
  0x78   : > { %7652 = vst [vmem:[#allocation50_spill] sm:$0xff] %v6018_v59  ;;  %v592_v23 = vrot.slane %v6018_v59, 1  ;;  %v785_v29 = vsel %vm533_vm1, %v780_v43, %v784_v53  ;;  %v6056_v43 = vshrl.u32 %v5225_v55, 16 }
  0x79   : > { %7656 = vst [vmem:[#allocation54_spill] sm:$0xff] %v6064_v42  ;;  %v660_v26 = vor.u32 %v6054_v35, %v656_v1 }
  0x7a   : > { %v593_v25 = vsel %vm533_vm1, %v588_v14, %v592_v23  ;;  %v5058_v14 = vld [vmem:[%s7509_s2 + $0x14] sm:$0xf]  ;;  %7653 = vst [vmem:[#allocation51_spill] sm:$0xff] %v6056_v43  ;;  %v724_v55 = vor.u32 %v6056_v43, %v720_v63  ;;  %v596_v58 = vor.u32 %v6064_v42, %v592_v23  ;;  %v7660_v23 = vshrl.u32 %v5732_v21, 16 }
  0x7c   : > { %v729_v36 = vsel %vm533_vm1, %v724_v55, %v7658_v44  ;;  %v1949_v55 = vrot.slane %v5838_v32, 1 }
  0x82   : > { %4909 = vmatmul.msk.bf16.gmra.mxu1 %vm794_vm2, %v657_v52  ;;  %v5124_v52 = vld [vmem:[%s7509_s2 + $0x1c] sm:$0xf] }
  0x83   : > { %4917 = vmatmul.msk.bf16.gmra.mxu2 %vm794_vm2, %v721_v22  ;;  %v3295_v22 = vsel %vm891_vm0, %v5124_v52, 0  ;;  %v5157_v52 = vld [vmem:[%s7509_s2 + $0x20] sm:$0xf] }
  0x84   : > { %4925 = vmatmul.msk.bf16.gmra.mxu3 %vm794_vm2, %v785_v29  ;;  %v2581_v29 = vsel %vm891_vm0, %v5058_v14, 0 }
  0x85   : > { %3304 = vmatpush.bf16.msra.mxu3 %v3295_v22  ;;  %2590 = vmatpush.bf16.msra.mxu1 %v2581_v29  ;;  %v3695_v22 = vsel %vm891_vm0, %v5157_v52, 0  ;;  %v7657_v29 = vrot.slane %v5726_v19, 1  ;;  %v7661_v52 = vshll.u32 %v5732_v21, 16 }
  0x86   : > { %4901 = vmatmul.msk.bf16.gmra.mxu0 %vm794_vm2, %v593_v25  ;;  %v6059_v25 = vshrl.u32 %v5233_v30, 16  ;;  %v792_v30 = vrot.slane %v6061_v0, 1 }
  0x87   : > { %3704 = vmatpush.bf16.msra.mxu0 %v3695_v22  ;;  %v665_v15 = vsel %vm533_vm1, %v660_v26, %v7657_v29  ;;  %v1946_v26 = vrot.slane %v7660_v23, 1  ;;  %v1947_v44 = vrot.slane %v7661_v52, 2  ;;  %v1304_v22 = vrot.slane %v5732_v21, 1 }
  0x88   : > { %7654 = vst [vmem:[#allocation52_spill] sm:$0xff] %v6059_v25  ;;  %v788_v14 = vor.u32 %v6059_v25, %v784_v53  ;;  %v7659_v53 = vrot.slane %v5718_v16, 1 }
  0x8a   : > { %v793_v1 = vsel %vm533_vm1, %v788_v14, %v792_v30  ;;  %v601_v63 = vsel %vm533_vm1, %v596_v58, %v7659_v53  ;;  %v1306_v14 = vrot.slane %v5778_v49, 1  ;;  %v1948_v30 = vor.u32 %v1947_v44, %v1946_v26 }
  0x8c   : > { %v1307_v53 = vsel %vm1302_vm3, %v1304_v22, %v1306_v14 }
  0x92   : > { %4910 = vmatmul.msk.bf16.gmra.mxu1 %vm794_vm2, %v665_v15  ;;  %v1950_v15 = vrot.slane %v5796_v57, 2 }
  0x93   : > { %4918 = vmatmul.msk.bf16.gmra.mxu2 %vm794_vm2, %v729_v36  ;;  %v1303_v36 = vrot.slane %v5729_v20, 1 }
  0x94   : > { %4926 = vmatmul.msk.bf16.gmra.mxu3 %vm794_vm2, %v793_v1  ;;  %v1951_v58 = vor.u32 %v1950_v15, %v1949_v55  ;;  %v1953_v15 = vrot.slane %v5882_v3, 1 }
  0x95   : > { %v1305_v1 = vsel %vm1302_vm3, %v1303_v36, %v1304_v22  ;;  %v1308_v36 = vrot.slane %v5821_v9, 1 }
  0x96   : > { %4902 = vmatmul.msk.bf16.gmra.mxu0 %vm794_vm2, %v601_v63  ;;  %v1952_v23 = vsel %vm1945_vm4, %v1948_v30, %v1951_v58 }
  0x97   : > { %v1309_v57 = vsel %vm1302_vm3, %v1306_v14, %v1308_v36 }
  0x9f   : > { %v6098_v29 = vpop.f32.mrf.mxu1 }
  0xa2   : > { %4927 = vmatmul.msk.bf16.vlgmr.msrb.gmra.mxu1 %vm794_vm2, %v5729_v20  ;;  %v1954_v20 = vrot.slane %v5841_v33, 2 }
  0xa3   : > { %v6102_v63 = vpop.f32.mrf.mxu0  ;;  %4960 = vmatmul.msk.bf16.vlgmr.msrb.gmra.mxu2 %vm794_vm2, %v1305_v1 }
  0xa4   : > { %4993 = vmatmul.msk.bf16.vlgmr.msrb.gmra.mxu3 %vm794_vm2, %v1307_v53  ;;  %v1955_v1 = vor.u32 %v1954_v20, %v1953_v15 }
  0xa6   : > { %5026 = vmatmul.msk.bf16.vlgmr.msrb.gmra.mxu0 %vm794_vm2, %v1952_v23  ;;  %v6110_v26 = vpop.f32.mrf.mxu2  ;;  %v1956_v33 = vsel %vm1945_vm4, %v1951_v58, %v1955_v1 }
  0xa7   : > { %7662 = vst [vmem:[#allocation55_spill] sm:$0xff] %v6110_v26  ;;  %v6112_v52 = vpop.f32.mrf.mxu3  ;;  %v6114_v44 = vpop.f32.mrf.mxu1 }
  0xa8   : > { %7663 = vst [vmem:[#allocation56_spill] sm:$0xff] %v6112_v52 }
  0xab   : > { %v6116_v55 = vpop.f32.mrf.mxu0 }
  0xae   : > { %v6121_v22 = vpop.f32.mrf.mxu2 }
  0xaf   : > { %7664 = vst [vmem:[#allocation57_spill] sm:$0xff] %v6121_v22  ;;  %v6123_v30 = vpop.f32.mrf.mxu3  ;;  %v6125_v23 = vpop.f32.mrf.mxu1 }
  0xb0   : > { %7665 = vst [vmem:[#allocation58_spill] sm:$0xff] %v6123_v30  ;;  %v1957_v30 = vrot.slane %v5926_v46, 1 }
  0xb2   : > { %4928 = vmatmul.msk.bf16.gmra.mxu1 %vm794_vm2, %v5732_v21  ;;  %v1958_v21 = vrot.slane %v5885_v4, 2 }
  0xb3   : > { %v6128_v52 = vpop.f32.mrf.mxu0  ;;  %4961 = vmatmul.msk.bf16.gmra.mxu2 %vm794_vm2, %v1307_v53  ;;  %v1310_v53 = vrot.slane %v5865_v60, 1 }
  0xb4   : > { %4994 = vmatmul.msk.bf16.gmra.mxu3 %vm794_vm2, %v1309_v57  ;;  %v1959_v0 = vor.u32 %v1958_v21, %v1957_v30 }
  0xb5   : > { %v1311_v25 = vsel %vm1302_vm3, %v1308_v36, %v1310_v53 }
  0xb6   : > { %5027 = vmatmul.msk.bf16.gmra.mxu0 %vm794_vm2, %v1956_v33  ;;  %v6136_v3 = vpop.f32.mrf.mxu2  ;;  %v1960_v4 = vsel %vm1945_vm4, %v1955_v1, %v1959_v0 }
  0xb7   : > { %7666 = vst [vmem:[#allocation59_spill] sm:$0xff] %v6136_v3  ;;  %v6138_v15 = vpop.f32.mrf.mxu3  ;;  %v6140_v20 = vpop.f32.mrf.mxu1 }
  0xb8   : > { %7667 = vst [vmem:[#allocation60_spill] sm:$0xff] %v6138_v15 }
  0xbb   : > { %v6142_v14 = vpop.f32.mrf.mxu0 }
  0xbe   : > { %v6147_v32 = vpop.f32.mrf.mxu2 }
  0xbf   : > { %7668 = vst [vmem:[#allocation61_spill] sm:$0xff] %v6147_v32  ;;  %v6149_v58 = vpop.f32.mrf.mxu3  ;;  %v6151_v33 = vpop.f32.mrf.mxu1 }
  0xc0   : > { %7669 = vst [vmem:[#allocation62_spill] sm:$0xff] %v6149_v58  ;;  %v1961_v58 = vrot.slane %v5970_v34, 1 }
  0xc2   : > { %4929 = vmatmul.msk.bf16.gmra.mxu1 %vm794_vm2, %v5778_v49  ;;  %v1962_v49 = vrot.slane %v5929_v38, 2 }
  0xc3   : > { %v6154_v15 = vpop.f32.mrf.mxu0  ;;  %4962 = vmatmul.msk.bf16.gmra.mxu2 %vm794_vm2, %v1309_v57  ;;  %v1312_v57 = vrot.slane %v5909_v37, 1 }
  0xc4   : > { %4995 = vmatmul.msk.bf16.gmra.mxu3 %vm794_vm2, %v1311_v25  ;;  %v1963_v3 = vor.u32 %v1962_v49, %v1961_v58 }
  0xc6   : > { %5028 = vmatmul.msk.bf16.gmra.mxu0 %vm794_vm2, %v1960_v4  ;;  %v6162_v46 = vpop.f32.mrf.mxu2  ;;  %v1964_v38 = vsel %vm1945_vm4, %v1959_v0, %v1963_v3 }
  0xc7   : > { %7670 = vst [vmem:[#allocation63_spill] sm:$0xff] %v6162_v46  ;;  %v6164_v30 = vpop.f32.mrf.mxu3  ;;  %v6166_v21 = vpop.f32.mrf.mxu1  ;;  %v1313_v46 = vsel %vm1302_vm3, %v1310_v53, %v1312_v57 }
  0xc8   : > { %7671 = vst [vmem:[#allocation64_spill] sm:$0xff] %v6164_v30 }
  0xcb   : > { %v6168_v36 = vpop.f32.mrf.mxu0 }
  0xce   : > { %v6173_v32 = vpop.f32.mrf.mxu2 }
  0xcf   : > { %7672 = vst [vmem:[#allocation65_spill] sm:$0xff] %v6173_v32  ;;  %v6175_v1 = vpop.f32.mrf.mxu3  ;;  %v6177_v4 = vpop.f32.mrf.mxu1 }
  0xd0   : > { %7673 = vst [vmem:[#allocation66_spill] sm:$0xff] %v6175_v1  ;;  %v1965_v1 = vrot.slane %v6015_v2, 1 }
  0xd2   : > { %4930 = vmatmul.msk.bf16.gmra.mxu1 %vm794_vm2, %v5821_v9  ;;  %v1966_v9 = vrot.slane %v5973_v8, 2 }
  0xd3   : > { %v6180_v30 = vpop.f32.mrf.mxu0  ;;  %4963 = vmatmul.msk.bf16.gmra.mxu2 %vm794_vm2, %v1311_v25  ;;  %v1314_v25 = vrot.slane %v5953_v41, 1 }
  0xd4   : > { %4996 = vmatmul.msk.bf16.gmra.mxu3 %vm794_vm2, %v1313_v46  ;;  %v1967_v22 = vor.u32 %v1966_v9, %v1965_v1 }
  0xd6   : > { %5029 = vmatmul.msk.bf16.gmra.mxu0 %vm794_vm2, %v1964_v38  ;;  %v6188_v34 = vpop.f32.mrf.mxu2  ;;  %v1968_v8 = vsel %vm1945_vm4, %v1963_v3, %v1967_v22 }
  0xd7   : > { %7674 = vst [vmem:[#allocation67_spill] sm:$0xff] %v6188_v34  ;;  %v6190_v58 = vpop.f32.mrf.mxu3  ;;  %v6192_v49 = vpop.f32.mrf.mxu1  ;;  %v1315_v34 = vsel %vm1302_vm3, %v1312_v57, %v1314_v25 }
  0xd8   : > { %7675 = vst [vmem:[#allocation68_spill] sm:$0xff] %v6190_v58 }
  0xdb   : > { %v6194_v53 = vpop.f32.mrf.mxu0 }
  0xde   : > { %v6199_v32 = vpop.f32.mrf.mxu2 }
  0xdf   : > { %7676 = vst [vmem:[#allocation69_spill] sm:$0xff] %v6199_v32  ;;  %v6201_v0 = vpop.f32.mrf.mxu3  ;;  %v6203_v38 = vpop.f32.mrf.mxu1 }
  0xe0   : > { %7677 = vst [vmem:[#allocation70_spill] sm:$0xff] %v6201_v0  ;;  %v1969_v0 = vrot.slane %v6064_v42, 1 }
  0xe2   : > { %4931 = vmatmul.msk.bf16.gmra.mxu1 %vm794_vm2, %v5865_v60  ;;  %v1970_v60 = vrot.slane %v6018_v59, 2 }
  0xe3   : > { %v6206_v58 = vpop.f32.mrf.mxu0  ;;  %4964 = vmatmul.msk.bf16.gmra.mxu2 %vm794_vm2, %v1313_v46  ;;  %v1316_v46 = vrot.slane %v5998_v27, 1 }
  0xe4   : > { %4997 = vmatmul.msk.bf16.gmra.mxu3 %vm794_vm2, %v1315_v34  ;;  %v1971_v26 = vor.u32 %v1970_v60, %v1969_v0 }
  0xe6   : > { %5030 = vmatmul.msk.bf16.gmra.mxu0 %vm794_vm2, %v1968_v8  ;;  %v6214_v2 = vpop.f32.mrf.mxu2  ;;  %v1972_v59 = vsel %vm1945_vm4, %v1967_v22, %v1971_v26 }
  0xe7   : > { %7678 = vst [vmem:[#allocation71_spill] sm:$0xff] %v6214_v2  ;;  %v6216_v1 = vpop.f32.mrf.mxu3  ;;  %v6218_v9 = vpop.f32.mrf.mxu1  ;;  %v1317_v2 = vsel %vm1302_vm3, %v1314_v25, %v1316_v46 }
  0xe8   : > { %7679 = vst [vmem:[#allocation72_spill] sm:$0xff] %v6216_v1 }
  0xe9   : > { %7680 = vst [vmem:[#allocation73_spill] sm:$0xff] %v6218_v9 }
  0xeb   : > { %v6220_v57 = vpop.f32.mrf.mxu0 }
  0xee   : > { %v6225_v32 = vpop.f32.mrf.mxu2 }
  0xef   : > { %7681 = vst [vmem:[#allocation74_spill] sm:$0xff] %v6225_v32  ;;  %v6227_v3 = vpop.f32.mrf.mxu3  ;;  %v6229_v8 = vpop.f32.mrf.mxu1 }
  0xf0   : > { %7682 = vst [vmem:[#allocation75_spill] sm:$0xff] %v6227_v3  ;;  %v1973_v3 = vrot.slane %v5721_v17, 1 }
  0xf1   : > { %7683 = vst [vmem:[#allocation76_spill] sm:$0xff] %v6229_v8 }
  0xf2   : > { %4932 = vmatmul.msk.bf16.gmra.mxu1 %vm794_vm2, %v5909_v37  ;;  %v1974_v37 = vrot.slane %v5718_v16, 2 }
  0xf3   : > { %v6232_v1 = vpop.f32.mrf.mxu0  ;;  %4965 = vmatmul.msk.bf16.gmra.mxu2 %vm794_vm2, %v1315_v34  ;;  %v1318_v34 = vrot.slane %v5708_v10, 1 }
  0xf4   : > { %4998 = vmatmul.msk.bf16.gmra.mxu3 %vm794_vm2, %v1317_v2  ;;  %v1975_v24 = vor.u32 %v1974_v37, %v1973_v3 }
  0xf6   : > { %5031 = vmatmul.msk.bf16.gmra.mxu0 %vm794_vm2, %v1972_v59  ;;  %v6240_v42 = vpop.f32.mrf.mxu2  ;;  %v1976_v16 = vsel %vm1945_vm4, %v1971_v26, %v1975_v24 }
  0xf7   : > { %7684 = vst [vmem:[#allocation77_spill] sm:$0xff] %v6240_v42  ;;  %v6242_v0 = vpop.f32.mrf.mxu3  ;;  %v6244_v60 = vpop.f32.mrf.mxu1  ;;  %v1319_v42 = vsel %vm1302_vm3, %v1316_v46, %v1318_v34 }
  0xf8   : > { %7685 = vst [vmem:[#allocation78_spill] sm:$0xff] %v6242_v0 }
  0xf9   : > { %7686 = vst [vmem:[#allocation79_spill] sm:$0xff] %v6244_v60 }
  0xfb   : > { %v6246_v25 = vpop.f32.mrf.mxu0 }
  0xfe   : > { %v6251_v32 = vpop.f32.mrf.mxu2 }
  0xff   : > { %7687 = vst [vmem:[#allocation80_spill] sm:$0xff] %v6251_v32  ;;  %v6253_v22 = vpop.f32.mrf.mxu3  ;;  %v6255_v59 = vpop.f32.mrf.mxu1 }
 0x100   : > { %7688 = vst [vmem:[#allocation81_spill] sm:$0xff] %v6253_v22  ;;  %v1977_v22 = vrot.slane %v5781_v50, 1 }
 0x101   : > { %7689 = vst [vmem:[#allocation82_spill] sm:$0xff] %v6255_v59 }
 0x102   : > { %4933 = vmatmul.msk.bf16.gmra.mxu1 %vm794_vm2, %v5953_v41  ;;  %v1978_v41 = vrot.slane %v5724_v18, 2 }
 0x103   : > { %v6258_v0 = vpop.f32.mrf.mxu0  ;;  %4966 = vmatmul.msk.bf16.gmra.mxu2 %vm794_vm2, %v1317_v2  ;;  %v1320_v2 = vrot.slane %v5711_v11, 1 }
 0x104   : > { %4999 = vmatmul.msk.bf16.gmra.mxu3 %vm794_vm2, %v1319_v42  ;;  %v1979_v59 = vor.u32 %v1978_v41, %v1977_v22 }
 0x106   : > { %5032 = vmatmul.msk.bf16.gmra.mxu0 %vm794_vm2, %v1976_v16  ;;  %v6266_v17 = vpop.f32.mrf.mxu2  ;;  %v1980_v18 = vsel %vm1945_vm4, %v1975_v24, %v1979_v59 }
 0x107   : > { %7690 = vst [vmem:[#allocation83_spill] sm:$0xff] %v6266_v17  ;;  %v6268_v3 = vpop.f32.mrf.mxu3  ;;  %v6270_v37 = vpop.f32.mrf.mxu1  ;;  %v1321_v17 = vsel %vm1302_vm3, %v1318_v34, %v1320_v2 }
 0x108   : > { %7691 = vst [vmem:[#allocation84_spill] sm:$0xff] %v6268_v3 }
 0x109   : > { %7692 = vst [vmem:[#allocation85_spill] sm:$0xff] %v6270_v37 }
 0x10b   : > { %v6272_v46 = vpop.f32.mrf.mxu0 }
 0x10e   : > { %v6277_v32 = vpop.f32.mrf.mxu2 }
 0x10f   : > { %7693 = vst [vmem:[#allocation86_spill] sm:$0xff] %v6277_v32  ;;  %v6279_v26 = vpop.f32.mrf.mxu3  ;;  %v6281_v16 = vpop.f32.mrf.mxu1 }
 0x110   : > { %7694 = vst [vmem:[#allocation87_spill] sm:$0xff] %v6279_v26  ;;  %v1981_v26 = vrot.slane %v5824_v12, 1 }
 0x111   : > { %7695 = vst [vmem:[#allocation88_spill] sm:$0xff] %v6281_v16 }
 0x112   : > { %4934 = vmatmul.msk.bf16.gmra.mxu1 %vm794_vm2, %v5998_v27  ;;  %v1982_v27 = vrot.slane %v5784_v51, 2 }
 0x113   : > { %v6284_v3 = vpop.f32.mrf.mxu0  ;;  %4967 = vmatmul.msk.bf16.gmra.mxu2 %vm794_vm2, %v1319_v42  ;;  %v1322_v42 = vrot.slane %v5771_v45, 1 }
 0x114   : > { %5000 = vmatmul.msk.bf16.gmra.mxu3 %vm794_vm2, %v1321_v17  ;;  %v1983_v16 = vor.u32 %v1982_v27, %v1981_v26 }
 0x116   : > { %5033 = vmatmul.msk.bf16.gmra.mxu0 %vm794_vm2, %v1980_v18  ;;  %v6292_v50 = vpop.f32.mrf.mxu2 }
 0x117   : > { %7696 = vst [vmem:[#allocation89_spill] sm:$0xff] %v6292_v50  ;;  %v6294_v22 = vpop.f32.mrf.mxu3  ;;  %v6296_v41 = vpop.f32.mrf.mxu1  ;;  %v1323_v50 = vsel %vm1302_vm3, %v1320_v2, %v1322_v42 }
 0x118   : > { %7697 = vst [vmem:[#allocation90_spill] sm:$0xff] %v6294_v22  ;;  %v1984_v22 = vsel %vm1945_vm4, %v1979_v59, %v1983_v16  ;;  %v1324_v59 = vrot.slane %v5815_v6, 1 }
 0x119   : > { %7698 = vst [vmem:[#allocation91_spill] sm:$0xff] %v6296_v41  ;;  %v1985_v41 = vrot.slane %v5868_v61, 1 }
 0x11b   : > { %v6298_v34 = vpop.f32.mrf.mxu0 }
 0x11e   : > { %v6303_v32 = vpop.f32.mrf.mxu2 }
 0x11f   : > { %7699 = vst [vmem:[#allocation92_spill] sm:$0xff] %v6303_v32  ;;  %v6305_v24 = vpop.f32.mrf.mxu3  ;;  %v1140_v18 = vpop.f32.mrf.mxu1 }
 0x120   : > { %7700 = vst [vmem:[#allocation93_spill] sm:$0xff] %v6305_v24  ;;  %v1141_v51 = vadd.f32 %v1140_v18, %v6102_v63 }
 0x122   : > { %4935 = vmatmul.msk.bf16.gmra.mxu1 %vm794_vm2, %v5708_v10  ;;  %v1986_v10 = vrot.slane %v5827_v13, 2 }
 0x123   : > { %v2192_v37 = vpop.f32.mrf.mxu0  ;;  %4968 = vmatmul.msk.bf16.gmra.mxu2 %vm794_vm2, %v1321_v17 }
 0x124   : > { %5001 = vmatmul.msk.bf16.gmra.mxu3 %vm794_vm2, %v1323_v50 }
 0x126   : > { %5034 = vmatmul.msk.bf16.gmra.mxu0 %vm794_vm2, %v1984_v22  ;;  %v1476_v12 = vpop.f32.mrf.mxu2  ;;  %v1987_v22 = vor.u32 %v1986_v10, %v1985_v41 }
 0x127   : > { %v1636_v24 = vadd.f32 %v1476_v12, %v1141_v51  ;;  %v1719_v26 = vpop.f32.mrf.mxu3  ;;  %v1142_v27 = vpop.f32.mrf.mxu1  ;;  %v1325_v12 = vsel %vm1302_vm3, %v1322_v42, %v1324_v59 }
 0x128   : > { %v1143_v17 = vadd.f32 %v1142_v27, %v6116_v55 }
 0x129   : > { %v1879_v32 = vadd.f32 %v1719_v26, %v1636_v24 }
 0x12b   : > { %v2194_v2 = vpop.f32.mrf.mxu0  ;;  %v6317_v60 = vadd.f32 %v2192_v37, %v1879_v32  ;;  %v1988_v32 = vsel %vm1945_vm4, %v1983_v16, %v1987_v22 }
 0x12e   : > { %v1478_v8 = vpop.f32.mrf.mxu2 }
 0x12f   : > { %v1637_v63 = vadd.f32 %v1478_v8, %v1143_v17  ;;  %v1721_v18 = vpop.f32.mrf.mxu3  ;;  %v1145_v9 = vpop.f32.mrf.mxu1 }
 0x130   : > { %v1146_v55 = vadd.f32 %v1145_v9, %v6128_v52 }
 0x131   : > { %v1880_v51 = vadd.f32 %v1721_v18, %v1637_v63 }
 0x132   : > { %4936 = vmatmul.msk.bf16.gmra.mxu1 %vm794_vm2, %v5711_v11  ;;  %v1989_v11 = vrot.slane %v5912_v5, 1 }
 0x133   : > { %v2197_v24 = vpop.f32.mrf.mxu0  ;;  %4969 = vmatmul.msk.bf16.gmra.mxu2 %vm794_vm2, %v1323_v50  ;;  %v6326_v37 = vadd.f32 %v2194_v2, %v1880_v51  ;;  %v1990_v50 = vrot.slane %v5871_v62, 2  ;;  %v1326_v2 = vrot.slane %v5859_v48, 1 }
 0x134   : > { %5002 = vmatmul.msk.bf16.gmra.mxu3 %vm794_vm2, %v1325_v12 }
 0x135   : > { %v1991_v18 = vor.u32 %v1990_v50, %v1989_v11 }
 0x136   : > { %5035 = vmatmul.msk.bf16.gmra.mxu0 %vm794_vm2, %v1988_v32  ;;  %v1481_v8 = vpop.f32.mrf.mxu2 }
 0x137   : > { %v1638_v41 = vadd.f32 %v1481_v8, %v1146_v55  ;;  %v1724_v26 = vpop.f32.mrf.mxu3  ;;  %v1147_v42 = vpop.f32.mrf.mxu1  ;;  %v1327_v55 = vsel %vm1302_vm3, %v1324_v59, %v1326_v2 }
 0x138   : > { %v1148_v16 = vadd.f32 %v1147_v42, %v6142_v14 }
 0x139   : > { %v1881_v27 = vadd.f32 %v1724_v26, %v1638_v41 }
 0x13b   : > { %v2199_v10 = vpop.f32.mrf.mxu0  ;;  %v6333_v17 = vadd.f32 %v2197_v24, %v1881_v27  ;;  %v1992_v24 = vsel %vm1945_vm4, %v1987_v22, %v1991_v18 }
 0x13e   : > { %v1483_v63 = vpop.f32.mrf.mxu2 }
 0x13f   : > { %v1639_v52 = vadd.f32 %v1483_v63, %v1148_v16  ;;  %v1726_v9 = vpop.f32.mrf.mxu3  ;;  %v1150_v51 = vpop.f32.mrf.mxu1 }
 0x140   : > { %v1151_v14 = vadd.f32 %v1150_v51, %v6154_v15 }
 0x141   : > { %v1882_v32 = vadd.f32 %v1726_v9, %v1639_v52 }
 0x142   : > { %4937 = vmatmul.msk.bf16.gmra.mxu1 %vm794_vm2, %v5771_v45  ;;  %v1993_v45 = vrot.slane %v5956_v56, 1 }
 0x143   : > { %v2202_v8 = vpop.f32.mrf.mxu0  ;;  %4970 = vmatmul.msk.bf16.gmra.mxu2 %vm794_vm2, %v1325_v12  ;;  %v6342_v41 = vadd.f32 %v2199_v10, %v1882_v32  ;;  %v1994_v12 = vrot.slane %v5915_v7, 2  ;;  %v1328_v10 = vrot.slane %v5903_v40, 1 }
 0x144   : > { %5003 = vmatmul.msk.bf16.gmra.mxu3 %vm794_vm2, %v1327_v55 }
 0x145   : > { %v1995_v9 = vor.u32 %v1994_v12, %v1993_v45 }
 0x146   : > { %5036 = vmatmul.msk.bf16.gmra.mxu0 %vm794_vm2, %v1992_v24  ;;  %v1486_v26 = vpop.f32.mrf.mxu2  ;;  %v1329_v24 = vsel %vm1302_vm3, %v1326_v2, %v1328_v10 }
 0x147   : > { %v1640_v42 = vadd.f32 %v1486_v26, %v1151_v14  ;;  %v1729_v27 = vpop.f32.mrf.mxu3  ;;  %v1152_v59 = vpop.f32.mrf.mxu1 }
 0x148   : > { %v1153_v22 = vadd.f32 %v1152_v59, %v6168_v36 }
 0x149   : > { %v1883_v11 = vadd.f32 %v1729_v27, %v1640_v42 }
 0x14b   : > { %v2204_v50 = vpop.f32.mrf.mxu0  ;;  %v6349_v16 = vadd.f32 %v2202_v8, %v1883_v11  ;;  %v1996_v8 = vsel %vm1945_vm4, %v1991_v18, %v1995_v9 }
 0x14e   : > { %v1488_v63 = vpop.f32.mrf.mxu2 }
 0x14f   : > { %v1641_v15 = vadd.f32 %v1488_v63, %v1153_v22  ;;  %v1731_v52 = vpop.f32.mrf.mxu3  ;;  %v1155_v51 = vpop.f32.mrf.mxu1 }
 0x150   : > { %v1156_v36 = vadd.f32 %v1155_v51, %v6180_v30 }
 0x151   : > { %v1884_v32 = vadd.f32 %v1731_v52, %v1641_v15 }
 0x152   : > { %4938 = vmatmul.msk.bf16.gmra.mxu1 %vm794_vm2, %v5815_v6  ;;  %v1997_v6 = vrot.slane %v6001_v54, 1 }
 0x153   : > { %v2207_v14 = vpop.f32.mrf.mxu0  ;;  %4971 = vmatmul.msk.bf16.gmra.mxu2 %vm794_vm2, %v1327_v55  ;;  %v6358_v26 = vadd.f32 %v2204_v50, %v1884_v32  ;;  %v1998_v55 = vrot.slane %v5959_v31, 2  ;;  %v1330_v50 = vrot.slane %v5947_v39, 1 }
 0x154   : > { %5004 = vmatmul.msk.bf16.gmra.mxu3 %vm794_vm2, %v1329_v24 }
 0x155   : > { %v1999_v15 = vor.u32 %v1998_v55, %v1997_v6  ;;  %v1331_v32 = vsel %vm1302_vm3, %v1328_v10, %v1330_v50 }
 0x156   : > { %5037 = vmatmul.msk.bf16.gmra.mxu0 %vm794_vm2, %v1996_v8  ;;  %v1491_v42 = vpop.f32.mrf.mxu2 }
 0x157   : > { %v1642_v27 = vadd.f32 %v1491_v42, %v1156_v36  ;;  %v1734_v59 = vpop.f32.mrf.mxu3  ;;  %v1157_v2 = vpop.f32.mrf.mxu1 }
 0x158   : > { %v1158_v18 = vadd.f32 %v1157_v2, %v6194_v53 }
 0x159   : > { %v1885_v11 = vadd.f32 %v1734_v59, %v1642_v27 }
 0x15b   : > { %v2209_v45 = vpop.f32.mrf.mxu0  ;;  %v6365_v12 = vadd.f32 %v2207_v14, %v1885_v11  ;;  %v2000_v14 = vsel %vm1945_vm4, %v1995_v9, %v1999_v15 }
 0x15e   : > { %v1493_v22 = vpop.f32.mrf.mxu2 }
 0x15f   : > { %v1643_v30 = vadd.f32 %v1493_v22, %v1158_v18  ;;  %v1736_v63 = vpop.f32.mrf.mxu3  ;;  %v1160_v52 = vpop.f32.mrf.mxu1 }
 0x160   : > { %v1161_v53 = vadd.f32 %v1160_v52, %v6206_v58 }
 0x161   : > { %v1886_v51 = vadd.f32 %v1736_v63, %v1643_v30 }
 0x162   : > { %4939 = vmatmul.msk.bf16.gmra.mxu1 %vm794_vm2, %v5859_v48  ;;  %v2001_v48 = vrot.slane %v6054_v35, 1 }
 0x163   : > { %v2212_v8 = vpop.f32.mrf.mxu0  ;;  %4972 = vmatmul.msk.bf16.gmra.mxu2 %vm794_vm2, %v1329_v24  ;;  %v6374_v36 = vadd.f32 %v2209_v45, %v1886_v51  ;;  %v2002_v24 = vrot.slane %v6004_v47, 2  ;;  %v1332_v45 = vrot.slane %v5991_v28, 1 }
 0x164   : > { %5005 = vmatmul.msk.bf16.gmra.mxu3 %vm794_vm2, %v1331_v32 }
 0x165   : > { %v2003_v22 = vor.u32 %v2002_v24, %v2001_v48  ;;  %v1333_v52 = vsel %vm1302_vm3, %v1330_v50, %v1332_v45 }
 0x166   : > { %5038 = vmatmul.msk.bf16.gmra.mxu0 %vm794_vm2, %v2000_v14  ;;  %v1496_v42 = vpop.f32.mrf.mxu2 }
 0x167   : > { %v1644_v27 = vadd.f32 %v1496_v42, %v1161_v53  ;;  %v1739_v59 = vpop.f32.mrf.mxu3  ;;  %v1162_v10 = vpop.f32.mrf.mxu1 }
 0x168   : > { %v1163_v9 = vadd.f32 %v1162_v10, %v6220_v57 }
 0x169   : > { %v1887_v2 = vadd.f32 %v1739_v59, %v1644_v27 }
 0x16b   : > { %v2214_v11 = vpop.f32.mrf.mxu0  ;;  %v6381_v6 = vadd.f32 %v2212_v8, %v1887_v2  ;;  %v2004_v8 = vsel %vm1945_vm4, %v1999_v15, %v2003_v22 }
 0x16e   : > { %v1498_v55 = vpop.f32.mrf.mxu2 }
 0x16f   : > { %v1645_v58 = vadd.f32 %v1498_v55, %v1163_v9  ;;  %v1741_v18 = vpop.f32.mrf.mxu3  ;;  %v1165_v30 = vpop.f32.mrf.mxu1 }
 0x170   : > { %v1166_v14 = vadd.f32 %v1165_v30, %v6232_v1 }
 0x171   : > { %v1888_v63 = vadd.f32 %v1741_v18, %v1645_v58 }
 0x172   : > { %4940 = vmatmul.msk.bf16.gmra.mxu1 %vm794_vm2, %v5903_v40  ;;  %v7701_v40 = vld [vmem:[#allocation8_spill] sm:$0xff] }
 0x173   : > { %v2217_v51 = vpop.f32.mrf.mxu0  ;;  %4973 = vmatmul.msk.bf16.gmra.mxu2 %vm794_vm2, %v1331_v32  ;;  %v6390_v57 = vadd.f32 %v2214_v11, %v1888_v63  ;;  %v2005_v2 = vrot.slane %v7701_v40, 1  ;;  %v2006_v32 = vrot.slane %v5726_v19, 2  ;;  %v6401_v11 = vld [vmem:[%s5705_s26 + $0x80] sm:$0xff] }
 0x174   : > { %5006 = vmatmul.msk.bf16.gmra.mxu3 %vm794_vm2, %v1333_v52  ;;  %v1334_v1 = vrot.slane %v6401_v11, 1 }
 0x175   : > { %v2007_v58 = vor.u32 %v2006_v32, %v2005_v2 }
 0x176   : > { %5039 = vmatmul.msk.bf16.gmra.mxu0 %vm794_vm2, %v2004_v8  ;;  %v1501_v53 = vpop.f32.mrf.mxu2  ;;  %v1335_v63 = vsel %vm1302_vm3, %v1332_v45, %v1334_v1 }
 0x177   : > { %v1646_v42 = vadd.f32 %v1501_v53, %v1166_v14  ;;  %v1744_v50 = vpop.f32.mrf.mxu3  ;;  %v1167_v27 = vpop.f32.mrf.mxu1 }
 0x178   : > { %v1168_v15 = vadd.f32 %v1167_v27, %v6246_v25  ;;  %v2008_v25 = vsel %vm1945_vm4, %v2003_v22, %v2007_v58 }
 0x179   : > { %v1889_v59 = vadd.f32 %v1744_v50, %v1646_v42 }
 0x17b   : > { %v2219_v10 = vpop.f32.mrf.mxu0  ;;  %v6397_v48 = vadd.f32 %v2217_v51, %v1889_v59 }
 0x17e   : > { %v1503_v24 = vpop.f32.mrf.mxu2 }
 0x17f   : > { %v1647_v9 = vadd.f32 %v1503_v24, %v1168_v15  ;;  %v1746_v55 = vpop.f32.mrf.mxu3  ;;  %v1170_v18 = vpop.f32.mrf.mxu1 }
 0x180   : > { %v1171_v14 = vadd.f32 %v1170_v18, %v6258_v0 }
 0x181   : > { %v1890_v30 = vadd.f32 %v1746_v55, %v1647_v9 }
 0x182   : > { %4941 = vmatmul.msk.bf16.gmra.mxu1 %vm794_vm2, %v5947_v39  ;;  %v7702_v39 = vld [vmem:[#allocation15_spill] sm:$0xff] }
 0x183   : > { %v2222_v8 = vpop.f32.mrf.mxu0  ;;  %4974 = vmatmul.msk.bf16.gmra.mxu2 %vm794_vm2, %v1333_v52  ;;  %v6409_v51 = vadd.f32 %v2219_v10, %v1890_v30  ;;  %v2009_v2 = vrot.slane %v7702_v39, 1  ;;  %v7703_v52 = vld [vmem:[#allocation9_spill] sm:$0xff]  ;;  %v6420_v10 = vld [vmem:[%s5705_s26 + $0x88] sm:$0xff] }
 0x184   : > { %5007 = vmatmul.msk.bf16.gmra.mxu3 %vm794_vm2, %v1335_v63  ;;  %v2010_v32 = vrot.slane %v7703_v52, 2  ;;  %v1336_v0 = vrot.slane %v6420_v10, 1 }
 0x186   : > { %5040 = vmatmul.msk.bf16.gmra.mxu0 %vm794_vm2, %v2008_v25  ;;  %v1506_v53 = vpop.f32.mrf.mxu2  ;;  %v2011_v18 = vor.u32 %v2010_v32, %v2009_v2 }
 0x187   : > { %v1648_v42 = vadd.f32 %v1506_v53, %v1171_v14  ;;  %v1749_v45 = vpop.f32.mrf.mxu3  ;;  %v1172_v50 = vpop.f32.mrf.mxu1  ;;  %v1337_v14 = vsel %vm1302_vm3, %v1334_v1, %v1336_v0 }
 0x188   : > { %v1173_v22 = vadd.f32 %v1172_v50, %v6272_v46  ;;  %v2012_v46 = vsel %vm1945_vm4, %v2007_v58, %v2011_v18 }
 0x189   : > { %v1891_v27 = vadd.f32 %v1749_v45, %v1648_v42 }
 0x18b   : > { %v2224_v59 = vpop.f32.mrf.mxu0  ;;  %v6416_v15 = vadd.f32 %v2222_v8, %v1891_v27 }
 0x18e   : > { %v1508_v24 = vpop.f32.mrf.mxu2 }
 0x18f   : > { %v1649_v9 = vadd.f32 %v1508_v24, %v1173_v22  ;;  %v1751_v55 = vpop.f32.mrf.mxu3  ;;  %v1175_v30 = vpop.f32.mrf.mxu1 }
 0x190   : > { %v1176_v42 = vadd.f32 %v1175_v30, %v6284_v3 }
 0x191   : > { %v1892_v25 = vadd.f32 %v1751_v55, %v1649_v9 }
 0x192   : > { %4942 = vmatmul.msk.bf16.gmra.mxu1 %vm794_vm2, %v5991_v28  ;;  %v7704_v28 = vld [vmem:[#allocation21_spill] sm:$0xff] }
 0x193   : > { %v2227_v53 = vpop.f32.mrf.mxu0  ;;  %4975 = vmatmul.msk.bf16.gmra.mxu2 %vm794_vm2, %v1335_v63  ;;  %v6428_v8 = vadd.f32 %v2224_v59, %v1892_v25  ;;  %v2013_v22 = vrot.slane %v7704_v28, 1  ;;  %v7705_v63 = vld [vmem:[#allocation16_spill] sm:$0xff]  ;;  %v6439_v59 = vld [vmem:[%s5705_s26 + $0x90] sm:$0xff] }
 0x194   : > { %5008 = vmatmul.msk.bf16.gmra.mxu3 %vm794_vm2, %v1337_v14  ;;  %v2014_v24 = vrot.slane %v7705_v63, 2  ;;  %v1338_v3 = vrot.slane %v6439_v59, 1 }
 0x196   : > { %5041 = vmatmul.msk.bf16.gmra.mxu0 %vm794_vm2, %v2012_v46  ;;  %v1511_v45 = vpop.f32.mrf.mxu2  ;;  %v2015_v46 = vor.u32 %v2014_v24, %v2013_v22 }
 0x197   : > { %v1650_v50 = vadd.f32 %v1511_v45, %v1176_v42  ;;  %v1754_v1 = vpop.f32.mrf.mxu3  ;;  %v1177_v27 = vpop.f32.mrf.mxu1 }
 0x198   : > { %v1178_v58 = vadd.f32 %v1177_v27, %v6298_v34  ;;  %v2016_v34 = vsel %vm1945_vm4, %v2011_v18, %v2015_v46 }
 0x199   : > { %v1893_v2 = vadd.f32 %v1754_v1, %v1650_v50  ;;  %v1339_v50 = vsel %vm1302_vm3, %v1336_v0, %v1338_v3 }
 0x19b   : > { %v2229_v32 = vpop.f32.mrf.mxu0  ;;  %v6435_v9 = vadd.f32 %v2227_v53, %v1893_v2 }
 0x19d   : > { %7706 = vst [vmem:[#allocation8_spill] sm:$0xff] %v6435_v9 }
 0x19e   : > { %v1513_v55 = vpop.f32.mrf.mxu2 }
 0x19f   : > { %v1651_v30 = vadd.f32 %v1513_v55, %v1178_v58  ;;  %v1756_v25 = vpop.f32.mrf.mxu3  ;;  %v1180_v42 = vpop.f32.mrf.mxu1 }
 0x1a0   : > { %v1181_v27 = vadd.f32 %v1180_v42, %v6098_v29 }
 0x1a1   : > { %v1894_v45 = vadd.f32 %v1756_v25, %v1651_v30 }
 0x1a2   : > { %4943 = vmatmul.msk.bf16.gmra.mxu1 %vm794_vm2, %v6401_v11  ;;  %v7708_v11 = vld [vmem:[#allocation27_spill] sm:$0xff] }
 0x1a3   : > { %v2232_v1 = vpop.f32.mrf.mxu0  ;;  %4976 = vmatmul.msk.bf16.gmra.mxu2 %vm794_vm2, %v1337_v14  ;;  %v6447_v53 = vadd.f32 %v2229_v32, %v1894_v45  ;;  %v2017_v30 = vrot.slane %v7708_v11, 1  ;;  %v7709_v14 = vld [vmem:[#allocation22_spill] sm:$0xff]  ;;  %v6458_v32 = vld [vmem:[%s5705_s26 + $0x98] sm:$0xff] }
 0x1a4   : > { %5009 = vmatmul.msk.bf16.gmra.mxu3 %vm794_vm2, %v1339_v50  ;;  %v2018_v25 = vrot.slane %v7709_v14, 2  ;;  %v1340_v29 = vrot.slane %v6458_v32, 1 }
 0x1a5   : > { %7707 = vst [vmem:[#allocation15_spill] sm:$0xff] %v6447_v53 }
 0x1a6   : > { %5042 = vmatmul.msk.bf16.gmra.mxu0 %vm794_vm2, %v2016_v34  ;;  %v1516_v2 = vpop.f32.mrf.mxu2 }
 0x1a7   : > { %v1652_v22 = vadd.f32 %v1516_v2, %v1181_v27  ;;  %v1759_v0 = vpop.f32.mrf.mxu3  ;;  %v1182_v24 = vpop.f32.mrf.mxu1  ;;  %v2019_v27 = vor.u32 %v2018_v25, %v2017_v30 }
 0x1a8   : > { %v1183_v18 = vadd.f32 %v1182_v24, %v6114_v44 }
 0x1a9   : > { %v1895_v58 = vadd.f32 %v1759_v0, %v1652_v22  ;;  %v1341_v22 = vsel %vm1302_vm3, %v1338_v3, %v1340_v29  ;;  %v2020_v44 = vsel %vm1945_vm4, %v2015_v46, %v2019_v27 }
 0x1ab   : > { %v2234_v55 = vpop.f32.mrf.mxu0  ;;  %v6454_v9 = vadd.f32 %v2232_v1, %v1895_v58 }
 0x1ad   : > { %7710 = vst [vmem:[#allocation9_spill] sm:$0xff] %v6454_v9 }
 0x1ae   : > { %v1518_v42 = vpop.f32.mrf.mxu2 }
 0x1af   : > { %v1653_v45 = vadd.f32 %v1518_v42, %v1183_v18  ;;  %v1761_v34 = vpop.f32.mrf.mxu3  ;;  %v1185_v2 = vpop.f32.mrf.mxu1 }
 0x1b0   : > { %v1186_v24 = vadd.f32 %v1185_v2, %v6125_v23 }
 0x1b1   : > { %v1896_v53 = vadd.f32 %v1761_v34, %v1653_v45 }
 0x1b2   : > { %4944 = vmatmul.msk.bf16.gmra.mxu1 %vm794_vm2, %v6420_v10  ;;  %v7712_v10 = vld [vmem:[#allocation33_spill] sm:$0xff] }
 0x1b3   : > { %v2237_v0 = vpop.f32.mrf.mxu0  ;;  %4977 = vmatmul.msk.bf16.gmra.mxu2 %vm794_vm2, %v1339_v50  ;;  %v6466_v1 = vadd.f32 %v2234_v55, %v1896_v53  ;;  %v2021_v45 = vrot.slane %v7712_v10, 1  ;;  %v7713_v50 = vld [vmem:[#allocation28_spill] sm:$0xff]  ;;  %v6477_v53 = vld [vmem:[%s5705_s26 + $0xa0] sm:$0xff] }
 0x1b4   : > { %5010 = vmatmul.msk.bf16.gmra.mxu3 %vm794_vm2, %v1341_v22  ;;  %v2022_v34 = vrot.slane %v7713_v50, 2  ;;  %v1342_v23 = vrot.slane %v6477_v53, 1 }
 0x1b5   : > { %7711 = vst [vmem:[#allocation21_spill] sm:$0xff] %v6466_v1 }
 0x1b6   : > { %5043 = vmatmul.msk.bf16.gmra.mxu0 %vm794_vm2, %v2020_v44  ;;  %v1521_v58 = vpop.f32.mrf.mxu2 }
 0x1b7   : > { %v1654_v30 = vadd.f32 %v1521_v58, %v1186_v24  ;;  %v1764_v3 = vpop.f32.mrf.mxu3  ;;  %v1187_v25 = vpop.f32.mrf.mxu1  ;;  %v2023_v24 = vor.u32 %v2022_v34, %v2021_v45 }
 0x1b8   : > { %v1188_v46 = vadd.f32 %v1187_v25, %v6140_v20 }
 0x1b9   : > { %v1897_v18 = vadd.f32 %v1764_v3, %v1654_v30  ;;  %v1343_v30 = vsel %vm1302_vm3, %v1340_v29, %v1342_v23  ;;  %v2024_v20 = vsel %vm1945_vm4, %v2019_v27, %v2023_v24 }
 0x1bb   : > { %v2239_v42 = vpop.f32.mrf.mxu0  ;;  %v6473_v9 = vadd.f32 %v2237_v0, %v1897_v18 }
 0x1bd   : > { %7714 = vst [vmem:[#allocation16_spill] sm:$0xff] %v6473_v9 }
 0x1be   : > { %v1523_v55 = vpop.f32.mrf.mxu2 }
 0x1bf   : > { %v1655_v2 = vadd.f32 %v1523_v55, %v1188_v46  ;;  %v1766_v44 = vpop.f32.mrf.mxu3  ;;  %v1190_v58 = vpop.f32.mrf.mxu1 }
 0x1c0   : > { %v1191_v25 = vadd.f32 %v1190_v58, %v6151_v33 }
 0x1c1   : > { %v1898_v1 = vadd.f32 %v1766_v44, %v1655_v2 }
 0x1c2   : > { %4945 = vmatmul.msk.bf16.gmra.mxu1 %vm794_vm2, %v6439_v59  ;;  %v7716_v59 = vld [vmem:[#allocation39_spill] sm:$0xff] }
 0x1c3   : > { %v2242_v3 = vpop.f32.mrf.mxu0  ;;  %4978 = vmatmul.msk.bf16.gmra.mxu2 %vm794_vm2, %v1341_v22  ;;  %v6485_v0 = vadd.f32 %v2239_v42, %v1898_v1  ;;  %v2025_v2 = vrot.slane %v7716_v59, 1  ;;  %v7717_v22 = vld [vmem:[#allocation34_spill] sm:$0xff] }
 0x1c4   : > { %5011 = vmatmul.msk.bf16.gmra.mxu3 %vm794_vm2, %v1343_v30  ;;  %v2026_v44 = vrot.slane %v7717_v22, 2  ;;  %v6496_v1 = vld [vmem:[%s5705_s26 + $0xa8] sm:$0xff] }
 0x1c5   : > { %7715 = vst [vmem:[#allocation27_spill] sm:$0xff] %v6485_v0  ;;  %v1344_v33 = vrot.slane %v6496_v1, 1 }
 0x1c6   : > { %5044 = vmatmul.msk.bf16.gmra.mxu0 %vm794_vm2, %v2024_v20  ;;  %v1526_v18 = vpop.f32.mrf.mxu2 }
 0x1c7   : > { %v1656_v45 = vadd.f32 %v1526_v18, %v1191_v25  ;;  %v1769_v29 = vpop.f32.mrf.mxu3  ;;  %v1192_v34 = vpop.f32.mrf.mxu1  ;;  %v2027_v25 = vor.u32 %v2026_v44, %v2025_v2 }
 0x1c8   : > { %v1193_v27 = vadd.f32 %v1192_v34, %v6166_v21 }
 0x1c9   : > { %v1899_v46 = vadd.f32 %v1769_v29, %v1656_v45  ;;  %v1345_v45 = vsel %vm1302_vm3, %v1342_v23, %v1344_v33  ;;  %v2028_v21 = vsel %vm1945_vm4, %v2023_v24, %v2027_v25 }
 0x1cb   : > { %v2244_v55 = vpop.f32.mrf.mxu0  ;;  %v6492_v9 = vadd.f32 %v2242_v3, %v1899_v46 }
 0x1cd   : > { %7718 = vst [vmem:[#allocation22_spill] sm:$0xff] %v6492_v9 }
 0x1ce   : > { %v1528_v42 = vpop.f32.mrf.mxu2 }
 0x1cf   : > { %v1657_v58 = vadd.f32 %v1528_v42, %v1193_v27  ;;  %v1771_v20 = vpop.f32.mrf.mxu3  ;;  %v1195_v18 = vpop.f32.mrf.mxu1 }
 0x1d0   : > { %v1196_v34 = vadd.f32 %v1195_v18, %v6177_v4 }
 0x1d1   : > { %v1900_v0 = vadd.f32 %v1771_v20, %v1657_v58 }
 0x1d2   : > { %4946 = vmatmul.msk.bf16.gmra.mxu1 %vm794_vm2, %v6458_v32  ;;  %v7720_v32 = vld [vmem:[#allocation45_spill] sm:$0xff] }
 0x1d3   : > { %v2247_v29 = vpop.f32.mrf.mxu0  ;;  %4979 = vmatmul.msk.bf16.gmra.mxu2 %vm794_vm2, %v1343_v30  ;;  %v6504_v3 = vadd.f32 %v2244_v55, %v1900_v0  ;;  %v2029_v58 = vrot.slane %v7720_v32, 1  ;;  %v7721_v30 = vld [vmem:[#allocation40_spill] sm:$0xff]  ;;  %v6515_v0 = vld [vmem:[%s5705_s26 + $0xb0] sm:$0xff] }
 0x1d4   : > { %5012 = vmatmul.msk.bf16.gmra.mxu3 %vm794_vm2, %v1345_v45  ;;  %v2030_v20 = vrot.slane %v7721_v30, 2  ;;  %v1346_v4 = vrot.slane %v6515_v0, 1 }
 0x1d5   : > { %7719 = vst [vmem:[#allocation33_spill] sm:$0xff] %v6504_v3 }
 0x1d6   : > { %5045 = vmatmul.msk.bf16.gmra.mxu0 %vm794_vm2, %v2028_v21  ;;  %v1531_v46 = vpop.f32.mrf.mxu2 }
 0x1d7   : > { %v1658_v2 = vadd.f32 %v1531_v46, %v1196_v34  ;;  %v1774_v23 = vpop.f32.mrf.mxu3  ;;  %v1197_v44 = vpop.f32.mrf.mxu1  ;;  %v2031_v34 = vor.u32 %v2030_v20, %v2029_v58 }
 0x1d8   : > { %v1198_v24 = vadd.f32 %v1197_v44, %v6192_v49 }
 0x1d9   : > { %v1901_v27 = vadd.f32 %v1774_v23, %v1658_v2  ;;  %v1347_v2 = vsel %vm1302_vm3, %v1344_v33, %v1346_v4  ;;  %v2032_v49 = vsel %vm1945_vm4, %v2027_v25, %v2031_v34  ;;  %v7726_v25 = vld [vmem:[#allocation73_spill] sm:$0xff] }
 0x1db   : > { %v2249_v42 = vpop.f32.mrf.mxu0  ;;  %v6511_v9 = vadd.f32 %v2247_v29, %v1901_v27 }
 0x1dd   : > { %7722 = vst [vmem:[#allocation28_spill] sm:$0xff] %v6511_v9 }
 0x1de   : > { %v1533_v55 = vpop.f32.mrf.mxu2 }
 0x1df   : > { %v1659_v18 = vadd.f32 %v1533_v55, %v1198_v24  ;;  %v1776_v21 = vpop.f32.mrf.mxu3  ;;  %v1200_v46 = vpop.f32.mrf.mxu1 }
 0x1e0   : > { %v1201_v44 = vadd.f32 %v1200_v46, %v6203_v38 }
 0x1e1   : > { %v1902_v3 = vadd.f32 %v1776_v21, %v1659_v18 }
 0x1e2   : > { %4947 = vmatmul.msk.bf16.gmra.mxu1 %vm794_vm2, %v6477_v53  ;;  %v2033_v53 = vrot.slane %v6056_v43, 1 }
 0x1e3   : > { %v2252_v23 = vpop.f32.mrf.mxu0  ;;  %4980 = vmatmul.msk.bf16.gmra.mxu2 %vm794_vm2, %v1345_v45  ;;  %v6523_v29 = vadd.f32 %v2249_v42, %v1902_v3  ;;  %v7724_v45 = vld [vmem:[#allocation46_spill] sm:$0xff]  ;;  %v6534_v42 = vld [vmem:[%s5705_s26 + $0xb8] sm:$0xff] }
 0x1e4   : > { %5013 = vmatmul.msk.bf16.gmra.mxu3 %vm794_vm2, %v1347_v2  ;;  %v2034_v18 = vrot.slane %v7724_v45, 2  ;;  %v1348_v38 = vrot.slane %v6534_v42, 1 }
 0x1e5   : > { %7723 = vst [vmem:[#allocation39_spill] sm:$0xff] %v6523_v29 }
 0x1e6   : > { %5046 = vmatmul.msk.bf16.gmra.mxu0 %vm794_vm2, %v2032_v49  ;;  %v1536_v27 = vpop.f32.mrf.mxu2 }
 0x1e7   : > { %v1660_v58 = vadd.f32 %v1536_v27, %v1201_v44  ;;  %v1779_v33 = vpop.f32.mrf.mxu3  ;;  %v1202_v20 = vpop.f32.mrf.mxu1  ;;  %v2035_v44 = vor.u32 %v2034_v18, %v2033_v53 }
 0x1e8   : > { %v1203_v3 = vadd.f32 %v1202_v20, %v7726_v25 }
 0x1e9   : > { %v1903_v24 = vadd.f32 %v1779_v33, %v1660_v58  ;;  %v1349_v58 = vsel %vm1302_vm3, %v1346_v4, %v1348_v38 }
 0x1eb   : > { %v2254_v55 = vpop.f32.mrf.mxu0  ;;  %v6530_v21 = vadd.f32 %v2252_v23, %v1903_v24  ;;  %v2036_v23 = vsel %vm1945_vm4, %v2031_v34, %v2035_v44  ;;  %v7728_v24 = vld [vmem:[#allocation76_spill] sm:$0xff] }
 0x1ed   : > { %7725 = vst [vmem:[#allocation34_spill] sm:$0xff] %v6530_v21 }
 0x1ee   : > { %v1538_v46 = vpop.f32.mrf.mxu2 }
 0x1ef   : > { %v1661_v49 = vadd.f32 %v1538_v46, %v1203_v3  ;;  %v1781_v29 = vpop.f32.mrf.mxu3  ;;  %v1205_v27 = vpop.f32.mrf.mxu1 }
 0x1f0   : > { %v1206_v25 = vadd.f32 %v1205_v27, %v7728_v24 }
 0x1f1   : > { %v1904_v9 = vadd.f32 %v1781_v29, %v1661_v49 }
 0x1f2   : > { %4948 = vmatmul.msk.bf16.gmra.mxu1 %vm794_vm2, %v6496_v1  ;;  %v7729_v1 = vld [vmem:[#allocation11_spill] sm:$0xff] }
 0x1f3   : > { %v2257_v33 = vpop.f32.mrf.mxu0  ;;  %4981 = vmatmul.msk.bf16.gmra.mxu2 %vm794_vm2, %v1347_v2  ;;  %v6542_v20 = vadd.f32 %v2254_v55, %v1904_v9  ;;  %v2037_v49 = vrot.slane %v7729_v1, 1  ;;  %v7730_v2 = vld [vmem:[#allocation10_spill] sm:$0xff]  ;;  %v7732_v9 = vld [vmem:[#allocation79_spill] sm:$0xff]  ;;  %v6553_v55 = vld [vmem:[%s5705_s26 + $0xc0] sm:$0xff] }
 0x1f4   : > { %5014 = vmatmul.msk.bf16.gmra.mxu3 %vm794_vm2, %v1349_v58  ;;  %v2038_v21 = vrot.slane %v7730_v2, 2  ;;  %v1350_v27 = vrot.slane %v6553_v55, 1 }
 0x1f5   : > { %7727 = vst [vmem:[#allocation45_spill] sm:$0xff] %v6542_v20 }
 0x1f6   : > { %5047 = vmatmul.msk.bf16.gmra.mxu0 %vm794_vm2, %v2036_v23  ;;  %v1541_v29 = vpop.f32.mrf.mxu2 }
 0x1f7   : > { %v1662_v53 = vadd.f32 %v1541_v29, %v1206_v25  ;;  %v1784_v4 = vpop.f32.mrf.mxu3  ;;  %v1207_v18 = vpop.f32.mrf.mxu1  ;;  %v2039_v25 = vor.u32 %v2038_v21, %v2037_v49 }
 0x1f8   : > { %v1208_v34 = vadd.f32 %v1207_v18, %v7732_v9 }
 0x1f9   : > { %v1905_v3 = vadd.f32 %v1784_v4, %v1662_v53  ;;  %v1351_v53 = vsel %vm1302_vm3, %v1348_v38, %v1350_v27 }
 0x1fb   : > { %v2259_v46 = vpop.f32.mrf.mxu0  ;;  %v6549_v45 = vadd.f32 %v2257_v33, %v1905_v3  ;;  %v2040_v33 = vsel %vm1945_vm4, %v2035_v44, %v2039_v25  ;;  %v7734_v3 = vld [vmem:[#allocation82_spill] sm:$0xff] }
 0x1fd   : > { %7731 = vst [vmem:[#allocation40_spill] sm:$0xff] %v6549_v45 }
 0x1fe   : > { %v1543_v24 = vpop.f32.mrf.mxu2 }
 0x1ff   : > { %v1663_v23 = vadd.f32 %v1543_v24, %v1208_v34  ;;  %v1786_v20 = vpop.f32.mrf.mxu3  ;;  %v1210_v29 = vpop.f32.mrf.mxu1 }
 0x200   : > { %v1211_v9 = vadd.f32 %v1210_v29, %v7734_v3 }
 0x201   : > { %v1906_v43 = vadd.f32 %v1786_v20, %v1663_v23 }
 0x202   : > { %4949 = vmatmul.msk.bf16.gmra.mxu1 %vm794_vm2, %v6515_v0  ;;  %v7735_v0 = vld [vmem:[#allocation17_spill] sm:$0xff] }
 0x203   : > { %v2262_v4 = vpop.f32.mrf.mxu0  ;;  %4982 = vmatmul.msk.bf16.gmra.mxu2 %vm794_vm2, %v1349_v58  ;;  %v6561_v18 = vadd.f32 %v2259_v46, %v1906_v43  ;;  %v2041_v23 = vrot.slane %v7735_v0, 1  ;;  %v7736_v58 = vld [vmem:[#allocation12_spill] sm:$0xff]  ;;  %v7738_v43 = vld [vmem:[#allocation85_spill] sm:$0xff]  ;;  %v6572_v46 = vld [vmem:[%s5705_s26 + $0xc8] sm:$0xff] }
 0x204   : > { %5015 = vmatmul.msk.bf16.gmra.mxu3 %vm794_vm2, %v1351_v53  ;;  %v2042_v45 = vrot.slane %v7736_v58, 2  ;;  %v1352_v29 = vrot.slane %v6572_v46, 1 }
 0x205   : > { %7733 = vst [vmem:[#allocation73_spill] sm:$0xff] %v6561_v18 }
 0x206   : > { %5048 = vmatmul.msk.bf16.gmra.mxu0 %vm794_vm2, %v2040_v33  ;;  %v1546_v21 = vpop.f32.mrf.mxu2 }
 0x207   : > { %v1664_v20 = vadd.f32 %v1546_v21, %v1211_v9  ;;  %v1789_v38 = vpop.f32.mrf.mxu3  ;;  %v1212_v49 = vpop.f32.mrf.mxu1  ;;  %v2043_v9 = vor.u32 %v2042_v45, %v2041_v23 }
 0x208   : > { %v1213_v44 = vadd.f32 %v1212_v49, %v7738_v43 }
 0x209   : > { %v1907_v34 = vadd.f32 %v1789_v38, %v1664_v20  ;;  %v1353_v20 = vsel %vm1302_vm3, %v1350_v27, %v1352_v29 }
 0x20b   : > { %v2264_v24 = vpop.f32.mrf.mxu0  ;;  %v6568_v2 = vadd.f32 %v2262_v4, %v1907_v34  ;;  %v2044_v4 = vsel %vm1945_vm4, %v2039_v25, %v2043_v9  ;;  %v7740_v34 = vld [vmem:[#allocation88_spill] sm:$0xff] }
 0x20d   : > { %7737 = vst [vmem:[#allocation76_spill] sm:$0xff] %v6568_v2 }
 0x20e   : > { %v1548_v3 = vpop.f32.mrf.mxu2 }
 0x20f   : > { %v1665_v33 = vadd.f32 %v1548_v3, %v1213_v44  ;;  %v1791_v18 = vpop.f32.mrf.mxu3  ;;  %v1215_v21 = vpop.f32.mrf.mxu1 }
 0x210   : > { %v1216_v43 = vadd.f32 %v1215_v21, %v7740_v34 }
 0x211   : > { %v1908_v1 = vadd.f32 %v1791_v18, %v1665_v33 }
 0x212   : > { %4950 = vmatmul.msk.bf16.gmra.mxu1 %vm794_vm2, %v6534_v42  ;;  %v7741_v42 = vld [vmem:[#allocation23_spill] sm:$0xff] }
 0x213   : > { %v2267_v38 = vpop.f32.mrf.mxu0  ;;  %4983 = vmatmul.msk.bf16.gmra.mxu2 %vm794_vm2, %v1351_v53  ;;  %v6580_v49 = vadd.f32 %v2264_v24, %v1908_v1  ;;  %v2045_v33 = vrot.slane %v7741_v42, 1  ;;  %v7742_v53 = vld [vmem:[#allocation18_spill] sm:$0xff]  ;;  %v7744_v1 = vld [vmem:[#allocation91_spill] sm:$0xff] }
 0x214   : > { %5016 = vmatmul.msk.bf16.gmra.mxu3 %vm794_vm2, %v1353_v20  ;;  %v2046_v2 = vrot.slane %v7742_v53, 2  ;;  %v6591_v24 = vld [vmem:[%s5705_s26 + $0xd0] sm:$0xff] }
 0x215   : > { %7739 = vst [vmem:[#allocation79_spill] sm:$0xff] %v6580_v49  ;;  %v1354_v21 = vrot.slane %v6591_v24, 1 }
 0x216   : > { %5049 = vmatmul.msk.bf16.gmra.mxu0 %vm794_vm2, %v2044_v4  ;;  %v1551_v45 = vpop.f32.mrf.mxu2 }
 0x217   : > { %v1666_v18 = vadd.f32 %v1551_v45, %v1216_v43  ;;  %v1794_v27 = vpop.f32.mrf.mxu3  ;;  %v1217_v23 = vpop.f32.mrf.mxu1  ;;  %v2047_v43 = vor.u32 %v2046_v2, %v2045_v33 }
 0x218   : > { %v1218_v25 = vadd.f32 %v1217_v23, %v7744_v1 }
 0x219   : > { %v1909_v44 = vadd.f32 %v1794_v27, %v1666_v18  ;;  %v1355_v18 = vsel %vm1302_vm3, %v1352_v29, %v1354_v21 }
 0x21b   : > { %v2269_v3 = vpop.f32.mrf.mxu0  ;;  %v6587_v58 = vadd.f32 %v2267_v38, %v1909_v44  ;;  %v2048_v38 = vsel %vm1945_vm4, %v2043_v9, %v2047_v43  ;;  %v7746_v44 = vld [vmem:[#allocation55_spill] sm:$0xff] }
 0x21d   : > { %7743 = vst [vmem:[#allocation82_spill] sm:$0xff] %v6587_v58 }
 0x21e   : > { %v1553_v34 = vpop.f32.mrf.mxu2 }
 0x21f   : > { %v1667_v4 = vadd.f32 %v1553_v34, %v1218_v25  ;;  %v1796_v49 = vpop.f32.mrf.mxu3  ;;  %v1220_v45 = vpop.f32.mrf.mxu1 }
 0x220   : > { %v1221_v1 = vadd.f32 %v1220_v45, %v7746_v44 }
 0x221   : > { %v1910_v0 = vadd.f32 %v1796_v49, %v1667_v4 }
 0x222   : > { %4951 = vmatmul.msk.bf16.gmra.mxu1 %vm794_vm2, %v6553_v55  ;;  %v7747_v55 = vld [vmem:[#allocation29_spill] sm:$0xff] }
 0x223   : > { %v2272_v27 = vpop.f32.mrf.mxu0  ;;  %4984 = vmatmul.msk.bf16.gmra.mxu2 %vm794_vm2, %v1353_v20  ;;  %v6599_v23 = vadd.f32 %v2269_v3, %v1910_v0  ;;  %v2049_v4 = vrot.slane %v7747_v55, 1  ;;  %v7748_v20 = vld [vmem:[#allocation24_spill] sm:$0xff]  ;;  %v7750_v0 = vld [vmem:[#allocation57_spill] sm:$0xff] }
 0x224   : > { %5017 = vmatmul.msk.bf16.gmra.mxu3 %vm794_vm2, %v1355_v18  ;;  %v2050_v58 = vrot.slane %v7748_v20, 2  ;;  %v6610_v3 = vld [vmem:[%s5705_s26 + $0xd8] sm:$0xff] }
 0x225   : > { %7745 = vst [vmem:[#allocation85_spill] sm:$0xff] %v6599_v23  ;;  %v1356_v45 = vrot.slane %v6610_v3, 1 }
 0x226   : > { %5050 = vmatmul.msk.bf16.gmra.mxu0 %vm794_vm2, %v2048_v38  ;;  %v1556_v2 = vpop.f32.mrf.mxu2 }
 0x227   : > { %v1668_v49 = vadd.f32 %v1556_v2, %v1221_v1  ;;  %v1799_v29 = vpop.f32.mrf.mxu3  ;;  %v1222_v33 = vpop.f32.mrf.mxu1  ;;  %v2051_v1 = vor.u32 %v2050_v58, %v2049_v4 }
 0x228   : > { %v1223_v9 = vadd.f32 %v1222_v33, %v7750_v0 }
 0x229   : > { %v1911_v25 = vadd.f32 %v1799_v29, %v1668_v49  ;;  %v1357_v49 = vsel %vm1302_vm3, %v1354_v21, %v1356_v45 }
 0x22b   : > { %v2274_v34 = vpop.f32.mrf.mxu0  ;;  %v6606_v53 = vadd.f32 %v2272_v27, %v1911_v25  ;;  %v2052_v27 = vsel %vm1945_vm4, %v2047_v43, %v2051_v1  ;;  %v7752_v25 = vld [vmem:[#allocation59_spill] sm:$0xff] }
 0x22d   : > { %7749 = vst [vmem:[#allocation88_spill] sm:$0xff] %v6606_v53 }
 0x22e   : > { %v1558_v44 = vpop.f32.mrf.mxu2 }
 0x22f   : > { %v1669_v38 = vadd.f32 %v1558_v44, %v1223_v9  ;;  %v1801_v23 = vpop.f32.mrf.mxu3  ;;  %v1225_v2 = vpop.f32.mrf.mxu1 }
 0x230   : > { %v1226_v0 = vadd.f32 %v1225_v2, %v7752_v25 }
 0x231   : > { %v1912_v42 = vadd.f32 %v1801_v23, %v1669_v38 }
 0x232   : > { %4952 = vmatmul.msk.bf16.gmra.mxu1 %vm794_vm2, %v6572_v46  ;;  %v7753_v46 = vld [vmem:[#allocation35_spill] sm:$0xff] }
 0x233   : > { %v2277_v29 = vpop.f32.mrf.mxu0  ;;  %4985 = vmatmul.msk.bf16.gmra.mxu2 %vm794_vm2, %v1355_v18  ;;  %v6618_v33 = vadd.f32 %v2274_v34, %v1912_v42  ;;  %v2053_v38 = vrot.slane %v7753_v46, 1  ;;  %v7754_v18 = vld [vmem:[#allocation30_spill] sm:$0xff]  ;;  %v7756_v42 = vld [vmem:[#allocation61_spill] sm:$0xff] }
 0x234   : > { %5018 = vmatmul.msk.bf16.gmra.mxu3 %vm794_vm2, %v1357_v49  ;;  %v2054_v53 = vrot.slane %v7754_v18, 2  ;;  %v6629_v34 = vld [vmem:[%s5705_s26 + $0xe0] sm:$0xff] }
 0x235   : > { %7751 = vst [vmem:[#allocation91_spill] sm:$0xff] %v6618_v33  ;;  %v1358_v2 = vrot.slane %v6629_v34, 1 }
 0x236   : > { %5051 = vmatmul.msk.bf16.gmra.mxu0 %vm794_vm2, %v2052_v27  ;;  %v1561_v58 = vpop.f32.mrf.mxu2 }
 0x237   : > { %v1670_v23 = vadd.f32 %v1561_v58, %v1226_v0  ;;  %v1804_v21 = vpop.f32.mrf.mxu3  ;;  %v1227_v4 = vpop.f32.mrf.mxu1  ;;  %v2055_v0 = vor.u32 %v2054_v53, %v2053_v38 }
 0x238   : > { %v1228_v43 = vadd.f32 %v1227_v4, %v7756_v42 }
 0x239   : > { %v1913_v9 = vadd.f32 %v1804_v21, %v1670_v23  ;;  %v1359_v23 = vsel %vm1302_vm3, %v1356_v45, %v1358_v2 }
 0x23b   : > { %v2279_v44 = vpop.f32.mrf.mxu0  ;;  %v6625_v20 = vadd.f32 %v2277_v29, %v1913_v9  ;;  %v2056_v29 = vsel %vm1945_vm4, %v2051_v1, %v2055_v0  ;;  %v7758_v9 = vld [vmem:[#allocation63_spill] sm:$0xff] }
 0x23d   : > { %7755 = vst [vmem:[#allocation55_spill] sm:$0xff] %v6625_v20 }
 0x23e   : > { %v1563_v25 = vpop.f32.mrf.mxu2 }
 0x23f   : > { %v1671_v27 = vadd.f32 %v1563_v25, %v1228_v43  ;;  %v1806_v33 = vpop.f32.mrf.mxu3  ;;  %v1230_v58 = vpop.f32.mrf.mxu1 }
 0x240   : > { %v1231_v42 = vadd.f32 %v1230_v58, %v7758_v9 }
 0x241   : > { %v1914_v55 = vadd.f32 %v1806_v33, %v1671_v27 }
 0x242   : > { %4953 = vmatmul.msk.bf16.gmra.mxu1 %vm794_vm2, %v6591_v24  ;;  %v7759_v24 = vld [vmem:[#allocation41_spill] sm:$0xff] }
 0x243   : > { %v2282_v21 = vpop.f32.mrf.mxu0  ;;  %4986 = vmatmul.msk.bf16.gmra.mxu2 %vm794_vm2, %v1357_v49  ;;  %v6637_v4 = vadd.f32 %v2279_v44, %v1914_v55  ;;  %v2057_v27 = vrot.slane %v7759_v24, 1  ;;  %v7760_v49 = vld [vmem:[#allocation36_spill] sm:$0xff]  ;;  %v7762_v55 = vld [vmem:[#allocation65_spill] sm:$0xff]  ;;  %v6648_v44 = vld [vmem:[%s5705_s26 + $0xe8] sm:$0xff] }
 0x244   : > { %5019 = vmatmul.msk.bf16.gmra.mxu3 %vm794_vm2, %v1359_v23  ;;  %v2058_v20 = vrot.slane %v7760_v49, 2  ;;  %v1360_v58 = vrot.slane %v6648_v44, 1 }
 0x245   : > { %7757 = vst [vmem:[#allocation57_spill] sm:$0xff] %v6637_v4 }
 0x246   : > { %5052 = vmatmul.msk.bf16.gmra.mxu0 %vm794_vm2, %v2056_v29  ;;  %v1566_v53 = vpop.f32.mrf.mxu2 }
 0x247   : > { %v1672_v33 = vadd.f32 %v1566_v53, %v1231_v42  ;;  %v1809_v45 = vpop.f32.mrf.mxu3  ;;  %v1232_v38 = vpop.f32.mrf.mxu1  ;;  %v2059_v42 = vor.u32 %v2058_v20, %v2057_v27 }
 0x248   : > { %v1233_v1 = vadd.f32 %v1232_v38, %v7762_v55 }
 0x249   : > { %v1915_v43 = vadd.f32 %v1809_v45, %v1672_v33  ;;  %v1361_v33 = vsel %vm1302_vm3, %v1358_v2, %v1360_v58 }
 0x24b   : > { %v2284_v25 = vpop.f32.mrf.mxu0  ;;  %v6644_v18 = vadd.f32 %v2282_v21, %v1915_v43  ;;  %v2060_v21 = vsel %vm1945_vm4, %v2055_v0, %v2059_v42  ;;  %v7764_v43 = vld [vmem:[#allocation67_spill] sm:$0xff] }
 0x24d   : > { %7761 = vst [vmem:[#allocation59_spill] sm:$0xff] %v6644_v18 }
 0x24e   : > { %v1568_v9 = vpop.f32.mrf.mxu2 }
 0x24f   : > { %v1673_v29 = vadd.f32 %v1568_v9, %v1233_v1  ;;  %v1811_v4 = vpop.f32.mrf.mxu3  ;;  %v1235_v53 = vpop.f32.mrf.mxu1 }
 0x250   : > { %v1236_v55 = vadd.f32 %v1235_v53, %v7764_v43 }
 0x251   : > { %v1916_v46 = vadd.f32 %v1811_v4, %v1673_v29 }
 0x252   : > { %4954 = vmatmul.msk.bf16.gmra.mxu1 %vm794_vm2, %v6610_v3  ;;  %v7765_v3 = vld [vmem:[#allocation47_spill] sm:$0xff] }
 0x253   : > { %v2287_v45 = vpop.f32.mrf.mxu0  ;;  %4987 = vmatmul.msk.bf16.gmra.mxu2 %vm794_vm2, %v1359_v23  ;;  %v6656_v38 = vadd.f32 %v2284_v25, %v1916_v46  ;;  %v2061_v29 = vrot.slane %v7765_v3, 1  ;;  %v7766_v23 = vld [vmem:[#allocation42_spill] sm:$0xff]  ;;  %v7768_v46 = vld [vmem:[#allocation69_spill] sm:$0xff]  ;;  %v6667_v25 = vld [vmem:[%s5705_s26 + $0xf0] sm:$0xff] }
 0x254   : > { %5020 = vmatmul.msk.bf16.gmra.mxu3 %vm794_vm2, %v1361_v33  ;;  %v2062_v18 = vrot.slane %v7766_v23, 2  ;;  %v1362_v53 = vrot.slane %v6667_v25, 1 }
 0x255   : > { %7763 = vst [vmem:[#allocation61_spill] sm:$0xff] %v6656_v38 }
 0x256   : > { %5053 = vmatmul.msk.bf16.gmra.mxu0 %vm794_vm2, %v2060_v21  ;;  %v1571_v20 = vpop.f32.mrf.mxu2 }
 0x257   : > { %v1674_v4 = vadd.f32 %v1571_v20, %v1236_v55  ;;  %v1814_v2 = vpop.f32.mrf.mxu3  ;;  %v1237_v27 = vpop.f32.mrf.mxu1  ;;  %v2063_v55 = vor.u32 %v2062_v18, %v2061_v29 }
 0x258   : > { %v1238_v0 = vadd.f32 %v1237_v27, %v7768_v46 }
 0x259   : > { %v1917_v1 = vadd.f32 %v1814_v2, %v1674_v4  ;;  %v1363_v4 = vsel %vm1302_vm3, %v1360_v58, %v1362_v53 }
 0x25b   : > { %v2289_v9 = vpop.f32.mrf.mxu0  ;;  %v6663_v49 = vadd.f32 %v2287_v45, %v1917_v1  ;;  %v2064_v45 = vsel %vm1945_vm4, %v2059_v42, %v2063_v55  ;;  %v7770_v1 = vld [vmem:[#allocation71_spill] sm:$0xff] }
 0x25d   : > { %7767 = vst [vmem:[#allocation63_spill] sm:$0xff] %v6663_v49 }
 0x25e   : > { %v1573_v43 = vpop.f32.mrf.mxu2 }
 0x25f   : > { %v1675_v21 = vadd.f32 %v1573_v43, %v1238_v0  ;;  %v1816_v38 = vpop.f32.mrf.mxu3  ;;  %v1240_v20 = vpop.f32.mrf.mxu1 }
 0x260   : > { %v1241_v46 = vadd.f32 %v1240_v20, %v7770_v1 }
 0x261   : > { %v1918_v24 = vadd.f32 %v1816_v38, %v1675_v21 }
 0x262   : > { %4955 = vmatmul.msk.bf16.gmra.mxu1 %vm794_vm2, %v6629_v34  ;;  %v7771_v34 = vld [vmem:[#allocation52_spill] sm:$0xff] }
 0x263   : > { %v2292_v2 = vpop.f32.mrf.mxu0  ;;  %4988 = vmatmul.msk.bf16.gmra.mxu2 %vm794_vm2, %v1361_v33  ;;  %v6675_v27 = vadd.f32 %v2289_v9, %v1918_v24  ;;  %v2065_v21 = vrot.slane %v7771_v34, 1  ;;  %v7772_v33 = vld [vmem:[#allocation48_spill] sm:$0xff]  ;;  %v7774_v24 = vld [vmem:[#allocation74_spill] sm:$0xff] }
 0x264   : > { %5021 = vmatmul.msk.bf16.gmra.mxu3 %vm794_vm2, %v1363_v4  ;;  %v2066_v49 = vrot.slane %v7772_v33, 2  ;;  %v6686_v9 = vld [vmem:[%s5705_s26 + $0xf8] sm:$0xff] }
 0x265   : > { %7769 = vst [vmem:[#allocation65_spill] sm:$0xff] %v6675_v27  ;;  %v1364_v20 = vrot.slane %v6686_v9, 1 }
 0x266   : > { %5054 = vmatmul.msk.bf16.gmra.mxu0 %vm794_vm2, %v2064_v45  ;;  %v1576_v18 = vpop.f32.mrf.mxu2 }
 0x267   : > { %v1676_v38 = vadd.f32 %v1576_v18, %v1241_v46  ;;  %v1819_v58 = vpop.f32.mrf.mxu3  ;;  %v1242_v29 = vpop.f32.mrf.mxu1  ;;  %v2067_v46 = vor.u32 %v2066_v49, %v2065_v21 }
 0x268   : > { %v1243_v42 = vadd.f32 %v1242_v29, %v7774_v24 }
 0x269   : > { %v1919_v0 = vadd.f32 %v1819_v58, %v1676_v38  ;;  %v1365_v58 = vsel %vm1302_vm3, %v1362_v53, %v1364_v20  ;;  %v6700_v53 = vld [vmem:[%s6034_s10] sm:$0xff] }
 0x26a   : > { %7777 = vst [vmem:[#allocation71_spill] sm:$0xff] %v6700_v53 }
 0x26b   : > { %v2294_v43 = vpop.f32.mrf.mxu0  ;;  %v6682_v23 = vadd.f32 %v2292_v2, %v1919_v0  ;;  %v2068_v2 = vsel %vm1945_vm4, %v2063_v55, %v2067_v46  ;;  %v7776_v0 = vld [vmem:[#allocation77_spill] sm:$0xff] }
 0x26d   : > { %7773 = vst [vmem:[#allocation67_spill] sm:$0xff] %v6682_v23 }
 0x26e   : > { %v1578_v1 = vpop.f32.mrf.mxu2 }
 0x26f   : > { %v1677_v45 = vadd.f32 %v1578_v1, %v1243_v42  ;;  %v1821_v27 = vpop.f32.mrf.mxu3  ;;  %v1245_v18 = vpop.f32.mrf.mxu1  ;;  %v7599_v42 = vshrl.u32 %v6700_v53, 16 }
 0x270   : > { %v1246_v24 = vadd.f32 %v1245_v18, %v7776_v0  ;;  %v7780_v18 = vld [vmem:[#allocation80_spill] sm:$0xff]  ;;  %v1366_v0 = vrot.slane %v6700_v53, 1 }
 0x271   : > { %v1920_v38 = vadd.f32 %v1821_v27, %v1677_v45  ;;  %v2071_v55 = vrot.slane %v7599_v42, 1 }
 0x272   : > { %4956 = vmatmul.msk.bf16.gmra.mxu1 %vm794_vm2, %v6648_v44 }
 0x273   : > { %v2297_v34 = vpop.f32.mrf.mxu0  ;;  %4989 = vmatmul.msk.bf16.gmra.mxu2 %vm794_vm2, %v1363_v4  ;;  %v6694_v29 = vadd.f32 %v2294_v43, %v1920_v38  ;;  %v7778_v43 = vld [vmem:[#allocation53_spill] sm:$0xff] }
 0x274   : > { %5022 = vmatmul.msk.bf16.gmra.mxu3 %vm794_vm2, %v1365_v58  ;;  %v2072_v45 = vrot.slane %v7778_v43, 2 }
 0x275   : > { %7775 = vst [vmem:[#allocation69_spill] sm:$0xff] %v6694_v29 }
 0x276   : > { %5055 = vmatmul.msk.bf16.gmra.mxu0 %vm794_vm2, %v2068_v2  ;;  %v1581_v49 = vpop.f32.mrf.mxu2  ;;  %v2073_v23 = vor.u32 %v2072_v45, %v2071_v55 }
 0x277   : > { %v1678_v27 = vadd.f32 %v1581_v49, %v1246_v24  ;;  %v1824_v21 = vpop.f32.mrf.mxu3  ;;  %v1247_v44 = vpop.f32.mrf.mxu1 }
 0x278   : > { %v1248_v2 = vadd.f32 %v1247_v44, %v7780_v18  ;;  %v7783_v18 = vld [vmem:[#allocation83_spill] sm:$0xff] }
 0x279   : > { %v1921_v1 = vadd.f32 %v1824_v21, %v1678_v27  ;;  %v1367_v27 = vsel %vm1302_vm3, %v1364_v20, %v1366_v0 }
 0x27b   : > { %v2299_v4 = vpop.f32.mrf.mxu0  ;;  %v6706_v38 = vadd.f32 %v2297_v34, %v1921_v1  ;;  %v2074_v34 = vsel %vm1945_vm4, %v2067_v46, %v2073_v23  ;;  %v6716_v1 = vld [vmem:[%s6034_s10 + $0x8] sm:$0xff] }
 0x27c   : > { %7781 = vst [vmem:[#allocation77_spill] sm:$0xff] %v6716_v1 }
 0x27d   : > { %7779 = vst [vmem:[#allocation74_spill] sm:$0xff] %v6706_v38 }
 0x27e   : > { %v1583_v24 = vpop.f32.mrf.mxu2 }
 0x27f   : > { %v1679_v49 = vadd.f32 %v1583_v24, %v1248_v2  ;;  %v1826_v29 = vpop.f32.mrf.mxu3  ;;  %v1250_v33 = vpop.f32.mrf.mxu1 }
 0x280   : > { %v1251_v55 = vadd.f32 %v1250_v33, %v7783_v18  ;;  %v1702_v18 = vrot.slane %v6716_v1, 1 }
 0x281   : > { %v1922_v3 = vadd.f32 %v1826_v29, %v1679_v49  ;;  %v7785_v49 = vld [vmem:[#allocation86_spill] sm:$0xff] }
 0x282   : > { %4957 = vmatmul.msk.bf16.gmra.mxu1 %vm794_vm2, %v6667_v25  ;;  %v7600_v25 = vshrl.u32 %v6716_v1, 16 }
 0x283   : > { %v2302_v21 = vpop.f32.mrf.mxu0  ;;  %4990 = vmatmul.msk.bf16.gmra.mxu2 %vm794_vm2, %v1365_v58  ;;  %v6719_v44 = vadd.f32 %v2299_v4, %v1922_v3  ;;  %v7601_v58 = vshll.u32 %v6716_v1, 16 }
 0x284   : > { %5023 = vmatmul.msk.bf16.gmra.mxu3 %vm794_vm2, %v1367_v27  ;;  %v2078_v3 = vrot.slane %v7600_v25, 1 }
 0x285   : > { %7782 = vst [vmem:[#allocation80_spill] sm:$0xff] %v6719_v44  ;;  %v2081_v4 = vrot.slane %v7601_v58, 2 }
 0x286   : > { %5056 = vmatmul.msk.bf16.gmra.mxu0 %vm794_vm2, %v2074_v34  ;;  %v1586_v20 = vpop.f32.mrf.mxu2 }
 0x287   : > { %v1680_v29 = vadd.f32 %v1586_v20, %v1251_v55  ;;  %v1829_v45 = vpop.f32.mrf.mxu3  ;;  %v1252_v2 = vpop.f32.mrf.mxu1  ;;  %v2082_v44 = vor.u32 %v2081_v4, %v2078_v3  ;;  %v7788_v4 = vld [vmem:[#allocation25_spill] sm:$0xff] }
 0x288   : > { %v1253_v34 = vadd.f32 %v1252_v2, %v7785_v49 }
 0x289   : > { %v1923_v46 = vadd.f32 %v1829_v45, %v1680_v29  ;;  %v1703_v45 = vsel %vm1302_vm3, %v1366_v0, %v1702_v18  ;;  %v7791_v18 = vld [vmem:[#allocation26_spill] sm:$0xff] }
 0x28b   : > { %v2304_v24 = vpop.f32.mrf.mxu0  ;;  %v6729_v33 = vadd.f32 %v2302_v21, %v1923_v46  ;;  %v2083_v21 = vsel %vm1945_vm4, %v2073_v23, %v2082_v44  ;;  %v7787_v46 = vld [vmem:[#allocation89_spill] sm:$0xff] }
 0x28d   : > { %7784 = vst [vmem:[#allocation83_spill] sm:$0xff] %v6729_v33 }
 0x28e   : > { %v1588_v55 = vpop.f32.mrf.mxu2 }
 0x28f   : > { %v1681_v20 = vadd.f32 %v1588_v55, %v1253_v34  ;;  %v1831_v42 = vpop.f32.mrf.mxu3  ;;  %v1255_v38 = vpop.f32.mrf.mxu1  ;;  %v3066_v55 = vrot.slane %v7791_v18, 3 }
 0x290   : > { %v1256_v49 = vadd.f32 %v1255_v38, %v7787_v46  ;;  %v7789_v38 = vld [vmem:[#allocation19_spill] sm:$0xff] }
 0x291   : > { %v1924_v29 = vadd.f32 %v1831_v42, %v1681_v20  ;;  %v3063_v44 = vrot.slane %v7789_v38, 3 }
 0x292   : > { %4958 = vmatmul.msk.bf16.gmra.mxu1 %vm794_vm2, %v6686_v9 }
 0x293   : > { %v2307_v25 = vpop.f32.mrf.mxu0  ;;  %4991 = vmatmul.msk.bf16.gmra.mxu2 %vm794_vm2, %v1367_v27  ;;  %v6740_v2 = vadd.f32 %v2304_v24, %v1924_v29  ;;  %v3062_v27 = vrot.slane %v7788_v4, 2  ;;  %v7790_v24 = vld [vmem:[#allocation31_spill] sm:$0xff]  ;;  %v4062_v29 = vld [vmem:[%s6749_s8] sm:$0xff]  ;;  %v5499_v4 = vld [vmem:[%s5705_s26 + $0x18] sm:$0xff] }
 0x294   : > { %5024 = vmatmul.msk.bf16.gmra.mxu3 %vm794_vm2, %v1703_v45  ;;  %v3065_v34 = vrot.slane %v7790_v24, 2  ;;  %v2422_v58 = vrot.slane %v5499_v4, 2 }
 0x295   : > { %7786 = vst [vmem:[#allocation86_spill] sm:$0xff] %v6740_v2  ;;  %v5596_v2 = vmov 0   ;;  %v3064_v38 = vor.u32 %v3063_v44, %v3062_v27 }
 0x296   : > { %5057 = vmatmul.msk.bf16.gmra.mxu0 %vm794_vm2, %v2083_v21  ;;  %v1591_v42 = vpop.f32.mrf.mxu2  ;;  %v5497_v21 = vld [vmem:[%s5705_s26 + $0x8] sm:$0xff]  ;;  %5476 = vset.pattern.permute.xlu0 %v5596_v2  ;;  %v3067_v24 = vor.u32 %v3066_v55, %v3065_v34  ;;  %v7795_v34 = vld [vmem:[#allocation56_spill] sm:$0xff] }
 0x297   : > { %v1682_v0 = vadd.f32 %v1591_v42, %v1256_v49  ;;  %v1834_v3 = vpop.f32.mrf.mxu3  ;;  %v1257_v9 = vpop.f32.mrf.mxu1  ;;  %v2419_v46 = vrot.slane %v5497_v21, 2  ;;  %v5498_v49 = vld [vmem:[%s5705_s26 + $0x10] sm:$0xff]  ;;  %5477 = vset.pattern.permute.xlu1 %v5596_v2  ;;  %4128 = vperm.xlu0 %5476, %v4062_v29   ;;  %v3534_v21 = vrot.slane %v5499_v4, 3 }
 0x298   : > { %v2420_v42 = vrot.slane %v5498_v49, 2  ;;  %5478 = vset.pattern.permute.xlu2 %v5596_v2 }
 0x299   : > { %v1925_v23 = vadd.f32 %v1834_v3, %v1682_v0  ;;  %v7793_v0 = vld [vmem:[#allocation92_spill] sm:$0xff] }
 0x29a   : > { %v1258_v3 = vadd.f32 %v1257_v9, %v7793_v0  ;;  %v2421_v1 = vsel %vm2418_vm5, %v2419_v46, %v2420_v42  ;;  %v2423_v43 = vsel %vm2418_vm5, %v2420_v42, %v2422_v58  ;;  %v3068_v9 = vsel %vm3061_vm6, %v3064_v38, %v3067_v24  ;;  %v4063_v46 = vld [vmem:[%s6749_s8 + $0x8] sm:$0xff]  ;;  %v7796_v0 = vld [vmem:[#allocation37_spill] sm:$0xff]  ;;  %v7797_v38 = vld [vmem:[#allocation32_spill] sm:$0xff] }
 0x29b   : > { %v2309_v20 = vpop.f32.mrf.mxu0  ;;  %v6755_v45 = vadd.f32 %v2307_v25, %v1925_v23 }
 0x29d   : > { %7792 = vst [vmem:[#allocation89_spill] sm:$0xff] %v6755_v45  ;;  %v3533_v45 = vrot.slane %v5498_v49, 3 }
 0x29e   : > { %v1593_v18 = vpop.f32.mrf.mxu2 }
 0x29f   : > { %v1683_v25 = vadd.f32 %v1593_v18, %v1258_v3  ;;  %v1836_v23 = vpop.f32.mrf.mxu3  ;;  %v1260_v33 = vpop.f32.mrf.mxu1  ;;  %v3535_v2 = vsel %vm3532_vm7, %v3533_v45, %v3534_v21  ;;  %4133 = vperm.xlu0 %5476, %v4063_v46   ;;  %v3069_v3 = vrot.slane %v7796_v0, 2  ;;  %v3070_v45 = vrot.slane %v7797_v38, 3 }
 0x2a0   : > { %v1261_v55 = vadd.f32 %v1260_v33, %v7795_v34  ;;  %v7799_v33 = vld [vmem:[#allocation58_spill] sm:$0xff] }
 0x2a1   : > { %v1926_v53 = vadd.f32 %v1836_v23, %v1683_v25  ;;  %v5500_v25 = vld [vmem:[%s5705_s26 + $0x20] sm:$0xff] }
 0x2a2   : > { %5059 = vmatmul.msk.bf16.vlgmr.msra.gmra.mxu1 %vm794_vm2, %v2421_v1  ;;  %v2424_v23 = vrot.slane %v5500_v25, 2  ;;  %v3536_v46 = vrot.slane %v5500_v25, 3 }
 0x2a3   : > { %v2312_v27 = vpop.f32.mrf.mxu0  ;;  %5092 = vmatmul.msk.bf16.vlgmr.msra.gmra.mxu2 %vm794_vm2, %v2423_v43  ;;  %v6767_v44 = vadd.f32 %v2309_v20, %v1926_v53  ;;  %v4064_v20 = vld [vmem:[%s6749_s8 + $0x10] sm:$0xff] }
 0x2a4   : > { %5125 = vmatmul.msk.bf16.vlgmr.msra.gmra.mxu3 %vm794_vm2, %v3068_v9  ;;  %4138 = vperm.xlu1 %5477, %v4064_v20  }
 0x2a5   : > { %7794 = vst [vmem:[#allocation25_spill] sm:$0xff] %v6767_v44 }
 0x2a6   : > { %5158 = vmatmul.msk.bf16.vlgmr.msra.gmra.mxu0 %vm794_vm2, %v3535_v2  ;;  %v1596_v29 = vpop.f32.mrf.mxu2  ;;  %v3071_v2 = vor.u32 %v3070_v45, %v3069_v3  ;;  %v4065_v45 = vld [vmem:[%s6749_s8 + $0x18] sm:$0xff] }
 0x2a7   : > { %v1684_v49 = vadd.f32 %v1596_v29, %v1261_v55  ;;  %v1839_v42 = vpop.f32.mrf.mxu3  ;;  %v1262_v1 = vpop.f32.mrf.mxu1 }
 0x2a8   : > { %v1263_v9 = vadd.f32 %v1262_v1, %v7799_v33  ;;  %v3072_v38 = vsel %vm3061_vm6, %v3067_v24, %v3071_v2  ;;  %v7802_v33 = vld [vmem:[#allocation43_spill] sm:$0xff] }
 0x2a9   : > { %v1927_v4 = vadd.f32 %v1839_v42, %v1684_v49  ;;  %v2425_v42 = vsel %vm2418_vm5, %v2422_v58, %v2424_v23 }
 0x2ab   : > { %v2314_v53 = vpop.f32.mrf.mxu0  ;;  %v6776_v18 = vadd.f32 %v2312_v27, %v1927_v4  ;;  %v3537_v27 = vsel %vm3532_vm7, %v3534_v21, %v3536_v46  ;;  %v7801_v4 = vld [vmem:[#allocation60_spill] sm:$0xff] }
 0x2ac   : > { %4143 = vperm.xlu1 %5477, %v4065_v45  }
 0x2ad   : > { %7798 = vst [vmem:[#allocation19_spill] sm:$0xff] %v6776_v18 }
 0x2ae   : > { %v1598_v34 = vpop.f32.mrf.mxu2 }
 0x2af   : > { %v1685_v55 = vadd.f32 %v1598_v34, %v1263_v9  ;;  %v1841_v29 = vpop.f32.mrf.mxu3  ;;  %v1265_v49 = vpop.f32.mrf.mxu1  ;;  %v3073_v9 = vrot.slane %v7802_v33, 2  ;;  %v7803_v34 = vld [vmem:[#allocation38_spill] sm:$0xff] }
 0x2b0   : > { %v1266_v3 = vadd.f32 %v1265_v49, %v7801_v4  ;;  %v3074_v21 = vrot.slane %v7803_v34, 3 }
 0x2b1   : > { %v1928_v0 = vadd.f32 %v1841_v29, %v1685_v55  ;;  %v5501_v29 = vld [vmem:[%s5705_s26 + $0x28] sm:$0xff] }
 0x2b2   : > { %5060 = vmatmul.msk.bf16.gmra.mxu1 %vm794_vm2, %v2423_v43  ;;  %v3075_v4 = vor.u32 %v3074_v21, %v3073_v9  ;;  %v7808_v21 = vld [vmem:[#allocation49_spill] sm:$0xff] }
 0x2b3   : > { %v2317_v44 = vpop.f32.mrf.mxu0  ;;  %5093 = vmatmul.msk.bf16.gmra.mxu2 %vm794_vm2, %v2425_v42  ;;  %v6785_v1 = vadd.f32 %v2314_v53, %v1928_v0  ;;  %v2426_v0 = vrot.slane %v5501_v29, 2 }
 0x2b4   : > { %5126 = vmatmul.msk.bf16.gmra.mxu3 %vm794_vm2, %v3072_v38  ;;  %v7805_v38 = vld [vmem:[#allocation62_spill] sm:$0xff] }
 0x2b5   : > { %7800 = vst [vmem:[#allocation31_spill] sm:$0xff] %v6785_v1  ;;  %v2427_v45 = vsel %vm2418_vm5, %v2424_v23, %v2426_v0 }
 0x2b6   : > { %5159 = vmatmul.msk.bf16.gmra.mxu0 %vm794_vm2, %v3537_v27  ;;  %v1601_v58 = vpop.f32.mrf.mxu2 }
 0x2b7   : > { %v1686_v20 = vadd.f32 %v1601_v58, %v1266_v3  ;;  %v1844_v24 = vpop.f32.mrf.mxu3  ;;  %v1267_v25 = vpop.f32.mrf.mxu1  ;;  %v3538_v3 = vrot.slane %v5501_v29, 3  ;;  %v7809_v29 = vld [vmem:[#allocation44_spill] sm:$0xff] }
 0x2b8   : > { %v1268_v49 = vadd.f32 %v1267_v25, %v7805_v38  ;;  %v3078_v38 = vrot.slane %v7809_v29, 3 }
 0x2b9   : > { %v1929_v43 = vadd.f32 %v1844_v24, %v1686_v20  ;;  %v3076_v24 = vsel %vm3061_vm6, %v3071_v2, %v3075_v4 }
 0x2bb   : > { %v2319_v55 = vpop.f32.mrf.mxu0  ;;  %v6793_v53 = vadd.f32 %v2317_v44, %v1929_v43  ;;  %v3539_v44 = vsel %vm3532_vm7, %v3536_v46, %v3538_v3  ;;  %v7807_v43 = vld [vmem:[#allocation64_spill] sm:$0xff] }
 0x2bd   : > { %7804 = vst [vmem:[#allocation26_spill] sm:$0xff] %v6793_v53 }
 0x2be   : > { %v1603_v27 = vpop.f32.mrf.mxu2 }
 0x2bf   : > { %v1687_v1 = vadd.f32 %v1603_v27, %v1268_v49  ;;  %v1846_v18 = vpop.f32.mrf.mxu3  ;;  %v1270_v58 = vpop.f32.mrf.mxu1  ;;  %v4068_v27 = vld [vmem:[%s6749_s8 + $0x30] sm:$0xff] }
 0x2c0   : > { %v1271_v9 = vadd.f32 %v1270_v58, %v7807_v43  ;;  %4158 = vperm.xlu0 %5476, %v4068_v27  }
 0x2c1   : > { %v1930_v20 = vadd.f32 %v1846_v18, %v1687_v1 }
 0x2c2   : > { %5061 = vmatmul.msk.bf16.gmra.mxu1 %vm794_vm2, %v2425_v42  ;;  %v3077_v42 = vrot.slane %v7808_v21, 2 }
 0x2c3   : > { %v2322_v33 = vpop.f32.mrf.mxu0  ;;  %5094 = vmatmul.msk.bf16.gmra.mxu2 %vm794_vm2, %v2427_v45  ;;  %v6802_v25 = vadd.f32 %v2319_v55, %v1930_v20  ;;  %v5502_v55 = vld [vmem:[%s5705_s26 + $0x30] sm:$0xff] }
 0x2c4   : > { %5127 = vmatmul.msk.bf16.gmra.mxu3 %vm794_vm2, %v3076_v24  ;;  %v2428_v20 = vrot.slane %v5502_v55, 2  ;;  %v7811_v24 = vld [vmem:[#allocation66_spill] sm:$0xff]  ;;  %v3079_v43 = vor.u32 %v3078_v38, %v3077_v42  ;;  %v7813_v42 = vld [vmem:[#allocation68_spill] sm:$0xff] }
 0x2c5   : > { %7806 = vst [vmem:[#allocation92_spill] sm:$0xff] %v6802_v25 }
 0x2c6   : > { %5160 = vmatmul.msk.bf16.gmra.mxu0 %vm794_vm2, %v3539_v44  ;;  %v1606_v18 = vpop.f32.mrf.mxu2  ;;  %v3080_v29 = vsel %vm3061_vm6, %v3075_v4, %v3079_v43  ;;  %v4069_v4 = vld [vmem:[%s6749_s8 + $0x38] sm:$0xff] }
 0x2c7   : > { %v1688_v23 = vadd.f32 %v1606_v18, %v1271_v9  ;;  %v1849_v2 = vpop.f32.mrf.mxu3  ;;  %v1272_v1 = vpop.f32.mrf.mxu1  ;;  %v3540_v18 = vrot.slane %v5502_v55, 3  ;;  %4163 = vperm.xlu1 %5477, %v4069_v4  }
 0x2c8   : > { %v1273_v58 = vadd.f32 %v1272_v1, %v7811_v24 }
 0x2c9   : > { %v1931_v34 = vadd.f32 %v1849_v2, %v1688_v23  ;;  %v2429_v2 = vsel %vm2418_vm5, %v2426_v0, %v2428_v20  ;;  %v3541_v1 = vsel %vm3532_vm7, %v3538_v3, %v3540_v18  ;;  %v7814_v3 = vld [vmem:[#allocation54_spill] sm:$0xff] }
 0x2cb   : > { %v2324_v49 = vpop.f32.mrf.mxu0  ;;  %v6810_v46 = vadd.f32 %v2322_v33, %v1931_v34 }
 0x2cd   : > { %7810 = vst [vmem:[#allocation56_spill] sm:$0xff] %v6810_v46 }
 0x2ce   : > { %v1608_v44 = vpop.f32.mrf.mxu2 }
 0x2cf   : > { %v1689_v25 = vadd.f32 %v1608_v44, %v1273_v58  ;;  %v1851_v9 = vpop.f32.mrf.mxu3  ;;  %v1275_v23 = vpop.f32.mrf.mxu1  ;;  %v7815_v58 = vld [vmem:[#allocation50_spill] sm:$0xff] }
 0x2d0   : > { %v1276_v38 = vadd.f32 %v1275_v23, %v7813_v42  ;;  %v3082_v44 = vrot.slane %v7815_v58, 3  ;;  %v5503_v23 = vld [vmem:[%s5705_s26 + $0x38] sm:$0xff]  ;;  %v7817_v42 = vld [vmem:[#allocation70_spill] sm:$0xff] }
 0x2d1   : > { %v1932_v21 = vadd.f32 %v1851_v9, %v1689_v25  ;;  %v4066_v25 = vld [vmem:[%s6749_s8 + $0x20] sm:$0xff] }
 0x2d2   : > { %5062 = vmatmul.msk.bf16.gmra.mxu1 %vm794_vm2, %v2427_v45  ;;  %4148 = vperm.xlu2 %5478, %v4066_v25   ;;  %v3542_v25 = vrot.slane %v5503_v23, 3 }
 0x2d3   : > { %v2327_v33 = vpop.f32.mrf.mxu0  ;;  %5095 = vmatmul.msk.bf16.gmra.mxu2 %vm794_vm2, %v2429_v2  ;;  %v6819_v34 = vadd.f32 %v2324_v49, %v1932_v21  ;;  %v3081_v49 = vrot.slane %v7814_v3, 2 }
 0x2d4   : > { %5128 = vmatmul.msk.bf16.gmra.mxu3 %vm794_vm2, %v3080_v29  ;;  %v2430_v29 = vrot.slane %v5503_v23, 2  ;;  %v7820_v23 = vld [vmem:[#allocation6_spill] sm:$0xff] }
 0x2d5   : > { %7812 = vst [vmem:[#allocation37_spill] sm:$0xff] %v6819_v34  ;;  %v3083_v46 = vor.u32 %v3082_v44, %v3081_v49  ;;  %v4071_v49 = vld [vmem:[%s6749_s8 + $0x48] sm:$0xff] }
 0x2d6   : > { %5161 = vmatmul.msk.bf16.gmra.mxu0 %vm794_vm2, %v3541_v1  ;;  %v1611_v0 = vpop.f32.mrf.mxu2  ;;  %v4067_v1 = vld [vmem:[%s6749_s8 + $0x28] sm:$0xff]  ;;  %4173 = vperm.xlu0 %5476, %v4071_v49  }
 0x2d7   : > { %v1690_v27 = vadd.f32 %v1611_v0, %v1276_v38  ;;  %v1854_v55 = vpop.f32.mrf.mxu3  ;;  %v1277_v45 = vpop.f32.mrf.mxu1  ;;  %v3084_v3 = vsel %vm3061_vm6, %v3079_v43, %v3083_v46 }
 0x2d8   : > { %v1278_v34 = vadd.f32 %v1277_v45, %v7817_v42  ;;  %v3543_v45 = vsel %vm3532_vm7, %v3540_v18, %v3542_v25  ;;  %v7821_v42 = vld [vmem:[#allocation5_spill] sm:$0xff] }
 0x2d9   : > { %v1933_v24 = vadd.f32 %v1854_v55, %v1690_v27  ;;  %v2431_v27 = vsel %vm2418_vm5, %v2428_v20, %v2430_v29  ;;  %v3086_v18 = vrot.slane %v7821_v42, 3 }
 0x2da   : > { %4153 = vperm.xlu2 %5478, %v4067_v1   ;;  %v3085_v1 = vrot.slane %v7820_v23, 2 }
 0x2db   : > { %v2329_v9 = vpop.f32.mrf.mxu0  ;;  %v6828_v21 = vadd.f32 %v2327_v33, %v1933_v24 }
 0x2dd   : > { %7816 = vst [vmem:[#allocation32_spill] sm:$0xff] %v6828_v21 }
 0x2de   : > { %v1613_v53 = vpop.f32.mrf.mxu2 }
 0x2df   : > { %v1691_v38 = vadd.f32 %v1613_v53, %v1278_v34  ;;  %v1856_v0 = vpop.f32.mrf.mxu3  ;;  %v1280_v4 = vpop.f32.mrf.mxu1  ;;  %v7819_v53 = vld [vmem:[#allocation72_spill] sm:$0xff] }
 0x2e0   : > { %v1281_v34 = vadd.f32 %v1280_v4, %v7819_v53  ;;  %v7823_v4 = vld [vmem:[#allocation75_spill] sm:$0xff]  ;;  %v3087_v53 = vor.u32 %v3086_v18, %v3085_v1  ;;  %v4070_v1 = vld [vmem:[%s6749_s8 + $0x40] sm:$0xff] }
 0x2e1   : > { %v1934_v55 = vadd.f32 %v1856_v0, %v1691_v38  ;;  %v4072_v38 = vld [vmem:[%s6749_s8 + $0x50] sm:$0xff] }
 0x2e2   : > { %5063 = vmatmul.msk.bf16.gmra.mxu1 %vm794_vm2, %v2429_v2  ;;  %4178 = vperm.xlu1 %5477, %v4072_v38   ;;  %v3088_v42 = vsel %vm3061_vm6, %v3083_v46, %v3087_v53 }
 0x2e3   : > { %v2332_v33 = vpop.f32.mrf.mxu0  ;;  %5096 = vmatmul.msk.bf16.gmra.mxu2 %vm794_vm2, %v2431_v27  ;;  %v6838_v24 = vadd.f32 %v2329_v9, %v1934_v55  ;;  %v5504_v55 = vld [vmem:[%s5705_s26 + $0x40] sm:$0xff]  ;;  %4168 = vperm.xlu2 %5478, %v4070_v1  }
 0x2e4   : > { %5129 = vmatmul.msk.bf16.gmra.mxu3 %vm794_vm2, %v3084_v3  ;;  %v2432_v3 = vrot.slane %v5504_v55, 2  ;;  %v3544_v49 = vrot.slane %v5504_v55, 3  ;;  %v7826_v55 = vld [vmem:[#allocation13_spill] sm:$0xff] }
 0x2e5   : > { %7818 = vst [vmem:[#allocation58_spill] sm:$0xff] %v6838_v24 }
 0x2e6   : > { %5162 = vmatmul.msk.bf16.gmra.mxu0 %vm794_vm2, %v3543_v45  ;;  %v1616_v20 = vpop.f32.mrf.mxu2 }
 0x2e7   : > { %v1692_v43 = vadd.f32 %v1616_v20, %v1281_v34  ;;  %v1859_v58 = vpop.f32.mrf.mxu3  ;;  %v1282_v2 = vpop.f32.mrf.mxu1 }
 0x2e8   : > { %v1283_v45 = vadd.f32 %v1282_v2, %v7823_v4  ;;  %v3089_v4 = vrot.slane %v7826_v55, 2 }
 0x2e9   : > { %v1935_v44 = vadd.f32 %v1859_v58, %v1692_v43  ;;  %v2433_v58 = vsel %vm2418_vm5, %v2430_v29, %v2432_v3 }
 0x2eb   : > { %v2334_v9 = vpop.f32.mrf.mxu0  ;;  %v6847_v0 = vadd.f32 %v2332_v33, %v1935_v44  ;;  %v3545_v33 = vsel %vm3532_vm7, %v3542_v25, %v3544_v49 }
 0x2ed   : > { %7822 = vst [vmem:[#allocation60_spill] sm:$0xff] %v6847_v0 }
 0x2ee   : > { %v1618_v24 = vpop.f32.mrf.mxu2 }
 0x2ef   : > { %v1693_v34 = vadd.f32 %v1618_v24, %v1283_v45  ;;  %v1861_v20 = vpop.f32.mrf.mxu3  ;;  %v1285_v43 = vpop.f32.mrf.mxu1  ;;  %v7825_v24 = vld [vmem:[#allocation78_spill] sm:$0xff]  ;;  %v7827_v45 = vld [vmem:[#allocation7_spill] sm:$0xff] }
 0x2f0   : > { %v1286_v44 = vadd.f32 %v1285_v43, %v7825_v24  ;;  %v3090_v25 = vrot.slane %v7827_v45, 3  ;;  %v7829_v43 = vld [vmem:[#allocation81_spill] sm:$0xff] }
 0x2f1   : > { %v1936_v23 = vadd.f32 %v1861_v20, %v1693_v34  ;;  %v4074_v34 = vld [vmem:[%s6749_s8 + $0x60] sm:$0xff] }
 0x2f2   : > { %5064 = vmatmul.msk.bf16.gmra.mxu1 %vm794_vm2, %v2431_v27  ;;  %4188 = vperm.xlu0 %5476, %v4074_v34   ;;  %v3091_v24 = vor.u32 %v3090_v25, %v3089_v4  ;;  %v4075_v4 = vld [vmem:[%s6749_s8 + $0x68] sm:$0xff] }
 0x2f3   : > { %v2337_v21 = vpop.f32.mrf.mxu0  ;;  %5097 = vmatmul.msk.bf16.gmra.mxu2 %vm794_vm2, %v2433_v58  ;;  %v6856_v2 = vadd.f32 %v2334_v9, %v1936_v23  ;;  %v5505_v23 = vld [vmem:[%s5705_s26 + $0x48] sm:$0xff]  ;;  %4193 = vperm.xlu1 %5477, %v4075_v4  }
 0x2f4   : > { %5130 = vmatmul.msk.bf16.gmra.mxu3 %vm794_vm2, %v3088_v42  ;;  %v2434_v42 = vrot.slane %v5505_v23, 2  ;;  %v3546_v1 = vrot.slane %v5505_v23, 3  ;;  %v3092_v45 = vsel %vm3061_vm6, %v3087_v53, %v3091_v24  ;;  %v7832_v23 = vld [vmem:[#allocation20_spill] sm:$0xff] }
 0x2f5   : > { %7824 = vst [vmem:[#allocation43_spill] sm:$0xff] %v6856_v2 }
 0x2f6   : > { %5163 = vmatmul.msk.bf16.gmra.mxu0 %vm794_vm2, %v3545_v33  ;;  %v1621_v29 = vpop.f32.mrf.mxu2 }
 0x2f7   : > { %v1694_v46 = vadd.f32 %v1621_v29, %v1286_v44  ;;  %v1864_v18 = vpop.f32.mrf.mxu3  ;;  %v1287_v27 = vpop.f32.mrf.mxu1 }
 0x2f8   : > { %v1288_v33 = vadd.f32 %v1287_v27, %v7829_v43  ;;  %v3093_v43 = vrot.slane %v7832_v23, 2 }
 0x2f9   : > { %v1937_v38 = vadd.f32 %v1864_v18, %v1694_v46  ;;  %v2435_v18 = vsel %vm2418_vm5, %v2432_v3, %v2434_v42 }
 0x2fb   : > { %v2339_v9 = vpop.f32.mrf.mxu0  ;;  %v6865_v20 = vadd.f32 %v2337_v21, %v1937_v38  ;;  %v3547_v21 = vsel %vm3532_vm7, %v3544_v49, %v3546_v1 }
 0x2fd   : > { %7828 = vst [vmem:[#allocation38_spill] sm:$0xff] %v6865_v20 }
 0x2fe   : > { %v1623_v2 = vpop.f32.mrf.mxu2 }
 0x2ff   : > { %v1695_v44 = vadd.f32 %v1623_v2, %v1288_v33  ;;  %v1866_v29 = vpop.f32.mrf.mxu3  ;;  %v1290_v46 = vpop.f32.mrf.mxu1  ;;  %v7831_v2 = vld [vmem:[#allocation84_spill] sm:$0xff]  ;;  %v7833_v33 = vld [vmem:[#allocation14_spill] sm:$0xff] }
 0x300   : > { %v1291_v38 = vadd.f32 %v1290_v46, %v7831_v2  ;;  %v3094_v49 = vrot.slane %v7833_v33, 3  ;;  %v7834_v46 = vld [vmem:[#allocation87_spill] sm:$0xff] }
 0x301   : > { %v1938_v55 = vadd.f32 %v1866_v29, %v1695_v44  ;;  %v4073_v44 = vld [vmem:[%s6749_s8 + $0x58] sm:$0xff] }
 0x302   : > { %5065 = vmatmul.msk.bf16.gmra.mxu1 %vm794_vm2, %v2433_v58  ;;  %4183 = vperm.xlu2 %5478, %v4073_v44   ;;  %v3095_v2 = vor.u32 %v3094_v49, %v3093_v43  ;;  %v4077_v43 = vld [vmem:[%s6749_s8 + $0x78] sm:$0xff] }
 0x303   : > { %v2342_v0 = vpop.f32.mrf.mxu0  ;;  %5098 = vmatmul.msk.bf16.gmra.mxu2 %vm794_vm2, %v2435_v18  ;;  %v6874_v27 = vadd.f32 %v2339_v9, %v1938_v55  ;;  %v5506_v55 = vld [vmem:[%s5705_s26 + $0x50] sm:$0xff]  ;;  %4203 = vperm.xlu0 %5476, %v4077_v43  }
 0x304   : > { %5131 = vmatmul.msk.bf16.gmra.mxu3 %vm794_vm2, %v3092_v45  ;;  %v2436_v45 = vrot.slane %v5506_v55, 2  ;;  %v3548_v4 = vrot.slane %v5506_v55, 3  ;;  %v3096_v33 = vsel %vm3061_vm6, %v3091_v24, %v3095_v2  ;;  %v3097_v55 = vrot.slane %v5868_v61, 2 }
 0x305   : > { %7830 = vst [vmem:[#allocation62_spill] sm:$0xff] %v6874_v27 }
 0x306   : > { %5164 = vmatmul.msk.bf16.gmra.mxu0 %vm794_vm2, %v3547_v21  ;;  %v1626_v3 = vpop.f32.mrf.mxu2 }
 0x307   : > { %v1696_v53 = vadd.f32 %v1626_v3, %v1291_v38  ;;  %v1869_v25 = vpop.f32.mrf.mxu3  ;;  %v1292_v58 = vpop.f32.mrf.mxu1 }
 0x308   : > { %v1293_v21 = vadd.f32 %v1292_v58, %v7834_v46 }
 0x309   : > { %v1939_v34 = vadd.f32 %v1869_v25, %v1696_v53  ;;  %v2437_v25 = vsel %vm2418_vm5, %v2434_v42, %v2436_v45 }
 0x30b   : > { %v2344_v9 = vpop.f32.mrf.mxu0  ;;  %v6883_v29 = vadd.f32 %v2342_v0, %v1939_v34  ;;  %v3549_v0 = vsel %vm3532_vm7, %v3546_v1, %v3548_v4  ;;  %v3098_v1 = vrot.slane %v5827_v13, 3 }
 0x30e   : > { %v1628_v27 = vpop.f32.mrf.mxu2 }
 0x30f   : > { %v1697_v38 = vadd.f32 %v1628_v27, %v1293_v21  ;;  %v1871_v3 = vpop.f32.mrf.mxu3  ;;  %v1295_v53 = vpop.f32.mrf.mxu1  ;;  %v7835_v27 = vld [vmem:[#allocation90_spill] sm:$0xff]  ;;  %v5507_v21 = vld [vmem:[%s5705_s26 + $0x58] sm:$0xff] }
 0x310   : > { %v1296_v34 = vadd.f32 %v1295_v53, %v7835_v27 }
 0x311   : > { %v1940_v23 = vadd.f32 %v1871_v3, %v1697_v38  ;;  %v2438_v38 = vrot.slane %v5507_v21, 2  ;;  %v7836_v3 = vld [vmem:[#allocation93_spill] sm:$0xff] }
 0x312   : > { %5066 = vmatmul.msk.bf16.gmra.mxu1 %vm794_vm2, %v2435_v18 }
 0x313   : > { %v2347_v20 = vpop.f32.mrf.mxu0  ;;  %5099 = vmatmul.msk.bf16.gmra.mxu2 %vm794_vm2, %v2437_v25  ;;  %v6892_v58 = vadd.f32 %v2344_v9, %v1940_v23  ;;  %v3099_v23 = vor.u32 %v3098_v1, %v3097_v55  ;;  %v2439_v61 = vsel %vm2418_vm5, %v2436_v45, %v2438_v38  ;;  %v4076_v55 = vld [vmem:[%s6749_s8 + $0x70] sm:$0xff] }
 0x314   : > { %5132 = vmatmul.msk.bf16.gmra.mxu3 %vm794_vm2, %v3096_v33  ;;  %v4078_v33 = vld [vmem:[%s6749_s8 + $0x80] sm:$0xff]  ;;  %4198 = vperm.xlu2 %5478, %v4076_v55  }
 0x315   : > { %4208 = vperm.xlu1 %5477, %v4078_v33   ;;  %v3100_v13 = vsel %vm3061_vm6, %v3095_v2, %v3099_v23  ;;  %v6919_v33 = vld [vmem:[%s5705_s26 + $0x60] sm:$0xff] }
 0x316   : > { %5165 = vmatmul.msk.bf16.gmra.mxu0 %vm794_vm2, %v3549_v0  ;;  %v1631_v42 = vpop.f32.mrf.mxu2 }
 0x317   : > { %v1698_v24 = vadd.f32 %v1631_v42, %v1296_v34  ;;  %v1874_v49 = vpop.f32.mrf.mxu3  ;;  %v1297_v18 = vpop.f32.mrf.mxu1  ;;  %v3550_v42 = vrot.slane %v5507_v21, 3 }
 0x318   : > { %v1298_v53 = vadd.f32 %v1297_v18, %v7836_v3  ;;  %v3101_v3 = vrot.slane %v5912_v5, 2 }
 0x319   : > { %v1941_v44 = vadd.f32 %v1874_v49, %v1698_v24  ;;  %v3551_v49 = vsel %vm3532_vm7, %v3548_v4, %v3550_v42  ;;  %v3102_v4 = vrot.slane %v5871_v62, 3 }
 0x31b   : > { %v2349_v9 = vpop.f32.mrf.mxu0  ;;  %v6900_v46 = vadd.f32 %v2347_v20, %v1941_v44 }
 0x31e   : > { %v1633_v0 = vpop.f32.mrf.mxu2 }
 0x31f   : > { %v1699_v27 = vadd.f32 %v1633_v0, %v1298_v53  ;;  %v1876_v34 = vpop.f32.mrf.mxu3  ;;  %v2592_v43 = vpop.f32.mrf.mxu1 }
 0x320   : > { %v2752_v44 = vadd.f32 %v2592_v43, %v6317_v60  ;;  %v4129_v53 = vpop.permute.xlu0 %4128  ;;  %v2440_v60 = vrot.slane %v6919_v33, 2  ;;  %v3103_v43 = vor.u32 %v3102_v4, %v3101_v3 }
 0x321   : > { %v1942_v24 = vadd.f32 %v1876_v34, %v1699_v27  ;;  %v6926_v34 = vld [vmem:[%s7510_s3] ss:$0 sm:$0xff] }
 0x322   : > { %5067 = vmatmul.msk.bf16.gmra.mxu1 %vm794_vm2, %v2437_v25  ;;  %v3104_v55 = vsel %vm3061_vm6, %v3099_v23, %v3103_v43 }
 0x323   : > { %v3706_v20 = vpop.f32.mrf.mxu0  ;;  %5100 = vmatmul.msk.bf16.gmra.mxu2 %vm794_vm2, %v2439_v61  ;;  %v6910_v18 = vadd.f32 %v2349_v9, %v1942_v24  ;;  %v4080_v24 = vld [vmem:[%s6749_s8 + $0x90] sm:$0xff] }
 0x324   : > { %5133 = vmatmul.msk.bf16.gmra.mxu3 %vm794_vm2, %v3100_v13  ;;  %4218 = vperm.xlu0 %5476, %v4080_v24  }
 0x326   : > { %5166 = vmatmul.msk.bf16.gmra.mxu0 %vm794_vm2, %v3551_v49  ;;  %v2835_v45 = vpop.f32.mrf.mxu2  ;;  %v3552_v49 = vrot.slane %v6919_v33, 3 }
 0x327   : > { %v2995_v2 = vadd.f32 %v2835_v45, %v2752_v44  ;;  %v3306_v1 = vpop.f32.mrf.mxu3  ;;  %v2594_v25 = vpop.f32.mrf.mxu1  ;;  %v2441_v45 = vsel %vm2418_vm5, %v2438_v38, %v2440_v60 }
 0x328   : > { %v2753_v27 = vadd.f32 %v2594_v25, %v6326_v37  ;;  %v3553_v25 = vsel %vm3532_vm7, %v3550_v42, %v3552_v49  ;;  %v4134_v4 = vpop.permute.xlu0 %4133 }
 0x329   : > { %v3466_v21 = vadd.f32 %v3306_v1, %v2995_v2 }
 0x32b   : > { %v3708_v9 = vpop.f32.mrf.mxu0  ;;  %v3866_v0 = vadd.f32 %v3706_v20, %v3466_v21 }
 0x32d   : > { %v3934_v37 = vadd.f32 %v6926_v34, %v3866_v0 }
 0x32e   : > { %v2837_v13 = vpop.f32.mrf.mxu2 }
 0x32f   : > { %v2996_v62 = vadd.f32 %v2837_v13, %v2753_v27  ;;  %v3308_v5 = vpop.f32.mrf.mxu3  ;;  %v2597_v44 = vpop.f32.mrf.mxu1  ;;  %v3998_v21 = vmax.f32 %v3934_v37, 0.0  ;;  %v3105_v27 = vrot.slane %v5956_v56, 2  ;;  %v6947_v37 = vld [vmem:[%s5705_s26 + $0x68] sm:$0xff] }
 0x330   : > { %v2754_v38 = vadd.f32 %v2597_v44, %v6333_v17 }
 0x331   : > { %v3467_v20 = vadd.f32 %v3308_v5, %v2996_v62  ;;  %v4446_v24 = vmul.f32 %v4129_v53, %v3998_v21  ;;  %v3106_v62 = vrot.slane %v5915_v7, 3  ;;  %v4079_v53 = vld [vmem:[%s6749_s8 + $0x88] sm:$0xff] }
 0x332   : > { %5068 = vmatmul.msk.bf16.gmra.mxu1 %vm794_vm2, %v2439_v61  ;;  %4213 = vperm.xlu2 %5478, %v4079_v53  }
 0x333   : > { %v3867_v2 = vadd.f32 %v3708_v9, %v3467_v20  ;;  %v3711_v1 = vpop.f32.mrf.mxu0  ;;  %5101 = vmatmul.msk.bf16.gmra.mxu2 %vm794_vm2, %v2441_v45  ;;  %v4081_v9 = vld [vmem:[%s6749_s8 + $0x98] sm:$0xff]  ;;  %v4139_v20 = vpop.permute.xlu1 %4138  ;;  %v3107_v56 = vor.u32 %v3106_v62, %v3105_v27 }
 0x334   : > { %5134 = vmatmul.msk.bf16.gmra.mxu3 %vm794_vm2, %v3104_v55  ;;  %4223 = vperm.xlu1 %5477, %v4081_v9   ;;  %v2442_v55 = vrot.slane %v6947_v37, 2 }
 0x335   : > { %v3935_v3 = vadd.f32 %v6926_v34, %v3867_v2 }
 0x336   : > { %5167 = vmatmul.msk.bf16.gmra.mxu0 %vm794_vm2, %v3553_v25  ;;  %v2840_v23 = vpop.f32.mrf.mxu2 }
 0x337   : > { %v2997_v33 = vadd.f32 %v2840_v23, %v2754_v38  ;;  %v3311_v61 = vpop.f32.mrf.mxu3  ;;  %v3999_v0 = vmax.f32 %v3935_v3, 0.0  ;;  %v2599_v42 = vpop.f32.mrf.mxu1  ;;  %v3554_v3 = vrot.slane %v6947_v37, 3 }
 0x338   : > { %v2755_v25 = vadd.f32 %v2599_v42, %v6342_v41 }
 0x339   : > { %v3468_v17 = vadd.f32 %v3311_v61, %v2997_v33  ;;  %v4447_v13 = vmul.f32 %v4134_v4, %v3999_v0  ;;  %v2443_v4 = vsel %vm2418_vm5, %v2440_v60, %v2442_v55  ;;  %v3108_v33 = vsel %vm3061_vm6, %v3103_v43, %v3107_v56 }
 0x33a   : > { %v3555_v41 = vsel %vm3532_vm7, %v3552_v49, %v3554_v3 }
 0x33b   : > { %v5241_v5 = vpack.c.bf16 %v4447_v13, %v4446_v24  ;;  %v3713_v44 = vpop.f32.mrf.mxu0  ;;  %v3868_v2 = vadd.f32 %v3711_v1, %v3468_v17  ;;  %v4144_v43 = vpop.permute.xlu1 %4143  ;;  %v4083_v17 = vld [vmem:[%s6749_s8 + $0xa8] sm:$0xff] }
 0x33c   : > { %4233 = vperm.xlu0 %5476, %v4083_v17  }
 0x33d   : > { %5242 = vst [vmem:[%s6950_s13] sm:$0xff] %v5241_v5   ;;  %v3936_v1 = vadd.f32 %v6926_v34, %v3868_v2  ;;  %v3109_v5 = vrot.slane %v6001_v54, 2  ;;  %v3110_v2 = vrot.slane %v5959_v31, 3 }
 0x33e   : > { %v2842_v21 = vpop.f32.mrf.mxu2 }
 0x33f   : > { %v2998_v38 = vadd.f32 %v2842_v21, %v2755_v25  ;;  %v3313_v7 = vpop.f32.mrf.mxu3  ;;  %v2602_v23 = vpop.f32.mrf.mxu1  ;;  %v4000_v42 = vmax.f32 %v3936_v1, 0.0  ;;  %v3111_v1 = vor.u32 %v3110_v2, %v3109_v5  ;;  %v3114_v2 = vrot.slane %v6004_v47, 3 }
 0x340   : > { %v2756_v27 = vadd.f32 %v2602_v23, %v6349_v16  ;;  %v4149_v21 = vpop.permute.xlu2 %4148 }
 0x341   : > { %v3469_v9 = vadd.f32 %v3313_v7, %v2998_v38  ;;  %v6970_v38 = vld [vmem:[%s5705_s26 + $0x70] sm:$0xff] }
 0x342   : > { %5069 = vmatmul.msk.bf16.gmra.mxu1 %vm794_vm2, %v2441_v45  ;;  %v2444_v7 = vrot.slane %v6970_v38, 2 }
 0x343   : > { %v3869_v61 = vadd.f32 %v3713_v44, %v3469_v9  ;;  %v3716_v0 = vpop.f32.mrf.mxu0  ;;  %5102 = vmatmul.msk.bf16.gmra.mxu2 %vm794_vm2, %v2443_v4  ;;  %v4448_v44 = vmul.f32 %v4139_v20, %v4000_v42 }
 0x344   : > { %5135 = vmatmul.msk.bf16.gmra.mxu3 %vm794_vm2, %v3108_v33  ;;  %v4084_v33 = vld [vmem:[%s6749_s8 + $0xb0] sm:$0xff]  ;;  %v2445_v42 = vsel %vm2418_vm5, %v2442_v55, %v2444_v7 }
 0x345   : > { %v3937_v60 = vadd.f32 %v6926_v34, %v3869_v61  ;;  %4238 = vperm.xlu1 %5477, %v4084_v33  }
 0x346   : > { %5168 = vmatmul.msk.bf16.gmra.mxu0 %vm794_vm2, %v3555_v41  ;;  %v2845_v24 = vpop.f32.mrf.mxu2  ;;  %v3556_v41 = vrot.slane %v6970_v38, 3  ;;  %v6991_v38 = vld [vmem:[%s5705_s26 + $0x78] sm:$0xff] }
 0x347   : > { %v2999_v13 = vadd.f32 %v2845_v24, %v2756_v27  ;;  %v3316_v45 = vpop.f32.mrf.mxu3  ;;  %v4001_v62 = vmax.f32 %v3937_v60, 0.0  ;;  %v2604_v49 = vpop.f32.mrf.mxu1 }
 0x348   : > { %v2757_v9 = vadd.f32 %v2604_v49, %v6358_v26  ;;  %v3557_v26 = vsel %vm3532_vm7, %v3554_v3, %v3556_v41 }
 0x349   : > { %v3470_v37 = vadd.f32 %v3316_v45, %v2999_v13  ;;  %v4449_v16 = vmul.f32 %v4144_v43, %v4001_v62  ;;  %v4082_v62 = vld [vmem:[%s6749_s8 + $0xa0] sm:$0xff] }
 0x34a   : > { %4228 = vperm.xlu2 %5478, %v4082_v62  }
 0x34b   : > { %v5246_v25 = vpack.c.bf16 %v4449_v16, %v4448_v44  ;;  %v3718_v53 = vpop.f32.mrf.mxu0  ;;  %v3870_v23 = vadd.f32 %v3716_v0, %v3470_v37  ;;  %v3112_v0 = vsel %vm3061_vm6, %v3107_v56, %v3111_v1  ;;  %v4154_v56 = vpop.permute.xlu2 %4153  ;;  %v3113_v44 = vrot.slane %v6054_v35, 2 }
 0x34d   : > { %5400 = vst [vmem:[%s6950_s13 + $0x8] sm:$0xff] %v5246_v25   ;;  %v3938_v60 = vadd.f32 %v6926_v34, %v3870_v23  ;;  %v2446_v23 = vrot.slane %v6991_v38, 2 }
 0x34e   : > { %v2847_v61 = vpop.f32.mrf.mxu2 }
 0x34f   : > { %v3000_v54 = vadd.f32 %v2847_v61, %v2757_v9  ;;  %v3318_v20 = vpop.f32.mrf.mxu3  ;;  %v2607_v31 = vpop.f32.mrf.mxu1  ;;  %v4002_v17 = vmax.f32 %v3938_v60, 0.0  ;;  %v3115_v61 = vor.u32 %v3114_v2, %v3113_v44  ;;  %v2447_v47 = vsel %vm2418_vm5, %v2444_v7, %v2446_v23 }
 0x350   : > { %v2758_v13 = vadd.f32 %v2607_v31, %v6365_v12  ;;  %v3558_v31 = vrot.slane %v6991_v38, 3  ;;  %v3118_v44 = vrot.slane %v5726_v19, 3 }
 0x351   : > { %v3471_v27 = vadd.f32 %v3318_v20, %v3000_v54  ;;  %v4450_v37 = vmul.f32 %v4149_v21, %v4002_v17  ;;  %v4086_v54 = vld [vmem:[%s6749_s8 + $0xc0] sm:$0xff]  ;;  %v4159_v17 = vpop.permute.xlu0 %4158 }
 0x352   : > { %5070 = vmatmul.msk.bf16.gmra.mxu1 %vm794_vm2, %v2443_v4  ;;  %4248 = vperm.xlu0 %5476, %v4086_v54  }
 0x353   : > { %v3871_v24 = vadd.f32 %v3718_v53, %v3471_v27  ;;  %v3721_v43 = vpop.f32.mrf.mxu0  ;;  %5103 = vmatmul.msk.bf16.gmra.mxu2 %vm794_vm2, %v2445_v42 }
 0x354   : > { %5136 = vmatmul.msk.bf16.gmra.mxu3 %vm794_vm2, %v3112_v0 }
 0x355   : > { %v3939_v55 = vadd.f32 %v6926_v34, %v3871_v24  ;;  %v3116_v24 = vsel %vm3061_vm6, %v3111_v1, %v3115_v61 }
 0x356   : > { %5169 = vmatmul.msk.bf16.gmra.mxu0 %vm794_vm2, %v3557_v26  ;;  %v2850_v45 = vpop.f32.mrf.mxu2 }
 0x357   : > { %v3001_v49 = vadd.f32 %v2850_v45, %v2758_v13  ;;  %v3321_v4 = vpop.f32.mrf.mxu3  ;;  %v4003_v5 = vmax.f32 %v3939_v55, 0.0  ;;  %v2609_v3 = vpop.f32.mrf.mxu1 }
 0x358   : > { %v2759_v33 = vadd.f32 %v2609_v3, %v6374_v36  ;;  %v3559_v36 = vsel %vm3532_vm7, %v3556_v41, %v3558_v31  ;;  %v4164_v45 = vpop.permute.xlu1 %4163 }
 0x359   : > { %v3472_v16 = vadd.f32 %v3321_v4, %v3001_v49  ;;  %v4451_v12 = vmul.f32 %v4154_v56, %v4003_v5  ;;  %v4087_v56 = vld [vmem:[%s6749_s8 + $0xc8] sm:$0xff]  ;;  %v3117_v4 = vrot.slane %v7701_v40, 2 }
 0x35a   : > { %4253 = vperm.xlu1 %5477, %v4087_v56  }
 0x35b   : > { %v5251_v25 = vpack.c.bf16 %v4451_v12, %v4450_v37  ;;  %v3723_v53 = vpop.f32.mrf.mxu0  ;;  %v3872_v9 = vadd.f32 %v3721_v43, %v3472_v16  ;;  %v7012_v12 = vld [vmem:[%s5705_s26 + $0x80] sm:$0xff]  ;;  %v3119_v38 = vor.u32 %v3118_v44, %v3117_v4 }
 0x35c   : > { %v2448_v2 = vrot.slane %v7012_v12, 2  ;;  %v4090_v44 = vld [vmem:[%s6749_s8 + $0xe0] sm:$0xff] }
 0x35d   : > { %5401 = vst [vmem:[%s6950_s13 + $0x10] sm:$0xff] %v5251_v25   ;;  %v3940_v0 = vadd.f32 %v6926_v34, %v3872_v9  ;;  %v4085_v9 = vld [vmem:[%s6749_s8 + $0xb8] sm:$0xff] }
 0x35e   : > { %v2852_v20 = vpop.f32.mrf.mxu2  ;;  %4243 = vperm.xlu2 %5478, %v4085_v9   ;;  %v2449_v19 = vsel %vm2418_vm5, %v2446_v23, %v2448_v2 }
 0x35f   : > { %v3002_v35 = vadd.f32 %v2852_v20, %v2759_v33  ;;  %v3323_v21 = vpop.f32.mrf.mxu3  ;;  %v2612_v27 = vpop.f32.mrf.mxu1  ;;  %v4004_v13 = vmax.f32 %v3940_v0, 0.0  ;;  %v3560_v20 = vrot.slane %v7012_v12, 3 }
 0x360   : > { %v2760_v7 = vadd.f32 %v2612_v27, %v6381_v6 }
 0x361   : > { %v3473_v60 = vadd.f32 %v3323_v21, %v3002_v35  ;;  %v4452_v5 = vmul.f32 %v4159_v17, %v4004_v13  ;;  %v4174_v17 = vpop.permute.xlu0 %4173  ;;  %v4089_v13 = vld [vmem:[%s6749_s8 + $0xd8] sm:$0xff] }
 0x362   : > { %5071 = vmatmul.msk.bf16.gmra.mxu1 %vm794_vm2, %v2445_v42  ;;  %4263 = vperm.xlu0 %5476, %v4089_v13   ;;  %v7054_v13 = vld [vmem:[%s5705_s26 + $0x90] sm:$0xff] }
 0x363   : > { %v3873_v43 = vadd.f32 %v3723_v53, %v3473_v60  ;;  %v3726_v26 = vpop.f32.mrf.mxu0  ;;  %5104 = vmatmul.msk.bf16.gmra.mxu2 %vm794_vm2, %v2447_v47  ;;  %v3120_v60 = vsel %vm3061_vm6, %v3115_v61, %v3119_v38  ;;  %4268 = vperm.xlu1 %5477, %v4090_v44  }
 0x364   : > { %5137 = vmatmul.msk.bf16.gmra.mxu3 %vm794_vm2, %v3116_v24 }
 0x365   : > { %v3941_v55 = vadd.f32 %v6926_v34, %v3873_v43  ;;  %v4169_v43 = vpop.permute.xlu2 %4168 }
 0x366   : > { %5170 = vmatmul.msk.bf16.gmra.mxu0 %vm794_vm2, %v3559_v36  ;;  %v2855_v1 = vpop.f32.mrf.mxu2 }
 0x367   : > { %v3003_v42 = vadd.f32 %v2855_v1, %v2760_v7  ;;  %v3326_v62 = vpop.f32.mrf.mxu3  ;;  %v4005_v49 = vmax.f32 %v3941_v55, 0.0  ;;  %v2614_v41 = vpop.f32.mrf.mxu1  ;;  %v3121_v1 = vrot.slane %v7702_v39, 2 }
 0x368   : > { %v2761_v53 = vadd.f32 %v2614_v41, %v6390_v57  ;;  %v3561_v57 = vsel %vm3532_vm7, %v3558_v31, %v3560_v20  ;;  %v7033_v41 = vld [vmem:[%s5705_s26 + $0x88] sm:$0xff] }
 0x369   : > { %v3474_v3 = vadd.f32 %v3326_v62, %v3003_v42  ;;  %v4453_v6 = vmul.f32 %v4164_v45, %v4005_v49  ;;  %v3122_v42 = vrot.slane %v7703_v52, 3  ;;  %v2450_v4 = vrot.slane %v7033_v41, 2  ;;  %v4189_v44 = vpop.permute.xlu0 %4188 }
 0x36a   : > { %v3562_v12 = vrot.slane %v7033_v41, 3 }
 0x36b   : > { %v5256_v37 = vpack.c.bf16 %v4453_v6, %v4452_v5  ;;  %v3728_v16 = vpop.f32.mrf.mxu0  ;;  %v3874_v25 = vadd.f32 %v3726_v26, %v3474_v3  ;;  %v3123_v6 = vor.u32 %v3122_v42, %v3121_v1  ;;  %v2451_v52 = vsel %vm2418_vm5, %v2448_v2, %v2450_v4  ;;  %v4092_v1 = vld [vmem:[%s6749_s8 + $0xf0] sm:$0xff] }
 0x36c   : > { %4278 = vperm.xlu0 %5476, %v4092_v1  }
 0x36d   : > { %5402 = vst [vmem:[%s6950_s13 + $0x18] sm:$0xff] %v5256_v37   ;;  %v3942_v27 = vadd.f32 %v6926_v34, %v3874_v25 }
 0x36e   : > { %v2857_v33 = vpop.f32.mrf.mxu2 }
 0x36f   : > { %v3004_v40 = vadd.f32 %v2857_v33, %v2761_v53  ;;  %v3328_v54 = vpop.f32.mrf.mxu3  ;;  %v2617_v35 = vpop.f32.mrf.mxu1  ;;  %v4006_v26 = vmax.f32 %v3942_v27, 0.0  ;;  %v3124_v33 = vsel %vm3061_vm6, %v3119_v38, %v3123_v6 }
 0x370   : > { %v2762_v23 = vadd.f32 %v2617_v35, %v6397_v48  ;;  %v4179_v35 = vpop.permute.xlu1 %4178 }
 0x371   : > { %v3475_v21 = vadd.f32 %v3328_v54, %v3004_v40  ;;  %v4454_v45 = vmul.f32 %v4169_v43, %v4006_v26  ;;  %v3125_v43 = vrot.slane %v7704_v28, 2 }
 0x372   : > { %5072 = vmatmul.msk.bf16.gmra.mxu1 %vm794_vm2, %v2447_v47 }
 0x373   : > { %v3875_v0 = vadd.f32 %v3728_v16, %v3475_v21  ;;  %v3731_v24 = vpop.f32.mrf.mxu0  ;;  %5105 = vmatmul.msk.bf16.gmra.mxu2 %vm794_vm2, %v2449_v19 }
 0x374   : > { %5138 = vmatmul.msk.bf16.gmra.mxu3 %vm794_vm2, %v3120_v60  ;;  %v4184_v60 = vpop.permute.xlu2 %4183 }
 0x375   : > { %v3943_v36 = vadd.f32 %v6926_v34, %v3875_v0  ;;  %v4088_v0 = vld [vmem:[%s6749_s8 + $0xd0] sm:$0xff] }
 0x376   : > { %5171 = vmatmul.msk.bf16.gmra.mxu0 %vm794_vm2, %v3561_v57  ;;  %v2860_v61 = vpop.f32.mrf.mxu2  ;;  %4258 = vperm.xlu2 %5478, %v4088_v0  }
 0x377   : > { %v3005_v47 = vadd.f32 %v2860_v61, %v2762_v23  ;;  %v3331_v7 = vpop.f32.mrf.mxu3  ;;  %v4007_v55 = vmax.f32 %v3943_v36, 0.0  ;;  %v2619_v31 = vpop.f32.mrf.mxu1  ;;  %v3126_v36 = vrot.slane %v7705_v63, 3 }
 0x378   : > { %v2763_v3 = vadd.f32 %v2619_v31, %v6409_v51  ;;  %v3563_v51 = vsel %vm3532_vm7, %v3560_v20, %v3562_v12 }
 0x379   : > { %v3476_v56 = vadd.f32 %v3331_v7, %v3005_v47  ;;  %v4455_v48 = vmul.f32 %v4174_v17, %v4007_v55  ;;  %v2452_v47 = vrot.slane %v7054_v13, 2  ;;  %v3127_v31 = vor.u32 %v3126_v36, %v3125_v43  ;;  %v4095_v43 = vld [vmem:[%s6749_s8 + $0x108] sm:$0xff] }
 0x37a   : > { %4293 = vperm.xlu0 %5476, %v4095_v43   ;;  %v7841_v43 = vld [vmem:[#allocation16_spill] sm:$0xff] }
 0x37b   : > { %v5261_v62 = vpack.c.bf16 %v4455_v48, %v4454_v45  ;;  %v3733_v49 = vpop.f32.mrf.mxu0  ;;  %v3876_v5 = vadd.f32 %v3731_v24, %v3476_v56  ;;  %v3564_v48 = vrot.slane %v7054_v13, 3  ;;  %v2453_v63 = vsel %vm2418_vm5, %v2450_v4, %v2452_v47 }
 0x37c   : > { %v3128_v41 = vsel %vm3061_vm6, %v3123_v6, %v3127_v31 }
 0x37d   : > { %5403 = vst [vmem:[%s6950_s13 + $0x20] sm:$0xff] %v5261_v62   ;;  %v3944_v9 = vadd.f32 %v6926_v34, %v3876_v5 }
 0x37e   : > { %v2862_v37 = vpop.f32.mrf.mxu2 }
 0x37f   : > { %v3006_v39 = vadd.f32 %v2862_v37, %v2763_v3  ;;  %v3333_v16 = vpop.f32.mrf.mxu3  ;;  %v2622_v25 = vpop.f32.mrf.mxu1  ;;  %v4008_v21 = vmax.f32 %v3944_v9, 0.0 }
 0x380   : > { %v2764_v2 = vadd.f32 %v2622_v25, %v6416_v15  ;;  %v4194_v25 = vpop.permute.xlu1 %4193 }
 0x381   : > { %v3477_v53 = vadd.f32 %v3333_v16, %v3006_v39  ;;  %v4456_v26 = vmul.f32 %v4179_v35, %v4008_v21  ;;  %v7837_v39 = vld [vmem:[#allocation8_spill] sm:$0xff]  ;;  %v3130_v21 = vrot.slane %v7709_v14, 3 }
 0x382   : > { %5073 = vmatmul.msk.bf16.gmra.mxu1 %vm794_vm2, %v2449_v19 }
 0x383   : > { %v3877_v40 = vadd.f32 %v3733_v49, %v3477_v53  ;;  %v3736_v54 = vpop.f32.mrf.mxu0  ;;  %5106 = vmatmul.msk.bf16.gmra.mxu2 %vm794_vm2, %v2451_v52  ;;  %v4093_v53 = vld [vmem:[%s6749_s8 + $0xf8] sm:$0xff] }
 0x384   : > { %5139 = vmatmul.msk.bf16.gmra.mxu3 %vm794_vm2, %v3124_v33  ;;  %4283 = vperm.xlu1 %5477, %v4093_v53  }
 0x385   : > { %v3945_v27 = vadd.f32 %v6926_v34, %v3877_v40  ;;  %v3129_v40 = vrot.slane %v7708_v11, 2 }
 0x386   : > { %5172 = vmatmul.msk.bf16.gmra.mxu0 %vm794_vm2, %v3563_v51  ;;  %v2865_v38 = vpop.f32.mrf.mxu2 }
 0x387   : > { %v3007_v19 = vadd.f32 %v2865_v38, %v2764_v2  ;;  %v3336_v24 = vpop.f32.mrf.mxu3  ;;  %v4009_v57 = vmax.f32 %v3945_v27, 0.0  ;;  %v2624_v20 = vpop.f32.mrf.mxu1  ;;  %v7075_v38 = vld [vmem:[%s5705_s26 + $0x98] sm:$0xff] }
 0x388   : > { %v2765_v55 = vadd.f32 %v2624_v20, %v6428_v8  ;;  %v3565_v8 = vsel %vm3532_vm7, %v3562_v12, %v3564_v48  ;;  %v4091_v20 = vld [vmem:[%s6749_s8 + $0xe8] sm:$0xff]  ;;  %v3566_v14 = vrot.slane %v7075_v38, 3 }
 0x389   : > { %v3478_v23 = vadd.f32 %v3336_v24, %v3007_v19  ;;  %v4457_v15 = vmul.f32 %v4184_v60, %v4009_v57  ;;  %v2454_v60 = vrot.slane %v7075_v38, 2  ;;  %v7838_v19 = vld [vmem:[#allocation15_spill] sm:$0xff]  ;;  %v3131_v57 = vor.u32 %v3130_v21, %v3129_v40  ;;  %4273 = vperm.xlu2 %5478, %v4091_v20   ;;  %v4101_v40 = vld [vmem:[%s6749_s8 + $0x138] sm:$0xff] }
 0x38a   : > { %v3567_v1 = vsel %vm3532_vm7, %v3564_v48, %v3566_v14 }
 0x38b   : > { %v5266_v61 = vpack.c.bf16 %v4457_v15, %v4456_v26  ;;  %v3738_v17 = vpop.f32.mrf.mxu0  ;;  %v3878_v7 = vadd.f32 %v3736_v54, %v3478_v23  ;;  %v2455_v36 = vsel %vm2418_vm5, %v2452_v47, %v2454_v60  ;;  %v3132_v13 = vsel %vm3061_vm6, %v3127_v31, %v3131_v57 }
 0x38d   : > { %5404 = vst [vmem:[%s6950_s13 + $0x28] sm:$0xff] %v5266_v61   ;;  %v3946_v49 = vadd.f32 %v6926_v34, %v3878_v7 }
 0x38e   : > { %v2867_v45 = vpop.f32.mrf.mxu2 }
 0x38f   : > { %v3008_v28 = vadd.f32 %v2867_v45, %v2765_v55  ;;  %v3338_v56 = vpop.f32.mrf.mxu3  ;;  %v2627_v42 = vpop.f32.mrf.mxu1  ;;  %v4010_v37 = vmax.f32 %v3946_v49, 0.0  ;;  %v4098_v49 = vld [vmem:[%s6749_s8 + $0x120] sm:$0xff] }
 0x390   : > { %v2766_v4 = vadd.f32 %v2627_v42, %v7837_v39  ;;  %v4199_v45 = vpop.permute.xlu2 %4198  ;;  %4308 = vperm.xlu0 %5476, %v4098_v49   ;;  %v3134_v39 = vrot.slane %v7713_v50, 3 }
 0x391   : > { %v3479_v62 = vadd.f32 %v3338_v56, %v3008_v28  ;;  %v4458_v54 = vmul.f32 %v4189_v44, %v4010_v37  ;;  %v7839_v56 = vld [vmem:[#allocation9_spill] sm:$0xff] }
 0x392   : > { %5074 = vmatmul.msk.bf16.gmra.mxu1 %vm794_vm2, %v2451_v52 }
 0x393   : > { %v3879_v5 = vadd.f32 %v3738_v17, %v3479_v62  ;;  %v3741_v3 = vpop.f32.mrf.mxu0  ;;  %5107 = vmatmul.msk.bf16.gmra.mxu2 %vm794_vm2, %v2453_v63  ;;  %v4204_v62 = vpop.permute.xlu0 %4203 }
 0x394   : > { %5140 = vmatmul.msk.bf16.gmra.mxu3 %vm794_vm2, %v3128_v41 }
 0x395   : > { %v3947_v16 = vadd.f32 %v6926_v34, %v3879_v5 }
 0x396   : > { %5173 = vmatmul.msk.bf16.gmra.mxu0 %vm794_vm2, %v3565_v8  ;;  %v2870_v6 = vpop.f32.mrf.mxu2 }
 0x397   : > { %v3009_v52 = vadd.f32 %v2870_v6, %v2766_v4  ;;  %v3341_v9 = vpop.f32.mrf.mxu3  ;;  %v4011_v33 = vmax.f32 %v3947_v16, 0.0  ;;  %v2629_v12 = vpop.f32.mrf.mxu1  ;;  %v7097_v6 = vld [vmem:[%s5705_s26 + $0xa0] sm:$0xff] }
 0x398   : > { %v2767_v24 = vadd.f32 %v2629_v12, %v7838_v19  ;;  %v4096_v12 = vld [vmem:[%s6749_s8 + $0x110] sm:$0xff]  ;;  %v3568_v50 = vrot.slane %v7097_v6, 3  ;;  %4323 = vperm.xlu0 %5476, %v4101_v40   ;;  %v7843_v40 = vld [vmem:[#allocation22_spill] sm:$0xff] }
 0x399   : > { %v3480_v51 = vadd.f32 %v3341_v9, %v3009_v52  ;;  %v4459_v35 = vmul.f32 %v4194_v25, %v4011_v33  ;;  %v2456_v25 = vrot.slane %v7097_v6, 2  ;;  %v7840_v52 = vld [vmem:[#allocation21_spill] sm:$0xff]  ;;  %4298 = vperm.xlu1 %5477, %v4096_v12  }
 0x39b   : > { %v5271_v2 = vpack.c.bf16 %v4459_v35, %v4458_v54  ;;  %v3743_v27 = vpop.f32.mrf.mxu0  ;;  %v3880_v0 = vadd.f32 %v3741_v3, %v3480_v51  ;;  %v3133_v3 = vrot.slane %v7712_v10, 2  ;;  %v2457_v21 = vsel %vm2418_vm5, %v2454_v60, %v2456_v25  ;;  %v4209_v60 = vpop.permute.xlu1 %4208 }
 0x39d   : > { %5405 = vst [vmem:[%s6950_s13 + $0x30] sm:$0xff] %v5271_v2   ;;  %v3948_v17 = vadd.f32 %v6926_v34, %v3880_v0  ;;  %v7102_v33 = vor.u32 %v3134_v39, %v3133_v3 }
 0x39e   : > { %v2872_v26 = vpop.f32.mrf.mxu2 }
 0x39f   : > { %v3010_v11 = vadd.f32 %v2872_v26, %v2767_v24  ;;  %v3343_v23 = vpop.f32.mrf.mxu3  ;;  %v2632_v15 = vpop.f32.mrf.mxu1  ;;  %v4012_v28 = vmax.f32 %v3948_v17, 0.0  ;;  %v3136_v38 = vsel %vm3061_vm6, %v3131_v57, %v7102_v33  ;;  %v3569_v24 = vsel %vm3532_vm7, %v3566_v14, %v3568_v50 }
 0x3a0   : > { %v2768_v47 = vadd.f32 %v2632_v15, %v7839_v56  ;;  %v4094_v15 = vld [vmem:[%s6749_s8 + $0x100] sm:$0xff]  ;;  %v3138_v56 = vrot.slane %v7717_v22, 3 }
 0x3a1   : > { %v3481_v61 = vadd.f32 %v3343_v23, %v3010_v11  ;;  %v4460_v8 = vmul.f32 %v4199_v45, %v4012_v28  ;;  %v4214_v23 = vpop.permute.xlu2 %4213  ;;  %4288 = vperm.xlu2 %5478, %v4094_v15  }
 0x3a2   : > { %5075 = vmatmul.msk.bf16.gmra.mxu1 %vm794_vm2, %v2453_v63 }
 0x3a3   : > { %v3881_v7 = vadd.f32 %v3743_v27, %v3481_v61  ;;  %v3746_v55 = vpop.f32.mrf.mxu0  ;;  %5108 = vmatmul.msk.bf16.gmra.mxu2 %vm794_vm2, %v2455_v36  ;;  %v4099_v61 = vld [vmem:[%s6749_s8 + $0x128] sm:$0xff] }
 0x3a4   : > { %5141 = vmatmul.msk.bf16.gmra.mxu3 %vm794_vm2, %v3132_v13  ;;  %4313 = vperm.xlu1 %5477, %v4099_v61   ;;  %v7844_v61 = vld [vmem:[#allocation33_spill] sm:$0xff] }
 0x3a5   : > { %v3949_v42 = vadd.f32 %v6926_v34, %v3881_v7 }
 0x3a6   : > { %5174 = vmatmul.msk.bf16.gmra.mxu0 %vm794_vm2, %v3567_v1  ;;  %v2875_v31 = vpop.f32.mrf.mxu2 }
 0x3a7   : > { %v3011_v63 = vadd.f32 %v2875_v31, %v2768_v47  ;;  %v3346_v41 = vpop.f32.mrf.mxu3  ;;  %v4013_v5 = vmax.f32 %v3949_v42, 0.0  ;;  %v2634_v48 = vpop.f32.mrf.mxu1  ;;  %v7126_v31 = vld [vmem:[%s5705_s26 + $0xa8] sm:$0xff] }
 0x3a8   : > { %v2769_v9 = vadd.f32 %v2634_v48, %v7840_v52  ;;  %v4102_v48 = vld [vmem:[%s6749_s8 + $0x140] sm:$0xff] }
 0x3a9   : > { %v3482_v44 = vadd.f32 %v3346_v41, %v3011_v63  ;;  %v4461_v37 = vmul.f32 %v4204_v62, %v4013_v5  ;;  %v2458_v62 = vrot.slane %v7126_v31, 2  ;;  %v7842_v63 = vld [vmem:[#allocation27_spill] sm:$0xff] }
 0x3ab   : > { %v5276_v4 = vpack.c.bf16 %v4461_v37, %v4460_v8  ;;  %v3748_v16 = vpop.f32.mrf.mxu0  ;;  %v3882_v53 = vadd.f32 %v3746_v55, %v3482_v44  ;;  %v3137_v55 = vrot.slane %v7716_v59, 2  ;;  %v4107_v59 = vld [vmem:[%s6749_s8 + $0x168] sm:$0xff]  ;;  %v3570_v37 = vrot.slane %v7126_v31, 3 }
 0x3ac   : > { %4328 = vperm.xlu1 %5477, %v4102_v48   ;;  %v2459_v39 = vsel %vm2418_vm5, %v2456_v25, %v2458_v62  ;;  %v4219_v25 = vpop.permute.xlu0 %4218 }
 0x3ad   : > { %5406 = vst [vmem:[%s6950_s13 + $0x38] sm:$0xff] %v5276_v4   ;;  %v3950_v27 = vadd.f32 %v6926_v34, %v3882_v53  ;;  %v7131_v5 = vor.u32 %v3138_v56, %v3137_v55  ;;  %v3571_v6 = vsel %vm3532_vm7, %v3568_v50, %v3570_v37 }
 0x3ae   : > { %v2877_v10 = vpop.f32.mrf.mxu2 }
 0x3af   : > { %v3012_v54 = vadd.f32 %v2877_v10, %v2769_v9  ;;  %v3348_v51 = vpop.f32.mrf.mxu3  ;;  %v2637_v35 = vpop.f32.mrf.mxu1  ;;  %v4014_v20 = vmax.f32 %v3950_v27, 0.0  ;;  %v3140_v53 = vsel %vm3061_vm6, %v7102_v33, %v7131_v5 }
 0x3b0   : > { %v2770_v26 = vadd.f32 %v2637_v35, %v7841_v43  ;;  %v4097_v35 = vld [vmem:[%s6749_s8 + $0x118] sm:$0xff]  ;;  %v3142_v43 = vrot.slane %v7721_v30, 3 }
 0x3b1   : > { %v3483_v2 = vadd.f32 %v3348_v51, %v3012_v54  ;;  %v4462_v1 = vmul.f32 %v4209_v60, %v4014_v20  ;;  %v4224_v51 = vpop.permute.xlu1 %4223  ;;  %4303 = vperm.xlu2 %5478, %v4097_v35  }
 0x3b2   : > { %5076 = vmatmul.msk.bf16.gmra.mxu1 %vm794_vm2, %v2455_v36  ;;  %v4104_v36 = vld [vmem:[%s6749_s8 + $0x150] sm:$0xff] }
 0x3b3   : > { %v3883_v0 = vadd.f32 %v3748_v16, %v3483_v2  ;;  %v3751_v19 = vpop.f32.mrf.mxu0  ;;  %5109 = vmatmul.msk.bf16.gmra.mxu2 %vm794_vm2, %v2457_v21  ;;  %4338 = vperm.xlu0 %5476, %v4104_v36   ;;  %v4110_v2 = vld [vmem:[%s6749_s8 + $0x180] sm:$0xff] }
 0x3b4   : > { %5142 = vmatmul.msk.bf16.gmra.mxu3 %vm794_vm2, %v3136_v38 }
 0x3b5   : > { %v3951_v11 = vadd.f32 %v6926_v34, %v3883_v0 }
 0x3b6   : > { %5175 = vmatmul.msk.bf16.gmra.mxu0 %vm794_vm2, %v3569_v24  ;;  %v2880_v57 = vpop.f32.mrf.mxu2 }
 0x3b7   : > { %v3013_v17 = vadd.f32 %v2880_v57, %v2770_v26  ;;  %v3351_v13 = vpop.f32.mrf.mxu3  ;;  %v4015_v14 = vmax.f32 %v3951_v11, 0.0  ;;  %v2639_v7 = vpop.f32.mrf.mxu1  ;;  %v7160_v57 = vld [vmem:[%s5705_s26 + $0xb0] sm:$0xff] }
 0x3b8   : > { %v2771_v41 = vadd.f32 %v2639_v7, %v7842_v63  ;;  %v3572_v30 = vrot.slane %v7160_v57, 3 }
 0x3b9   : > { %v3484_v45 = vadd.f32 %v3351_v13, %v3013_v17  ;;  %v4463_v28 = vmul.f32 %v4214_v23, %v4015_v14  ;;  %v2460_v23 = vrot.slane %v7160_v57, 2  ;;  %v4108_v13 = vld [vmem:[%s6749_s8 + $0x170] sm:$0xff]  ;;  %v4113_v14 = vld [vmem:[%s6749_s8 + $0x198] sm:$0xff] }
 0x3ba   : > { %v4109_v57 = vld [vmem:[%s6749_s8 + $0x178] sm:$0xff] }
 0x3bb   : > { %v5281_v47 = vpack.c.bf16 %v4463_v28, %v4462_v1  ;;  %v3753_v42 = vpop.f32.mrf.mxu0  ;;  %v3884_v49 = vadd.f32 %v3751_v19, %v3484_v45  ;;  %4353 = vperm.xlu0 %5476, %v4107_v59   ;;  %v3141_v19 = vrot.slane %v7720_v32, 2  ;;  %v4100_v32 = vld [vmem:[%s6749_s8 + $0x130] sm:$0xff]  ;;  %v2461_v28 = vsel %vm2418_vm5, %v2458_v62, %v2460_v23  ;;  %v7845_v59 = vld [vmem:[#allocation28_spill] sm:$0xff] }
 0x3bc   : > { %4318 = vperm.xlu2 %5478, %v4100_v32   ;;  %v3573_v62 = vsel %vm3532_vm7, %v3570_v37, %v3572_v30 }
 0x3bd   : > { %5407 = vst [vmem:[%s6950_s13 + $0x40] sm:$0xff] %v5281_v47   ;;  %v3952_v16 = vadd.f32 %v6926_v34, %v3884_v49  ;;  %v7165_v17 = vor.u32 %v3142_v43, %v3141_v19  ;;  %v4119_v19 = vld [vmem:[%s6749_s8 + $0x1c8] sm:$0xff] }
 0x3be   : > { %v2882_v3 = vpop.f32.mrf.mxu2 }
 0x3bf   : > { %v3014_v8 = vadd.f32 %v2882_v3, %v2771_v41  ;;  %v3353_v44 = vpop.f32.mrf.mxu3  ;;  %v2642_v22 = vpop.f32.mrf.mxu1  ;;  %v4016_v12 = vmax.f32 %v3952_v16, 0.0 }
 0x3c0   : > { %v2772_v10 = vadd.f32 %v2642_v22, %v7843_v40  ;;  %v4229_v41 = vpop.permute.xlu2 %4228  ;;  %v4103_v22 = vld [vmem:[%s6749_s8 + $0x148] sm:$0xff] }
 0x3c1   : > { %v3485_v4 = vadd.f32 %v3353_v44, %v3014_v8  ;;  %v4464_v24 = vmul.f32 %v4219_v25, %v4016_v12  ;;  %v4234_v44 = vpop.permute.xlu0 %4233  ;;  %v7847_v40 = vld [vmem:[#allocation46_spill] sm:$0xff] }
 0x3c2   : > { %5077 = vmatmul.msk.bf16.gmra.mxu1 %vm794_vm2, %v2457_v21  ;;  %v4105_v21 = vld [vmem:[%s6749_s8 + $0x158] sm:$0xff] }
 0x3c3   : > { %v3885_v52 = vadd.f32 %v3753_v42, %v3485_v4  ;;  %v3756_v9 = vpop.f32.mrf.mxu0  ;;  %5110 = vmatmul.msk.bf16.gmra.mxu2 %vm794_vm2, %v2459_v39  ;;  %4343 = vperm.xlu1 %5477, %v4105_v21   ;;  %v3144_v42 = vsel %vm3061_vm6, %v7131_v5, %v7165_v17  ;;  %v4116_v4 = vld [vmem:[%s6749_s8 + $0x1b0] sm:$0xff] }
 0x3c4   : > { %5143 = vmatmul.msk.bf16.gmra.mxu3 %vm794_vm2, %v3140_v53  ;;  %4368 = vperm.xlu0 %5476, %v4110_v2   ;;  %v7848_v2 = vld [vmem:[#allocation39_spill] sm:$0xff] }
 0x3c5   : > { %v3953_v54 = vadd.f32 %v6926_v34, %v3885_v52  ;;  %4333 = vperm.xlu2 %5478, %v4103_v22   ;;  %v7846_v52 = vld [vmem:[#allocation51_spill] sm:$0xff] }
 0x3c6   : > { %5176 = vmatmul.msk.bf16.gmra.mxu0 %vm794_vm2, %v3571_v6  ;;  %v2885_v33 = vpop.f32.mrf.mxu2 }
 0x3c7   : > { %v3015_v27 = vadd.f32 %v2885_v33, %v2772_v10  ;;  %v3356_v38 = vpop.f32.mrf.mxu3  ;;  %v4017_v50 = vmax.f32 %v3953_v54, 0.0  ;;  %v2644_v0 = vpop.f32.mrf.mxu1  ;;  %v3146_v10 = vrot.slane %v7847_v40, 3 }
 0x3c8   : > { %v2773_v36 = vadd.f32 %v2644_v0, %v7844_v61  ;;  %v4114_v0 = vld [vmem:[%s6749_s8 + $0x1a0] sm:$0xff] }
 0x3c9   : > { %v3486_v60 = vadd.f32 %v3356_v38, %v3015_v27  ;;  %v4465_v20 = vmul.f32 %v4224_v51, %v4017_v50  ;;  %v7197_v51 = vld [vmem:[%s5705_s26 + $0xb8] sm:$0xff]  ;;  %v4106_v50 = vld [vmem:[%s6749_s8 + $0x160] sm:$0xff] }
 0x3ca   : > { %v2462_v35 = vrot.slane %v7197_v51, 2  ;;  %v3574_v43 = vrot.slane %v7197_v51, 3 }
 0x3cb   : > { %v5286_v26 = vpack.c.bf16 %v4465_v20, %v4464_v24  ;;  %v3758_v11 = vpop.f32.mrf.mxu0  ;;  %v3886_v15 = vadd.f32 %v3756_v9, %v3486_v60  ;;  %4358 = vperm.xlu1 %5477, %v4108_v13   ;;  %v3145_v9 = vrot.slane %v7846_v52, 2  ;;  %v4112_v52 = vld [vmem:[%s6749_s8 + $0x190] sm:$0xff] }
 0x3cc   : > { %4383 = vperm.xlu0 %5476, %v4113_v14  }
 0x3cd   : > { %5408 = vst [vmem:[%s6950_s13 + $0x48] sm:$0xff] %v5286_v26   ;;  %v3954_v47 = vadd.f32 %v6926_v34, %v3886_v15  ;;  %v7202_v38 = vor.u32 %v3146_v10, %v3145_v9  ;;  %4348 = vperm.xlu2 %5478, %v4106_v50   ;;  %v4120_v9 = vld [vmem:[%s6749_s8 + $0x1d0] sm:$0xff] }
 0x3ce   : > { %v2887_v7 = vpop.f32.mrf.mxu2 }
 0x3cf   : > { %v3016_v55 = vadd.f32 %v2887_v7, %v2773_v36  ;;  %v3358_v1 = vpop.f32.mrf.mxu3  ;;  %v2647_v45 = vpop.f32.mrf.mxu1  ;;  %v4018_v48 = vmax.f32 %v3954_v47, 0.0  ;;  %v3148_v36 = vsel %vm3061_vm6, %v7165_v17, %v7202_v38  ;;  %v7849_v7 = vld [vmem:[#allocation34_spill] sm:$0xff] }
 0x3d0   : > { %v2774_v3 = vadd.f32 %v2647_v45, %v7845_v59 }
 0x3d1   : > { %v3487_v56 = vadd.f32 %v3358_v1, %v3016_v55  ;;  %v4466_v6 = vmul.f32 %v4229_v41, %v4018_v48  ;;  %v7229_v55 = vld [vmem:[%s7510_s3] ss:$0 sm:$0xff] }
 0x3d2   : > { %5078 = vmatmul.msk.bf16.gmra.mxu1 %vm794_vm2, %v2459_v39  ;;  %v4111_v39 = vld [vmem:[%s6749_s8 + $0x188] sm:$0xff] }
 0x3d3   : > { %v3887_v49 = vadd.f32 %v3758_v11, %v3487_v56  ;;  %v3761_v63 = vpop.f32.mrf.mxu0  ;;  %5111 = vmatmul.msk.bf16.gmra.mxu2 %vm794_vm2, %v2461_v28  ;;  %4373 = vperm.xlu1 %5477, %v4111_v39   ;;  %v2463_v11 = vsel %vm2418_vm5, %v2460_v23, %v2462_v35  ;;  %v3575_v23 = vsel %vm3532_vm7, %v3572_v30, %v3574_v43  ;;  %v4117_v56 = vld [vmem:[%s6749_s8 + $0x1b8] sm:$0xff]  ;;  %v4122_v30 = vld [vmem:[%s6749_s8 + $0x1e0] sm:$0xff] }
 0x3d4   : > { %5144 = vmatmul.msk.bf16.gmra.mxu3 %vm794_vm2, %v3144_v42  ;;  %4398 = vperm.xlu0 %5476, %v4116_v4   ;;  %v7239_v39 = vld [vmem:[%s5705_s26 + $0xc0] sm:$0xff] }
 0x3d5   : > { %v3955_v5 = vadd.f32 %v6926_v34, %v3887_v49  ;;  %4363 = vperm.xlu2 %5478, %v4109_v57   ;;  %v2464_v4 = vrot.slane %v7239_v39, 2  ;;  %v3576_v10 = vrot.slane %v7239_v39, 3  ;;  %v7268_v57 = vld [vmem:[%s5705_s26 + $0xc8] sm:$0xff] }
 0x3d6   : > { %5177 = vmatmul.msk.bf16.gmra.mxu0 %vm794_vm2, %v3573_v62  ;;  %v2890_v8 = vpop.f32.mrf.mxu2  ;;  %v7850_v62 = vld [vmem:[#allocation11_spill] sm:$0xff] }
 0x3d7   : > { %v3017_v16 = vadd.f32 %v2890_v8, %v2774_v3  ;;  %v3361_v31 = vpop.f32.mrf.mxu3  ;;  %v4019_v37 = vmax.f32 %v3955_v5, 0.0  ;;  %v2649_v53 = vpop.f32.mrf.mxu1  ;;  %v3149_v41 = vrot.slane %v7850_v62, 2  ;;  %v7851_v5 = vld [vmem:[#allocation10_spill] sm:$0xff] }
 0x3d8   : > { %v2775_v27 = vadd.f32 %v2649_v53, %v7848_v2  ;;  %v3150_v8 = vrot.slane %v7851_v5, 3 }
 0x3d9   : > { %v3488_v25 = vadd.f32 %v3361_v31, %v3017_v16  ;;  %v4467_v12 = vmul.f32 %v4234_v44, %v4019_v37  ;;  %v7852_v31 = vld [vmem:[#allocation45_spill] sm:$0xff] }
 0x3da   : > { %v3151_v53 = vor.u32 %v3150_v8, %v3149_v41 }
 0x3db   : > { %v5291_v54 = vpack.c.bf16 %v4467_v12, %v4466_v6  ;;  %v3763_v33 = vpop.f32.mrf.mxu0  ;;  %v3888_v21 = vadd.f32 %v3761_v63, %v3488_v25  ;;  %4388 = vperm.xlu1 %5477, %v4114_v0   ;;  %v4125_v6 = vld [vmem:[%s6749_s8 + $0x1f8] sm:$0xff] }
 0x3dc   : > { %4413 = vperm.xlu0 %5476, %v4119_v19   ;;  %v3577_v19 = vsel %vm3532_vm7, %v3574_v43, %v3576_v10 }
 0x3dd   : > { %5409 = vst [vmem:[%s6950_s13 + $0x50] sm:$0xff] %v5291_v54   ;;  %v3956_v61 = vadd.f32 %v6926_v34, %v3888_v21  ;;  %v4239_v34 = vpop.permute.xlu1 %4238  ;;  %4378 = vperm.xlu2 %5478, %v4112_v52  }
 0x3de   : > { %v2892_v24 = vpop.f32.mrf.mxu2 }
 0x3df   : > { %v3018_v60 = vadd.f32 %v2892_v24, %v2775_v27  ;;  %v3363_v20 = vpop.f32.mrf.mxu3  ;;  %v2652_v26 = vpop.f32.mrf.mxu1  ;;  %v4020_v14 = vmax.f32 %v3956_v61, 0.0  ;;  %v3152_v27 = vsel %vm3061_vm6, %v7202_v38, %v3151_v53  ;;  %v4123_v61 = vld [vmem:[%s6749_s8 + $0x1e8] sm:$0xff] }
 0x3e0   : > { %v2776_v17 = vadd.f32 %v2652_v26, %v7849_v7 }
 0x3e1   : > { %v3489_v15 = vadd.f32 %v3363_v20, %v3018_v60  ;;  %v4468_v48 = vmul.f32 %v4239_v34, %v4020_v14  ;;  %v7853_v60 = vld [vmem:[#allocation40_spill] sm:$0xff] }
 0x3e2   : > { %5079 = vmatmul.msk.bf16.gmra.mxu1 %vm794_vm2, %v2461_v28  ;;  %v4244_v28 = vpop.permute.xlu2 %4243 }
 0x3e3   : > { %v3889_v32 = vadd.f32 %v3763_v33, %v3489_v15  ;;  %v3766_v13 = vpop.f32.mrf.mxu0  ;;  %5112 = vmatmul.msk.bf16.gmra.mxu2 %vm794_vm2, %v2463_v11  ;;  %4403 = vperm.xlu1 %5477, %v4117_v56   ;;  %v2465_v33 = vsel %vm2418_vm5, %v2462_v35, %v2464_v4  ;;  %v4249_v35 = vpop.permute.xlu0 %4248  ;;  %v2466_v56 = vrot.slane %v7268_v57, 2 }
 0x3e4   : > { %5145 = vmatmul.msk.bf16.gmra.mxu3 %vm794_vm2, %v3148_v36  ;;  %4428 = vperm.xlu0 %5476, %v4122_v30  }
 0x3e5   : > { %v3957_v1 = vadd.f32 %v7229_v55, %v3889_v32  ;;  %v4254_v15 = vpop.permute.xlu1 %4253  ;;  %v2467_v5 = vsel %vm2418_vm5, %v2464_v4, %v2466_v56 }
 0x3e6   : > { %5178 = vmatmul.msk.bf16.gmra.mxu0 %vm794_vm2, %v3575_v23  ;;  %v2895_v45 = vpop.f32.mrf.mxu2 }
 0x3e7   : > { %v3019_v47 = vadd.f32 %v2895_v45, %v2776_v17  ;;  %v3366_v42 = vpop.f32.mrf.mxu3  ;;  %v4021_v49 = vmax.f32 %v3957_v1, 0.0  ;;  %v2654_v63 = vpop.f32.mrf.mxu1  ;;  %v7855_v17 = vld [vmem:[#allocation12_spill] sm:$0xff] }
 0x3e8   : > { %v2777_v37 = vadd.f32 %v2654_v63, %v7852_v31  ;;  %v3154_v1 = vrot.slane %v7855_v17, 3  ;;  %v4118_v63 = vld [vmem:[%s6749_s8 + $0x1c0] sm:$0xff] }
 0x3e9   : > { %v3490_v59 = vadd.f32 %v3366_v42, %v3019_v47  ;;  %v4469_v3 = vmul.f32 %v4244_v28, %v4021_v49  ;;  %v7856_v47 = vld [vmem:[#allocation73_spill] sm:$0xff] }
 0x3eb   : > { %v5296_v44 = vpack.c.bf16 %v4469_v3, %v4468_v48  ;;  %v3768_v22 = vpop.f32.mrf.mxu0  ;;  %v3890_v16 = vadd.f32 %v3766_v13, %v3490_v59  ;;  %4418 = vperm.xlu1 %5477, %v4120_v9   ;;  %v7854_v13 = vld [vmem:[#allocation17_spill] sm:$0xff]  ;;  %v3578_v59 = vrot.slane %v7268_v57, 3  ;;  %v7857_v9 = vld [vmem:[#allocation76_spill] sm:$0xff] }
 0x3ec   : > { %4443 = vperm.xlu0 %5476, %v4125_v6   ;;  %v3153_v23 = vrot.slane %v7854_v13, 2 }
 0x3ed   : > { %5410 = vst [vmem:[%s6950_s13 + $0x58] sm:$0xff] %v5296_v44   ;;  %v3958_v2 = vadd.f32 %v7229_v55, %v3890_v16  ;;  %v3579_v31 = vsel %vm3532_vm7, %v3576_v10, %v3578_v59  ;;  %v4269_v57 = vpop.permute.xlu1 %4268 }
 0x3ee   : > { %v2897_v25 = vpop.f32.mrf.mxu2  ;;  %v3155_v49 = vor.u32 %v3154_v1, %v3153_v23 }
 0x3ef   : > { %v3020_v12 = vadd.f32 %v2897_v25, %v2777_v37  ;;  %v3368_v40 = vpop.f32.mrf.mxu3  ;;  %v2657_v54 = vpop.f32.mrf.mxu1  ;;  %v4022_v24 = vmax.f32 %v3958_v2, 0.0 }
 0x3f0   : > { %v2778_v20 = vadd.f32 %v2657_v54, %v7853_v60  ;;  %v4259_v37 = vpop.permute.xlu2 %4258  ;;  %v4264_v25 = vpop.permute.xlu0 %4263 }
 0x3f1   : > { %v3491_v21 = vadd.f32 %v3368_v40, %v3020_v12  ;;  %v4470_v34 = vmul.f32 %v4249_v35, %v4022_v24  ;;  %v4121_v12 = vld [vmem:[%s6749_s8 + $0x1d8] sm:$0xff] }
 0x3f2   : > { %5080 = vmatmul.msk.bf16.gmra.mxu1 %vm794_vm2, %v2463_v11  ;;  %v4115_v11 = vld [vmem:[%s6749_s8 + $0x1a8] sm:$0xff] }
 0x3f3   : > { %v3891_v50 = vadd.f32 %v3768_v22, %v3491_v21  ;;  %v3771_v0 = vpop.f32.mrf.mxu0  ;;  %5113 = vmatmul.msk.bf16.gmra.mxu2 %vm794_vm2, %v2465_v33  ;;  %4393 = vperm.xlu2 %5478, %v4115_v11   ;;  %v3156_v22 = vsel %vm3061_vm6, %v3151_v53, %v3155_v49  ;;  %v7858_v21 = vld [vmem:[#allocation23_spill] sm:$0xff] }
 0x3f4   : > { %5146 = vmatmul.msk.bf16.gmra.mxu3 %vm794_vm2, %v3152_v27  ;;  %4433 = vperm.xlu1 %5477, %v4123_v61   ;;  %v3157_v2 = vrot.slane %v7858_v21, 2 }
 0x3f5   : > { %v3959_v26 = vadd.f32 %v7229_v55, %v3891_v50 }
 0x3f6   : > { %5179 = vmatmul.msk.bf16.gmra.mxu0 %vm794_vm2, %v3577_v19  ;;  %v2900_v38 = vpop.f32.mrf.mxu2  ;;  %v7859_v19 = vld [vmem:[#allocation18_spill] sm:$0xff] }
 0x3f7   : > { %v3021_v36 = vadd.f32 %v2900_v38, %v2778_v20  ;;  %v3371_v51 = vpop.f32.mrf.mxu3  ;;  %v4023_v32 = vmax.f32 %v3959_v26, 0.0  ;;  %v2659_v43 = vpop.f32.mrf.mxu1  ;;  %v3158_v35 = vrot.slane %v7859_v19, 3  ;;  %v5523_v20 = vld [vmem:[%s5705_s26 + $0xd0] sm:$0xff] }
 0x3f8   : > { %v2779_v42 = vadd.f32 %v2659_v43, %v7856_v47  ;;  %v2468_v26 = vrot.slane %v5523_v20, 2  ;;  %v3580_v13 = vrot.slane %v5523_v20, 3  ;;  %v7861_v47 = vld [vmem:[#allocation82_spill] sm:$0xff]  ;;  %v7865_v20 = vld [vmem:[#allocation88_spill] sm:$0xff] }
 0x3f9   : > { %v3492_v14 = vadd.f32 %v3371_v51, %v3021_v36  ;;  %v4471_v7 = vmul.f32 %v4254_v15, %v4023_v32  ;;  %v7860_v15 = vld [vmem:[#allocation79_spill] sm:$0xff]  ;;  %v3159_v61 = vor.u32 %v3158_v35, %v3157_v2 }
 0x3fa   : > { %v4124_v36 = vld [vmem:[%s6749_s8 + $0x1f0] sm:$0xff]  ;;  %s5546_s8 = sshra.s32 %s4654_s6, 4  ;;  %s5547_s8 = int_to_ptr.hbm [resolvable:$true] %s5546_s8 }
 0x3fb   : > { %v5301_v45 = vpack.c.bf16 %v4471_v7, %v4470_v34  ;;  %v3773_v28 = vpop.f32.mrf.mxu0  ;;  %v3892_v30 = vadd.f32 %v3771_v0, %v3492_v14  ;;  %4408 = vperm.xlu2 %5478, %v4118_v63   ;;  %v2469_v34 = vsel %vm2418_vm5, %v2466_v56, %v2468_v26  ;;  %v3160_v17 = vsel %vm3061_vm6, %v3155_v49, %v3159_v61  ;;  %v4274_v63 = vpop.permute.xlu2 %4273  ;;  %s5548_s7 = scalar_lea.hbm %s5547_s8, 256  ;;  %p5553_p2 = scmp.lt.s32.totalorder %s5547_s8, %s7512_s5 }
 0x3fc   : > { %p5549_p13 = scmp.ne.s32.totalorder %s5547_s8, %s5548_s7  ;;  %p5554_p3 = scmp.lt.s32.totalorder %s5552_s14, %s5548_s7 }
 0x3fd   : > { %5411 = vst [vmem:[%s6950_s13 + $0x60] sm:$0xff] %v5301_v45   ;;  %v3960_v44 = vadd.f32 %v7229_v55, %v3892_v30 }
 0x3fe   : > { %v2902_v62 = vpop.f32.mrf.mxu2  ;;  %p5550_p0 = pnand %p5549_p13, %p5667_p5  ;;  %p5555_p4 = por %p5554_p3, %p5553_p2 }
 0x3ff   : > { %v3022_v41 = vadd.f32 %v2902_v62, %v2779_v42  ;;  %v3373_v48 = vpop.f32.mrf.mxu3  ;;  %v2662_v3 = vpop.f32.mrf.mxu1  ;;  %v4024_v52 = vmax.f32 %v3960_v44, 0.0 }
 0x400   : > { %v2780_v4 = vadd.f32 %v2662_v3, %v7857_v9  ;;  %p5551_p1 = pneg %p5550_p0 }
 0x401   : > { %v3493_v8 = vadd.f32 %v3373_v48, %v3022_v41  ;;  %v4472_v27 = vmul.f32 %v4259_v37, %v4024_v52  ;;  %v5524_v52 = vld [vmem:[%s5705_s26 + $0xd8] sm:$0xff] }
 0x402   : > { %5081 = vmatmul.msk.bf16.gmra.mxu1 %vm794_vm2, %v2465_v33  ;;  %v2470_v9 = vrot.slane %v5524_v52, 2  ;;  %p5556_p7 = pnand %p5555_p4, %p5551_p1 }
 0x403   : > { %v3893_v39 = vadd.f32 %v3773_v28, %v3493_v8  ;;  %v3776_v16 = vpop.f32.mrf.mxu0  ;;  %5114 = vmatmul.msk.bf16.gmra.mxu2 %vm794_vm2, %v2467_v5  ;;  %4423 = vperm.xlu2 %5478, %v4121_v12   ;;  %v3581_v28 = vsel %vm3532_vm7, %v3578_v59, %v3580_v13 }
 0x404   : > { %5147 = vmatmul.msk.bf16.gmra.mxu3 %vm794_vm2, %v3156_v22  ;;  %v2471_v21 = vsel %vm2418_vm5, %v2468_v26, %v2470_v9 }
 0x405   : > { %v3961_v6 = vadd.f32 %v7229_v55, %v3893_v39  ;;  %v7863_v39 = vld [vmem:[#allocation24_spill] sm:$0xff] }
 0x406   : > { %5180 = vmatmul.msk.bf16.gmra.mxu0 %vm794_vm2, %v3579_v31  ;;  %v2905_v53 = vpop.f32.mrf.mxu2 }
 0x407   : > { %v3023_v40 = vadd.f32 %v2905_v53, %v2780_v4  ;;  %v3376_v54 = vpop.f32.mrf.mxu3  ;;  %v4025_v33 = vmax.f32 %v3961_v6, 0.0  ;;  %v2664_v10 = vpop.f32.mrf.mxu1  ;;  %v7864_v6 = vld [vmem:[#allocation85_spill] sm:$0xff] }
 0x408   : > { %v2781_v11 = vadd.f32 %v2664_v10, %v7860_v15 }
 0x409   : > { %v3494_v50 = vadd.f32 %v3376_v54, %v3023_v40  ;;  %v4473_v0 = vmul.f32 %v4264_v25, %v4025_v33  ;;  %v3582_v33 = vrot.slane %v5524_v52, 3 }
 0x40b   : > { %v5306_v24 = vpack.c.bf16 %v4473_v0, %v4472_v27  ;;  %v3778_v60 = vpop.f32.mrf.mxu0  ;;  %v3894_v38 = vadd.f32 %v3776_v16, %v3494_v50  ;;  %4438 = vperm.xlu2 %5478, %v4124_v36   ;;  %v3162_v16 = vrot.slane %v7863_v39, 3  ;;  %v3583_v35 = vsel %vm3532_vm7, %v3580_v13, %v3582_v33 }
 0x40d   : > { %5412 = vst [vmem:[%s6950_s13 + $0x68] sm:$0xff] %v5306_v24   ;;  %v3962_v7 = vadd.f32 %v7229_v55, %v3894_v38  ;;  %v4279_v24 = vpop.permute.xlu0 %4278 }
 0x40e   : > { %v2907_v51 = vpop.f32.mrf.mxu2 }
 0x40f   : > { %v3024_v32 = vadd.f32 %v2907_v51, %v2781_v11  ;;  %v3378_v43 = vpop.f32.mrf.mxu3  ;;  %v2667_v23 = vpop.f32.mrf.mxu1  ;;  %v4026_v30 = vmax.f32 %v3962_v7, 0.0  ;;  %v7867_v7 = vld [vmem:[#allocation30_spill] sm:$0xff] }
 0x410   : > { %v2782_v42 = vadd.f32 %v2667_v23, %v7861_v47  ;;  %v4284_v11 = vpop.permute.xlu1 %4283  ;;  %v7868_v47 = vld [vmem:[#allocation91_spill] sm:$0xff] }
 0x411   : > { %v3495_v14 = vadd.f32 %v3378_v43, %v3024_v32  ;;  %v4474_v8 = vmul.f32 %v4269_v57, %v4026_v30  ;;  %v7866_v43 = vld [vmem:[#allocation35_spill] sm:$0xff] }
 0x412   : > { %5082 = vmatmul.msk.bf16.gmra.mxu1 %vm794_vm2, %v2467_v5  ;;  %v7862_v5 = vld [vmem:[#allocation29_spill] sm:$0xff]  ;;  %v3165_v13 = vrot.slane %v7866_v43, 2 }
 0x413   : > { %v3895_v1 = vadd.f32 %v3778_v60, %v3495_v14  ;;  %v3781_v45 = vpop.f32.mrf.mxu0  ;;  %5115 = vmatmul.msk.bf16.gmra.mxu2 %vm794_vm2, %v2469_v34  ;;  %v3161_v59 = vrot.slane %v7862_v5, 2 }
 0x414   : > { %5148 = vmatmul.msk.bf16.gmra.mxu3 %vm794_vm2, %v3160_v17  ;;  %v3166_v17 = vrot.slane %v7867_v7, 3 }
 0x415   : > { %v3963_v56 = vadd.f32 %v7229_v55, %v3895_v1  ;;  %v3163_v25 = vor.u32 %v3162_v16, %v3161_v59 }
 0x416   : > { %5181 = vmatmul.msk.bf16.gmra.mxu0 %vm794_vm2, %v3581_v28  ;;  %v2910_v49 = vpop.f32.mrf.mxu2  ;;  %v5525_v28 = vld [vmem:[%s5705_s26 + $0xe0] sm:$0xff] }
 0x417   : > { %v3025_v62 = vadd.f32 %v2910_v49, %v2782_v42  ;;  %v3381_v41 = vpop.f32.mrf.mxu3  ;;  %v4027_v48 = vmax.f32 %v3963_v56, 0.0  ;;  %v2669_v3 = vpop.f32.mrf.mxu1  ;;  %v3164_v50 = vsel %vm3061_vm6, %v3159_v61, %v3163_v25  ;;  %v2472_v57 = vrot.slane %v5525_v28, 2 }
 0x418   : > { %v2783_v53 = vadd.f32 %v2669_v3, %v7864_v6  ;;  %v3167_v56 = vor.u32 %v3166_v17, %v3165_v13 }
 0x419   : > { %v3496_v44 = vadd.f32 %v3381_v41, %v3025_v62  ;;  %v4475_v22 = vmul.f32 %v4274_v63, %v4027_v48  ;;  %v3584_v41 = vrot.slane %v5525_v28, 3  ;;  %v2473_v3 = vsel %vm2418_vm5, %v2470_v9, %v2472_v57  ;;  %v4289_v9 = vpop.permute.xlu2 %4288 }
 0x41b   : > { %v5311_v31 = vpack.c.bf16 %v4475_v22, %v4474_v8  ;;  %v3783_v37 = vpop.f32.mrf.mxu0  ;;  %v3896_v4 = vadd.f32 %v3781_v45, %v3496_v44  ;;  %v3168_v8 = vsel %vm3061_vm6, %v3163_v25, %v3167_v56  ;;  %v3585_v39 = vsel %vm3532_vm7, %v3582_v33, %v3584_v41 }
 0x41d   : > { %5413 = vst [vmem:[%s6950_s13 + $0x70] sm:$0xff] %v5311_v31   ;;  %v3964_v27 = vadd.f32 %v7229_v55, %v3896_v4 }
 0x41e   : > { %v2912_v12 = vpop.f32.mrf.mxu2 }
 0x41f   : > { %v3026_v40 = vadd.f32 %v2912_v12, %v2783_v53  ;;  %v3383_v54 = vpop.f32.mrf.mxu3  ;;  %v2672_v10 = vpop.f32.mrf.mxu1  ;;  %v4028_v60 = vmax.f32 %v3964_v27, 0.0  ;;  %v7871_v27 = vld [vmem:[#allocation36_spill] sm:$0xff] }
 0x420   : > { %v2784_v38 = vadd.f32 %v2672_v10, %v7865_v20  ;;  %v4294_v12 = vpop.permute.xlu0 %4293  ;;  %v7872_v20 = vld [vmem:[#allocation57_spill] sm:$0xff] }
 0x421   : > { %v3497_v2 = vadd.f32 %v3383_v54, %v3026_v40  ;;  %v4476_v23 = vmul.f32 %v4279_v24, %v4028_v60  ;;  %v7870_v54 = vld [vmem:[#allocation41_spill] sm:$0xff] }
 0x422   : > { %5083 = vmatmul.msk.bf16.gmra.mxu1 %vm794_vm2, %v2469_v34  ;;  %v3169_v33 = vrot.slane %v7870_v54, 2 }
 0x423   : > { %v3897_v0 = vadd.f32 %v3783_v37, %v3497_v2  ;;  %v3786_v19 = vpop.f32.mrf.mxu0  ;;  %5116 = vmatmul.msk.bf16.gmra.mxu2 %vm794_vm2, %v2471_v21  ;;  %v7869_v37 = vld [vmem:[#allocation55_spill] sm:$0xff] }
 0x424   : > { %5149 = vmatmul.msk.bf16.gmra.mxu3 %vm794_vm2, %v3164_v50  ;;  %v3170_v50 = vrot.slane %v7871_v27, 3 }
 0x425   : > { %v3965_v26 = vadd.f32 %v7229_v55, %v3897_v0 }
 0x426   : > { %5182 = vmatmul.msk.bf16.gmra.mxu0 %vm794_vm2, %v3583_v35  ;;  %v2915_v15 = vpop.f32.mrf.mxu2  ;;  %v5526_v35 = vld [vmem:[%s5705_s26 + $0xe8] sm:$0xff] }
 0x427   : > { %v3027_v61 = vadd.f32 %v2915_v15, %v2784_v38  ;;  %v3386_v36 = vpop.f32.mrf.mxu3  ;;  %v4029_v51 = vmax.f32 %v3965_v26, 0.0  ;;  %v2674_v32 = vpop.f32.mrf.mxu1  ;;  %v2474_v24 = vrot.slane %v5526_v35, 2  ;;  %v3171_v26 = vor.u32 %v3170_v50, %v3169_v33 }
 0x428   : > { %v2785_v42 = vadd.f32 %v2674_v32, %v7868_v47 }
 0x429   : > { %v3498_v34 = vadd.f32 %v3386_v36, %v3027_v61  ;;  %v4477_v14 = vmul.f32 %v4284_v11, %v4029_v51  ;;  %v3586_v36 = vrot.slane %v5526_v35, 3  ;;  %v2475_v32 = vsel %vm2418_vm5, %v2472_v57, %v2474_v24  ;;  %v4299_v57 = vpop.permute.xlu1 %4298 }
 0x42b   : > { %v5316_v1 = vpack.c.bf16 %v4477_v14, %v4476_v23  ;;  %v3788_v45 = vpop.f32.mrf.mxu0  ;;  %v3898_v30 = vadd.f32 %v3786_v19, %v3498_v34  ;;  %v3172_v23 = vsel %vm3061_vm6, %v3167_v56, %v3171_v26  ;;  %v3587_v7 = vsel %vm3532_vm7, %v3584_v41, %v3586_v36 }
 0x42d   : > { %5414 = vst [vmem:[%s6950_s13 + $0x78] sm:$0xff] %v5316_v1   ;;  %v3966_v59 = vadd.f32 %v7229_v55, %v3898_v30 }
 0x42e   : > { %v2917_v49 = vpop.f32.mrf.mxu2 }
 0x42f   : > { %v3028_v63 = vadd.f32 %v2917_v49, %v2785_v42  ;;  %v3388_v62 = vpop.f32.mrf.mxu3  ;;  %v2677_v48 = vpop.f32.mrf.mxu1  ;;  %v4030_v16 = vmax.f32 %v3966_v59, 0.0  ;;  %v7875_v59 = vld [vmem:[#allocation42_spill] sm:$0xff] }
 0x430   : > { %v2786_v52 = vadd.f32 %v2677_v48, %v7869_v37  ;;  %v4304_v49 = vpop.permute.xlu2 %4303  ;;  %v7876_v37 = vld [vmem:[#allocation61_spill] sm:$0xff] }
 0x431   : > { %v3499_v5 = vadd.f32 %v3388_v62, %v3028_v63  ;;  %v4478_v10 = vmul.f32 %v4289_v9, %v4030_v16  ;;  %v7874_v62 = vld [vmem:[#allocation47_spill] sm:$0xff] }
 0x432   : > { %5084 = vmatmul.msk.bf16.gmra.mxu1 %vm794_vm2, %v2471_v21  ;;  %v3173_v41 = vrot.slane %v7874_v62, 2 }
 0x433   : > { %v3899_v44 = vadd.f32 %v3788_v45, %v3499_v5  ;;  %v3791_v22 = vpop.f32.mrf.mxu0  ;;  %5117 = vmatmul.msk.bf16.gmra.mxu2 %vm794_vm2, %v2473_v3  ;;  %v7873_v45 = vld [vmem:[#allocation59_spill] sm:$0xff] }
 0x434   : > { %5150 = vmatmul.msk.bf16.gmra.mxu3 %vm794_vm2, %v3168_v8  ;;  %v3174_v8 = vrot.slane %v7875_v59, 3 }
 0x435   : > { %v3967_v31 = vadd.f32 %v7229_v55, %v3899_v44 }
 0x436   : > { %5183 = vmatmul.msk.bf16.gmra.mxu0 %vm794_vm2, %v3585_v39  ;;  %v2920_v4 = vpop.f32.mrf.mxu2  ;;  %v5527_v39 = vld [vmem:[%s5705_s26 + $0xf0] sm:$0xff]  ;;  %v3175_v9 = vor.u32 %v3174_v8, %v3173_v41 }
 0x437   : > { %v4031_v6 = vmax.f32 %v3967_v31, 0.0  ;;  %v3029_v53 = vadd.f32 %v2920_v4, %v2786_v52  ;;  %v3391_v25 = vpop.f32.mrf.mxu3  ;;  %v2679_v40 = vpop.f32.mrf.mxu1  ;;  %v2476_v16 = vrot.slane %v5527_v39, 2 }
 0x438   : > { %v2787_v38 = vadd.f32 %v2679_v40, %v7872_v20 }
 0x439   : > { %v4479_v21 = vmul.f32 %v4294_v12, %v4031_v6  ;;  %v3500_v2 = vadd.f32 %v3391_v25, %v3029_v53  ;;  %v3588_v25 = vrot.slane %v5527_v39, 3  ;;  %v2477_v40 = vsel %vm2418_vm5, %v2474_v24, %v2476_v16 }
 0x43b   : > { %v5321_v0 = vpack.c.bf16 %v4479_v21, %v4478_v10  ;;  %v3793_v19 = vpop.f32.mrf.mxu0  ;;  %v3900_v60 = vadd.f32 %v3791_v22, %v3500_v2  ;;  %v3176_v10 = vsel %vm3061_vm6, %v3171_v26, %v3175_v9  ;;  %v3589_v27 = vsel %vm3532_vm7, %v3586_v36, %v3588_v25 }
 0x43d   : > { %5415 = vst [vmem:[%s6950_s13 + $0x80] sm:$0xff] %v5321_v0   ;;  %v3968_v13 = vadd.f32 %v7229_v55, %v3900_v60  ;;  %v4309_v60 = vpop.permute.xlu0 %4308 }
 0x43e   : > { %v2922_v15 = vpop.f32.mrf.mxu2 }
 0x43f   : > { %v3030_v11 = vadd.f32 %v2922_v15, %v2787_v38  ;;  %v3393_v61 = vpop.f32.mrf.mxu3  ;;  %v2682_v51 = vpop.f32.mrf.mxu1  ;;  %v4032_v1 = vmax.f32 %v3968_v13, 0.0  ;;  %v7879_v13 = vld [vmem:[#allocation48_spill] sm:$0xff] }
 0x440   : > { %v2788_v28 = vadd.f32 %v2682_v51, %v7873_v45  ;;  %v4314_v15 = vpop.permute.xlu1 %4313  ;;  %v7880_v45 = vld [vmem:[#allocation65_spill] sm:$0xff] }
 0x441   : > { %v3501_v43 = vadd.f32 %v3393_v61, %v3030_v11  ;;  %v7878_v61 = vld [vmem:[#allocation52_spill] sm:$0xff] }
 0x442   : > { %5085 = vmatmul.msk.bf16.gmra.mxu1 %vm794_vm2, %v2473_v3  ;;  %v4480_v3 = vmul.f32 %v4299_v57, %v4032_v1  ;;  %v3177_v36 = vrot.slane %v7878_v61, 2 }
 0x443   : > { %v3901_v34 = vadd.f32 %v3793_v19, %v3501_v43  ;;  %v3796_v14 = vpop.f32.mrf.mxu0  ;;  %5118 = vmatmul.msk.bf16.gmra.mxu2 %vm794_vm2, %v2475_v32  ;;  %v7877_v19 = vld [vmem:[#allocation63_spill] sm:$0xff] }
 0x444   : > { %5151 = vmatmul.msk.bf16.gmra.mxu3 %vm794_vm2, %v3172_v23  ;;  %v3178_v23 = vrot.slane %v7879_v13, 3 }
 0x445   : > { %v3969_v17 = vadd.f32 %v7229_v55, %v3901_v34 }
 0x446   : > { %5184 = vmatmul.msk.bf16.gmra.mxu0 %vm794_vm2, %v3587_v7  ;;  %v2925_v30 = vpop.f32.mrf.mxu2  ;;  %v5528_v7 = vld [vmem:[%s5705_s26 + $0xf8] sm:$0xff]  ;;  %v3179_v57 = vor.u32 %v3178_v23, %v3177_v36 }
 0x447   : > { %v4033_v47 = vmax.f32 %v3969_v17, 0.0  ;;  %v3031_v42 = vadd.f32 %v2925_v30, %v2788_v28  ;;  %v3396_v56 = vpop.f32.mrf.mxu3  ;;  %v2684_v63 = vpop.f32.mrf.mxu1  ;;  %v2478_v17 = vrot.slane %v5528_v7, 2 }
 0x448   : > { %v2789_v52 = vadd.f32 %v2684_v63, %v7876_v37 }
 0x449   : > { %v4481_v48 = vmul.f32 %v4304_v49, %v4033_v47  ;;  %v3502_v5 = vadd.f32 %v3396_v56, %v3031_v42  ;;  %v3590_v56 = vrot.slane %v5528_v7, 3  ;;  %v2479_v63 = vsel %vm2418_vm5, %v2476_v16, %v2478_v17  ;;  %v7886_v7 = vld [vmem:[#allocation74_spill] sm:$0xff] }
 0x44b   : > { %v5326_v44 = vpack.c.bf16 %v4481_v48, %v4480_v3  ;;  %v3798_v22 = vpop.f32.mrf.mxu0  ;;  %v3902_v31 = vadd.f32 %v3796_v14, %v3502_v5  ;;  %v3180_v48 = vsel %vm3061_vm6, %v3175_v9, %v3179_v57  ;;  %v3591_v59 = vsel %vm3532_vm7, %v3588_v25, %v3590_v56 }
 0x44d   : > { %5416 = vst [vmem:[%s6950_s13 + $0x88] sm:$0xff] %v5326_v44   ;;  %v3970_v54 = vadd.f32 %v7229_v55, %v3902_v31  ;;  %v4324_v31 = vpop.permute.xlu0 %4323 }
 0x44e   : > { %v2927_v4 = vpop.f32.mrf.mxu2 }
 0x44f   : > { %v3032_v6 = vadd.f32 %v2927_v4, %v2789_v52  ;;  %v3398_v53 = vpop.f32.mrf.mxu3  ;;  %v2687_v12 = vpop.f32.mrf.mxu1  ;;  %v4034_v50 = vmax.f32 %v3970_v54, 0.0 }
 0x450   : > { %v2790_v35 = vadd.f32 %v2687_v12, %v7877_v19  ;;  %v4319_v4 = vpop.permute.xlu2 %4318 }
 0x451   : > { %v3503_v33 = vadd.f32 %v3398_v53, %v3032_v6  ;;  %v4482_v51 = vmul.f32 %v4309_v60, %v4034_v50  ;;  %v7882_v53 = vld [vmem:[#allocation71_spill] sm:$0xff]  ;;  %v5529_v50 = vld [vmem:[%s6034_s10] sm:$0xff] }
 0x452   : > { %5086 = vmatmul.msk.bf16.gmra.mxu1 %vm794_vm2, %v2475_v32  ;;  %v7883_v25 = vshrl.u32 %v7882_v53, 16 }
 0x453   : > { %v3903_v21 = vadd.f32 %v3798_v22, %v3503_v33  ;;  %v3801_v2 = vpop.f32.mrf.mxu0  ;;  %5119 = vmatmul.msk.bf16.gmra.mxu2 %vm794_vm2, %v2477_v40  ;;  %v7881_v22 = vld [vmem:[#allocation67_spill] sm:$0xff] }
 0x454   : > { %5152 = vmatmul.msk.bf16.gmra.mxu3 %vm794_vm2, %v3176_v10  ;;  %v3181_v12 = vrot.slane %v7883_v25, 2  ;;  %v7884_v10 = vld [vmem:[#allocation53_spill] sm:$0xff] }
 0x455   : > { %v3971_v0 = vadd.f32 %v7229_v55, %v3903_v21  ;;  %v3182_v21 = vrot.slane %v7884_v10, 3 }
 0x456   : > { %5185 = vmatmul.msk.bf16.gmra.mxu0 %vm794_vm2, %v3589_v27  ;;  %v2930_v24 = vpop.f32.mrf.mxu2 }
 0x457   : > { %v4035_v20 = vmax.f32 %v3971_v0, 0.0  ;;  %v3033_v38 = vadd.f32 %v2930_v24, %v2790_v35  ;;  %v3401_v26 = vpop.f32.mrf.mxu3  ;;  %v2689_v11 = vpop.f32.mrf.mxu1  ;;  %v2480_v0 = vrot.slane %v5529_v50, 2  ;;  %v7885_v35 = vld [vmem:[#allocation69_spill] sm:$0xff]  ;;  %v3183_v60 = vor.u32 %v3182_v21, %v3181_v12  ;;  %v5236_v12 = vld [vmem:[%s6034_s10 + $0x10] sm:$0xff] }
 0x458   : > { %v2791_v28 = vadd.f32 %v2689_v11, %v7880_v45  ;;  %v4334_v45 = vpop.permute.xlu2 %4333 }
 0x459   : > { %v4483_v32 = vmul.f32 %v4314_v15, %v4035_v20  ;;  %v3504_v43 = vadd.f32 %v3401_v26, %v3033_v38  ;;  %v3592_v15 = vrot.slane %v5529_v50, 3  ;;  %v2481_v61 = vsel %vm2418_vm5, %v2478_v17, %v2480_v0 }
 0x45b   : > { %v5331_v34 = vpack.c.bf16 %v4483_v32, %v4482_v51  ;;  %v3803_v14 = vpop.f32.mrf.mxu0  ;;  %v3904_v1 = vadd.f32 %v3801_v2, %v3504_v43  ;;  %v3184_v32 = vsel %vm3061_vm6, %v3179_v57, %v3183_v60  ;;  %v3593_v23 = vsel %vm3532_vm7, %v3590_v56, %v3592_v15 }
 0x45d   : > { %5417 = vst [vmem:[%s6950_s13 + $0x90] sm:$0xff] %v5331_v34   ;;  %v3972_v62 = vadd.f32 %v7229_v55, %v3904_v1 }
 0x45e   : > { %v2932_v30 = vpop.f32.mrf.mxu2 }
 0x45f   : > { %v3034_v47 = vadd.f32 %v2932_v30, %v2791_v28  ;;  %v3403_v42 = vpop.f32.mrf.mxu3  ;;  %v2692_v49 = vpop.f32.mrf.mxu1  ;;  %v4036_v8 = vmax.f32 %v3972_v62, 0.0 }
 0x460   : > { %v2792_v39 = vadd.f32 %v2692_v49, %v7881_v22  ;;  %v7887_v49 = vld [vmem:[#allocation77_spill] sm:$0xff] }
 0x461   : > { %v3505_v41 = vadd.f32 %v3403_v42, %v3034_v47  ;;  %v4329_v47 = vpop.permute.xlu1 %4328  ;;  %v7888_v56 = vshrl.u32 %v7887_v49, 16 }
 0x462   : > { %5087 = vmatmul.msk.bf16.gmra.mxu1 %vm794_vm2, %v2477_v40  ;;  %v4484_v40 = vmul.f32 %v4319_v4, %v4036_v8 }
 0x463   : > { %v3905_v3 = vadd.f32 %v3803_v14, %v3505_v41  ;;  %v3806_v5 = vpop.f32.mrf.mxu0  ;;  %5120 = vmatmul.msk.bf16.gmra.mxu2 %vm794_vm2, %v2479_v63 }
 0x464   : > { %5153 = vmatmul.msk.bf16.gmra.mxu3 %vm794_vm2, %v3180_v48 }
 0x465   : > { %v3973_v44 = vadd.f32 %v7229_v55, %v3905_v3  ;;  %v7889_v3 = vshll.u32 %v7887_v49, 16 }
 0x466   : > { %5186 = vmatmul.msk.bf16.gmra.mxu0 %vm794_vm2, %v3591_v59  ;;  %v2935_v16 = vpop.f32.mrf.mxu2 }
 0x467   : > { %v4037_v37 = vmax.f32 %v3973_v44, 0.0  ;;  %v3035_v52 = vadd.f32 %v2935_v16, %v2792_v39  ;;  %v3406_v9 = vpop.f32.mrf.mxu3  ;;  %v2694_v6 = vpop.f32.mrf.mxu1  ;;  %v5530_v44 = vld [vmem:[%s6034_s10 + $0x8] sm:$0xff]  ;;  %v7890_v16 = vld [vmem:[#allocation80_spill] sm:$0xff] }
 0x468   : > { %v2793_v24 = vadd.f32 %v2694_v6, %v7885_v35  ;;  %v2482_v22 = vrot.slane %v5530_v44, 2  ;;  %v3594_v6 = vrot.slane %v5530_v44, 3 }
 0x469   : > { %v4485_v54 = vmul.f32 %v4324_v31, %v4037_v37  ;;  %v3506_v33 = vadd.f32 %v3406_v9, %v3035_v52 }
 0x46a   : > { %v2483_v25 = vsel %vm2418_vm5, %v2480_v0, %v2482_v22 }
 0x46b   : > { %v5336_v2 = vpack.c.bf16 %v4485_v54, %v4484_v40  ;;  %v3808_v27 = vpop.f32.mrf.mxu0  ;;  %v3906_v19 = vadd.f32 %v3806_v5, %v3506_v33  ;;  %v3186_v5 = vrot.slane %v7889_v3, 3 }
 0x46d   : > { %5418 = vst [vmem:[%s6950_s13 + $0x98] sm:$0xff] %v5336_v2   ;;  %v3974_v36 = vadd.f32 %v7229_v55, %v3906_v19  ;;  %v3595_v2 = vsel %vm3532_vm7, %v3592_v15, %v3594_v6  ;;  %v7891_v19 = vld [vmem:[#allocation83_spill] sm:$0xff] }
 0x46e   : > { %v2937_v20 = vpop.f32.mrf.mxu2 }
 0x46f   : > { %v3036_v38 = vadd.f32 %v2937_v20, %v2793_v24  ;;  %v3408_v26 = vpop.f32.mrf.mxu3  ;;  %v2697_v11 = vpop.f32.mrf.mxu1  ;;  %v4038_v34 = vmax.f32 %v3974_v36, 0.0  ;;  %v3193_v24 = vshll.u32 %v5236_v12, 16 }
 0x470   : > { %v2794_v17 = vadd.f32 %v2697_v11, %v7886_v7  ;;  %v4339_v20 = vpop.permute.xlu0 %4338 }
 0x471   : > { %v3507_v51 = vadd.f32 %v3408_v26, %v3036_v38  ;;  %v4486_v62 = vmul.f32 %v4329_v47, %v4038_v34  ;;  %v3596_v47 = vrot.slane %v5236_v12, 3 }
 0x472   : > { %5088 = vmatmul.msk.bf16.gmra.mxu1 %vm794_vm2, %v2479_v63  ;;  %v3185_v63 = vrot.slane %v7888_v56, 2 }
 0x473   : > { %v3907_v43 = vadd.f32 %v3808_v27, %v3507_v51  ;;  %v3811_v13 = vpop.f32.mrf.mxu0  ;;  %5121 = vmatmul.msk.bf16.gmra.mxu2 %vm794_vm2, %v2481_v61  ;;  %v3190_v27 = vshrl.u32 %v5236_v12, 16  ;;  %v3597_v3 = vsel %vm3532_vm7, %v3594_v6, %v3596_v47 }
 0x474   : > { %5154 = vmatmul.msk.bf16.gmra.mxu3 %vm794_vm2, %v3184_v32  ;;  %v3187_v37 = vor.u32 %v3186_v5, %v3185_v63 }
 0x475   : > { %v3975_v14 = vadd.f32 %v7229_v55, %v3907_v43  ;;  %v3192_v15 = vrot.slane %v3190_v27, 2 }
 0x476   : > { %5187 = vmatmul.msk.bf16.gmra.mxu0 %vm794_vm2, %v3593_v23  ;;  %v2940_v1 = vpop.f32.mrf.mxu2  ;;  %v3188_v33 = vsel %vm3061_vm6, %v3183_v60, %v3187_v37 }
 0x477   : > { %v4039_v28 = vmax.f32 %v3975_v14, 0.0  ;;  %v3037_v57 = vadd.f32 %v2940_v1, %v2794_v17  ;;  %v3411_v30 = vpop.f32.mrf.mxu3  ;;  %v2699_v42 = vpop.f32.mrf.mxu1  ;;  %v2818_v14 = vrot.slane %v5236_v12, 2  ;;  %v7892_v17 = vld [vmem:[#allocation86_spill] sm:$0xff] }
 0x478   : > { %v2795_v31 = vadd.f32 %v2699_v42, %v7890_v16 }
 0x479   : > { %v4487_v41 = vmul.f32 %v4334_v45, %v4039_v28  ;;  %v3508_v48 = vadd.f32 %v3411_v30, %v3037_v57  ;;  %v2819_v49 = vsel %vm2418_vm5, %v2482_v22, %v2818_v14 }
 0x47b   : > { %v5341_v59 = vpack.c.bf16 %v4487_v41, %v4486_v62  ;;  %v3813_v8 = vpop.f32.mrf.mxu0  ;;  %v3908_v39 = vadd.f32 %v3811_v13, %v3508_v48  ;;  %v3195_v13 = vrot.slane %v3193_v24, 3 }
 0x47d   : > { %5419 = vst [vmem:[%s6950_s13 + $0xa0] sm:$0xff] %v5341_v59   ;;  %v3976_v40 = vadd.f32 %v7229_v55, %v3908_v39  ;;  %v3196_v45 = vor.u32 %v3195_v13, %v3192_v15  ;;  %v4354_v39 = vpop.permute.xlu0 %4353 }
 0x47e   : > { %v2942_v52 = vpop.f32.mrf.mxu2 }
 0x47f   : > { %v3038_v9 = vadd.f32 %v2942_v52, %v2795_v31  ;;  %v3413_v4 = vpop.f32.mrf.mxu3  ;;  %v2702_v53 = vpop.f32.mrf.mxu1  ;;  %v4040_v50 = vmax.f32 %v3976_v40, 0.0  ;;  %v3197_v62 = vsel %vm3061_vm6, %v3187_v37, %v3196_v45 }
 0x480   : > { %v2796_v35 = vadd.f32 %v2702_v53, %v7891_v19  ;;  %v4349_v52 = vpop.permute.xlu2 %4348 }
 0x481   : > { %v3509_v54 = vadd.f32 %v3413_v4, %v3038_v9  ;;  %v4488_v51 = vmul.f32 %v4339_v20, %v4040_v50  ;;  %v7895_v20 = vld [vmem:[#allocation19_spill] sm:$0xff] }
 0x482   : > { %5089 = vmatmul.msk.bf16.gmra.mxu1 %vm794_vm2, %v2481_v61  ;;  %v4344_v61 = vpop.permute.xlu1 %4343 }
 0x483   : > { %v3909_v10 = vadd.f32 %v3813_v8, %v3509_v54  ;;  %v3816_v21 = vpop.f32.mrf.mxu0  ;;  %5122 = vmatmul.msk.bf16.gmra.mxu2 %vm794_vm2, %v2483_v25  ;;  %v7893_v8 = vld [vmem:[#allocation89_spill] sm:$0xff] }
 0x484   : > { %5155 = vmatmul.msk.bf16.gmra.mxu3 %vm794_vm2, %v3188_v33  ;;  %v7894_v54 = vld [vmem:[#allocation25_spill] sm:$0xff] }
 0x485   : > { %v3977_v0 = vadd.f32 %v7229_v55, %v3909_v10 }
 0x486   : > { %5188 = vmatmul.msk.bf16.gmra.mxu0 %vm794_vm2, %v3595_v2  ;;  %v2945_v60 = vpop.f32.mrf.mxu2 }
 0x487   : > { %v4041_v38 = vmax.f32 %v3977_v0, 0.0  ;;  %v3039_v26 = vadd.f32 %v2945_v60, %v2796_v35  ;;  %v3416_v11 = vpop.f32.mrf.mxu3  ;;  %v2704_v36 = vpop.f32.mrf.mxu1 }
 0x488   : > { %v2797_v1 = vadd.f32 %v2704_v36, %v7892_v17  ;;  %v7896_v17 = vld [vmem:[#allocation31_spill] sm:$0xff] }
 0x489   : > { %v4489_v32 = vmul.f32 %v4344_v61, %v4041_v38  ;;  %v3510_v43 = vadd.f32 %v3416_v11, %v3039_v26  ;;  %v4364_v11 = vpop.permute.xlu2 %4363 }
 0x48b   : > { %v5346_v23 = vpack.c.bf16 %v4489_v32, %v4488_v51  ;;  %v3818_v34 = vpop.f32.mrf.mxu0  ;;  %v3910_v7 = vadd.f32 %v3816_v21, %v3510_v43  ;;  %v4359_v51 = vpop.permute.xlu1 %4358 }
 0x48d   : > { %5420 = vst [vmem:[%s6950_s13 + $0xa8] sm:$0xff] %v5346_v23   ;;  %v3978_v56 = vadd.f32 %v7229_v55, %v3910_v7 }
 0x48e   : > { %v2947_v28 = vpop.f32.mrf.mxu2 }
 0x48f   : > { %v3040_v57 = vadd.f32 %v2947_v28, %v2797_v1  ;;  %v3418_v30 = vpop.f32.mrf.mxu3  ;;  %v2707_v42 = vpop.f32.mrf.mxu1  ;;  %v4042_v5 = vmax.f32 %v3978_v56, 0.0 }
 0x490   : > { %v2798_v44 = vadd.f32 %v2707_v42, %v7893_v8 }
 0x491   : > { %v3511_v63 = vadd.f32 %v3418_v30, %v3040_v57  ;;  %v4490_v4 = vmul.f32 %v4349_v52, %v4042_v5  ;;  %v4369_v5 = vpop.permute.xlu0 %4368 }
 0x492   : > { %5090 = vmatmul.msk.bf16.gmra.mxu1 %vm794_vm2, %v2483_v25 }
 0x493   : > { %v3911_v41 = vadd.f32 %v3818_v34, %v3511_v63  ;;  %v3821_v48 = vpop.f32.mrf.mxu0  ;;  %5123 = vmatmul.msk.bf16.gmra.mxu2 %vm794_vm2, %v2819_v49 }
 0x494   : > { %5156 = vmatmul.msk.bf16.gmra.mxu3 %vm794_vm2, %v3197_v62 }
 0x495   : > { %v3979_v59 = vadd.f32 %v7229_v55, %v3911_v41  ;;  %v7897_v41 = vld [vmem:[#allocation26_spill] sm:$0xff] }
 0x496   : > { %5189 = vmatmul.msk.bf16.gmra.mxu0 %vm794_vm2, %v3597_v3  ;;  %v2950_v22 = vpop.f32.mrf.mxu2 }
 0x497   : > { %v4043_v16 = vmax.f32 %v3979_v59, 0.0  ;;  %v3041_v31 = vadd.f32 %v2950_v22, %v2798_v44  ;;  %v3421_v37 = vpop.f32.mrf.mxu3  ;;  %v2709_v9 = vpop.f32.mrf.mxu1 }
 0x498   : > { %v2799_v33 = vadd.f32 %v2709_v9, %v7894_v54  ;;  %v4374_v22 = vpop.permute.xlu1 %4373  ;;  %v7438_v54 = vld [vmem:[%s7510_s3] ss:$0 sm:$0xff] }
 0x499   : > { %v4491_v53 = vmul.f32 %v4354_v39, %v4043_v16  ;;  %v3512_v6 = vadd.f32 %v3421_v37, %v3041_v31 }
 0x49b   : > { %v5351_v25 = vpack.c.bf16 %v4491_v53, %v4490_v4  ;;  %v3823_v12 = vpop.f32.mrf.mxu0  ;;  %v3912_v40 = vadd.f32 %v3821_v48, %v3512_v6  ;;  %v7898_v53 = vld [vmem:[#allocation92_spill] sm:$0xff] }
 0x49d   : > { %5421 = vst [vmem:[%s6950_s13 + $0xb0] sm:$0xff] %v5351_v25   ;;  %v3980_v50 = vadd.f32 %v7229_v55, %v3912_v40 }
 0x49e   : > { %v2952_v10 = vpop.f32.mrf.mxu2 }
 0x49f   : > { %v3042_v21 = vadd.f32 %v2952_v10, %v2799_v33  ;;  %v3423_v2 = vpop.f32.mrf.mxu3  ;;  %v2712_v27 = vpop.f32.mrf.mxu1  ;;  %v4044_v24 = vmax.f32 %v3980_v50, 0.0 }
 0x4a0   : > { %v2800_v38 = vadd.f32 %v2712_v27, %v7895_v20 }
 0x4a1   : > { %v3513_v0 = vadd.f32 %v3423_v2, %v3042_v21  ;;  %v4492_v43 = vmul.f32 %v4359_v51, %v4044_v24  ;;  %v4384_v24 = vpop.permute.xlu0 %4383 }
 0x4a3   : > { %v3913_v19 = vadd.f32 %v3823_v12, %v3513_v0  ;;  %v3826_v35 = vpop.f32.mrf.mxu0  ;;  %v7899_v0 = vld [vmem:[#allocation56_spill] sm:$0xff] }
 0x4a5   : > { %v3981_v60 = vadd.f32 %v7229_v55, %v3913_v19 }
 0x4a6   : > { %v2955_v26 = vpop.f32.mrf.mxu2 }
 0x4a7   : > { %v4045_v61 = vmax.f32 %v3981_v60, 0.0  ;;  %v3043_v36 = vadd.f32 %v2955_v26, %v2800_v38  ;;  %v3426_v15 = vpop.f32.mrf.mxu3  ;;  %v2714_v32 = vpop.f32.mrf.mxu1 }
 0x4a8   : > { %v2801_v1 = vadd.f32 %v2714_v32, %v7896_v17  ;;  %v4379_v26 = vpop.permute.xlu2 %4378 }
 0x4a9   : > { %v4493_v13 = vmul.f32 %v4364_v11, %v4045_v61  ;;  %v3514_v23 = vadd.f32 %v3426_v15, %v3043_v36 }
 0x4ab   : > { %v5356_v34 = vpack.c.bf16 %v4493_v13, %v4492_v43  ;;  %v3828_v14 = vpop.f32.mrf.mxu0  ;;  %v3914_v7 = vadd.f32 %v3826_v35, %v3514_v23  ;;  %v7900_v13 = vld [vmem:[#allocation37_spill] sm:$0xff] }
 0x4ad   : > { %5422 = vst [vmem:[%s6950_s13 + $0xb8] sm:$0xff] %v5356_v34   ;;  %v3982_v47 = vadd.f32 %v7229_v55, %v3914_v7 }
 0x4ae   : > { %v2957_v45 = vpop.f32.mrf.mxu2 }
 0x4af   : > { %v3044_v28 = vadd.f32 %v2957_v45, %v2801_v1  ;;  %v3428_v57 = vpop.f32.mrf.mxu3  ;;  %v2717_v30 = vpop.f32.mrf.mxu1  ;;  %v4046_v63 = vmax.f32 %v3982_v47, 0.0 }
 0x4b0   : > { %v2802_v48 = vadd.f32 %v2717_v30, %v7897_v41 }
 0x4b1   : > { %v3515_v42 = vadd.f32 %v3428_v57, %v3044_v28  ;;  %v4494_v16 = vmul.f32 %v4369_v5, %v4046_v63  ;;  %v4394_v63 = vpop.permute.xlu2 %4393 }
 0x4b3   : > { %v3915_v49 = vadd.f32 %v3828_v14, %v3515_v42  ;;  %v3831_v56 = vpop.f32.mrf.mxu0  ;;  %v7901_v42 = vld [vmem:[#allocation32_spill] sm:$0xff] }
 0x4b5   : > { %v3983_v62 = vadd.f32 %v7229_v55, %v3915_v49 }
 0x4b6   : > { %v2960_v3 = vpop.f32.mrf.mxu2 }
 0x4b7   : > { %v4047_v59 = vmax.f32 %v3983_v62, 0.0  ;;  %v3045_v8 = vadd.f32 %v2960_v3, %v2802_v48  ;;  %v3431_v44 = vpop.f32.mrf.mxu3  ;;  %v2719_v39 = vpop.f32.mrf.mxu1 }
 0x4b8   : > { %v2803_v6 = vadd.f32 %v2719_v39, %v7898_v53  ;;  %v4389_v3 = vpop.permute.xlu1 %4388 }
 0x4b9   : > { %v4495_v31 = vmul.f32 %v4374_v22, %v4047_v59  ;;  %v3516_v37 = vadd.f32 %v3431_v44, %v3045_v8 }
 0x4bb   : > { %v5361_v52 = vpack.c.bf16 %v4495_v31, %v4494_v16  ;;  %v3833_v9 = vpop.f32.mrf.mxu0  ;;  %v3916_v4 = vadd.f32 %v3831_v56, %v3516_v37  ;;  %v7902_v31 = vld [vmem:[#allocation58_spill] sm:$0xff] }
 0x4bd   : > { %5423 = vst [vmem:[%s6950_s13 + $0xc0] sm:$0xff] %v5361_v52   ;;  %v3984_v33 = vadd.f32 %v7438_v54, %v3916_v4 }
 0x4be   : > { %v2962_v25 = vpop.f32.mrf.mxu2 }
 0x4bf   : > { %v3046_v55 = vadd.f32 %v2962_v25, %v2803_v6  ;;  %v3433_v12 = vpop.f32.mrf.mxu3  ;;  %v2722_v40 = vpop.f32.mrf.mxu1  ;;  %v4048_v27 = vmax.f32 %v3984_v33, 0.0 }
 0x4c0   : > { %v2804_v19 = vadd.f32 %v2722_v40, %v7899_v0 }
 0x4c1   : > { %v3517_v10 = vadd.f32 %v3433_v12, %v3046_v55  ;;  %v4496_v61 = vmul.f32 %v4379_v26, %v4048_v27  ;;  %v4399_v27 = vpop.permute.xlu0 %4398 }
 0x4c3   : > { %v3917_v21 = vadd.f32 %v3833_v9, %v3517_v10  ;;  %v3836_v2 = vpop.f32.mrf.mxu0  ;;  %v7903_v10 = vld [vmem:[#allocation60_spill] sm:$0xff] }
 0x4c5   : > { %v3985_v50 = vadd.f32 %v7438_v54, %v3917_v21 }
 0x4c6   : > { %v2965_v35 = vpop.f32.mrf.mxu2 }
 0x4c7   : > { %v4049_v60 = vmax.f32 %v3985_v50, 0.0  ;;  %v3047_v20 = vadd.f32 %v2965_v35, %v2804_v19  ;;  %v3436_v38 = vpop.f32.mrf.mxu3  ;;  %v2724_v11 = vpop.f32.mrf.mxu1 }
 0x4c8   : > { %v2805_v23 = vadd.f32 %v2724_v11, %v7900_v13  ;;  %v4404_v35 = vpop.permute.xlu1 %4403 }
 0x4c9   : > { %v4497_v36 = vmul.f32 %v4384_v24, %v4049_v60  ;;  %v3518_v15 = vadd.f32 %v3436_v38, %v3047_v20 }
 0x4cb   : > { %v5366_v51 = vpack.c.bf16 %v4497_v36, %v4496_v61  ;;  %v3838_v32 = vpop.f32.mrf.mxu0  ;;  %v3918_v43 = vadd.f32 %v3836_v2, %v3518_v15  ;;  %v7904_v36 = vld [vmem:[#allocation43_spill] sm:$0xff] }
 0x4cd   : > { %5424 = vst [vmem:[%s6950_s13 + $0xc8] sm:$0xff] %v5366_v51   ;;  %v3986_v1 = vadd.f32 %v7438_v54, %v3918_v43 }
 0x4ce   : > { %v2967_v34 = vpop.f32.mrf.mxu2 }
 0x4cf   : > { %v3048_v14 = vadd.f32 %v2967_v34, %v2805_v23  ;;  %v3438_v7 = vpop.f32.mrf.mxu3  ;;  %v2727_v17 = vpop.f32.mrf.mxu1  ;;  %v4050_v30 = vmax.f32 %v3986_v1, 0.0 }
 0x4d0   : > { %v2806_v49 = vadd.f32 %v2727_v17, %v7901_v42 }
 0x4d1   : > { %v3519_v45 = vadd.f32 %v3438_v7, %v3048_v14  ;;  %v4498_v59 = vmul.f32 %v4389_v3, %v4050_v30  ;;  %v4414_v30 = vpop.permute.xlu0 %4413 }
 0x4d3   : > { %v3919_v28 = vadd.f32 %v3838_v32, %v3519_v45  ;;  %v3841_v57 = vpop.f32.mrf.mxu0  ;;  %v7905_v45 = vld [vmem:[#allocation38_spill] sm:$0xff] }
 0x4d5   : > { %v3987_v47 = vadd.f32 %v7438_v54, %v3919_v28 }
 0x4d6   : > { %v2970_v56 = vpop.f32.mrf.mxu2 }
 0x4d7   : > { %v4051_v62 = vmax.f32 %v3987_v47, 0.0  ;;  %v3049_v41 = vadd.f32 %v2970_v56, %v2806_v49  ;;  %v3441_v48 = vpop.f32.mrf.mxu3  ;;  %v2729_v5 = vpop.f32.mrf.mxu1 }
 0x4d8   : > { %v2807_v37 = vadd.f32 %v2729_v5, %v7902_v31  ;;  %v4409_v56 = vpop.permute.xlu2 %4408 }
 0x4d9   : > { %v4499_v8 = vmul.f32 %v4394_v63, %v4051_v62  ;;  %v3520_v44 = vadd.f32 %v3441_v48, %v3049_v41 }
 0x4db   : > { %v5371_v22 = vpack.c.bf16 %v4499_v8, %v4498_v59  ;;  %v3843_v39 = vpop.f32.mrf.mxu0  ;;  %v3920_v16 = vadd.f32 %v3841_v57, %v3520_v44  ;;  %v7906_v8 = vld [vmem:[#allocation62_spill] sm:$0xff] }
 0x4dd   : > { %5425 = vst [vmem:[%s6950_s13 + $0xd0] sm:$0xff] %v5371_v22   ;;  %v3988_v6 = vadd.f32 %v7438_v54, %v3920_v16 }
 0x4de   : > { %v2972_v52 = vpop.f32.mrf.mxu2 }
 0x4df   : > { %v3050_v9 = vadd.f32 %v2972_v52, %v2807_v37  ;;  %v3443_v4 = vpop.f32.mrf.mxu3  ;;  %v2732_v53 = vpop.f32.mrf.mxu1  ;;  %v4052_v40 = vmax.f32 %v3988_v6, 0.0 }
 0x4e0   : > { %v2808_v21 = vadd.f32 %v2732_v53, %v7903_v10 }
 0x4e1   : > { %v3521_v25 = vadd.f32 %v3443_v4, %v3050_v9  ;;  %v4500_v60 = vmul.f32 %v4399_v27, %v4052_v40 }
 0x4e3   : > { %v3921_v55 = vadd.f32 %v3843_v39, %v3521_v25  ;;  %v3846_v12 = vpop.f32.mrf.mxu0 }
 0x4e5   : > { %v3989_v33 = vadd.f32 %v7438_v54, %v3921_v55 }
 0x4e6   : > { %v2975_v2 = vpop.f32.mrf.mxu2 }
 0x4e7   : > { %v4053_v50 = vmax.f32 %v3989_v33, 0.0  ;;  %v3051_v0 = vadd.f32 %v2975_v2, %v2808_v21  ;;  %v3446_v19 = vpop.f32.mrf.mxu3  ;;  %v2734_v24 = vpop.f32.mrf.mxu1 }
 0x4e8   : > { %v2809_v15 = vadd.f32 %v2734_v24, %v7904_v36  ;;  %v4419_v21 = vpop.permute.xlu1 %4418 }
 0x4e9   : > { %v4501_v20 = vmul.f32 %v4404_v35, %v4053_v50  ;;  %v3522_v38 = vadd.f32 %v3446_v19, %v3051_v0 }
 0x4eb   : > { %v5376_v26 = vpack.c.bf16 %v4501_v20, %v4500_v60  ;;  %v3848_v11 = vpop.f32.mrf.mxu0  ;;  %v3922_v61 = vadd.f32 %v3846_v12, %v3522_v38  ;;  %v4424_v12 = vpop.permute.xlu2 %4423 }
 0x4ed   : > { %5426 = vst [vmem:[%s6950_s13 + $0xd8] sm:$0xff] %v5376_v26   ;;  %v3990_v23 = vadd.f32 %v7438_v54, %v3922_v61 }
 0x4ee   : > { %v2977_v51 = vpop.f32.mrf.mxu2 }
 0x4ef   : > { %v3052_v32 = vadd.f32 %v2977_v51, %v2809_v15  ;;  %v3448_v43 = vpop.f32.mrf.mxu3  ;;  %v2737_v13 = vpop.f32.mrf.mxu1  ;;  %v4054_v17 = vmax.f32 %v3990_v23, 0.0 }
 0x4f0   : > { %v2810_v28 = vadd.f32 %v2737_v13, %v7905_v45  ;;  %v4429_v13 = vpop.permute.xlu0 %4428 }
 0x4f1   : > { %v3523_v34 = vadd.f32 %v3448_v43, %v3052_v32  ;;  %v4502_v62 = vmul.f32 %v4409_v56, %v4054_v17 }
 0x4f3   : > { %v3923_v14 = vadd.f32 %v3848_v11, %v3523_v34  ;;  %v3851_v7 = vpop.f32.mrf.mxu0 }
 0x4f5   : > { %v3991_v1 = vadd.f32 %v7438_v54, %v3923_v14  ;;  %v4434_v14 = vpop.permute.xlu1 %4433 }
 0x4f6   : > { %v2980_v57 = vpop.f32.mrf.mxu2 }
 0x4f7   : > { %v4055_v47 = vmax.f32 %v3991_v1, 0.0  ;;  %v3053_v42 = vadd.f32 %v2980_v57, %v2810_v28  ;;  %v3451_v49 = vpop.f32.mrf.mxu3  ;;  %v2739_v63 = vpop.f32.mrf.mxu1 }
 0x4f8   : > { %v2811_v44 = vadd.f32 %v2739_v63, %v7906_v8 }
 0x4f9   : > { %v4503_v41 = vmul.f32 %v4414_v30, %v4055_v47  ;;  %v3524_v48 = vadd.f32 %v3451_v49, %v3053_v42 }
 0x4fb   : > { %v5381_v3 = vpack.c.bf16 %v4503_v41, %v4502_v62  ;;  %v3853_v5 = vpop.f32.mrf.mxu0  ;;  %v3924_v59 = vadd.f32 %v3851_v7, %v3524_v48 }
 0x4fd   : > { %5427 = vst [vmem:[%s6950_s13 + $0xe0] sm:$0xff] %v5381_v3   ;;  %v3992_v37 = vadd.f32 %v7438_v54, %v3924_v59  ;;  %v4439_v59 = vpop.permute.xlu2 %4438 }
 0x4fe   : > { %v2982_v22 = vpop.f32.mrf.mxu2 }
 0x4ff   : > { %v3054_v39 = vadd.f32 %v2982_v22, %v2811_v44  ;;  %v3453_v16 = vpop.f32.mrf.mxu3  ;;  %v2742_v31 = vpop.f32.mrf.mxu1  ;;  %v4056_v53 = vmax.f32 %v3992_v37, 0.0 }
 0x500   : > { %v2812_v25 = vadd.f32 %v2742_v31, %v6883_v29 }
 0x501   : > { %v3525_v52 = vadd.f32 %v3453_v16, %v3054_v39  ;;  %v4504_v27 = vmul.f32 %v4419_v21, %v4056_v53 }
 0x503   : > { %v3925_v9 = vadd.f32 %v3853_v5, %v3525_v52  ;;  %v3856_v4 = vpop.f32.mrf.mxu0 }
 0x505   : > { %v3993_v6 = vadd.f32 %v7438_v54, %v3925_v9 }
 0x506   : > { %v2985_v55 = vpop.f32.mrf.mxu2 }
 0x507   : > { %v4057_v40 = vmax.f32 %v3993_v6, 0.0  ;;  %v3055_v33 = vadd.f32 %v2985_v55, %v2812_v25  ;;  %v3456_v10 = vpop.f32.mrf.mxu3  ;;  %v2744_v2 = vpop.f32.mrf.mxu1 }
 0x508   : > { %v2813_v24 = vadd.f32 %v2744_v2, %v6892_v58 }
 0x509   : > { %v4505_v50 = vmul.f32 %v4424_v12, %v4057_v40  ;;  %v3526_v0 = vadd.f32 %v3456_v10, %v3055_v33 }
 0x50b   : > { %v5386_v19 = vpack.c.bf16 %v4505_v50, %v4504_v27  ;;  %v3926_v35 = vadd.f32 %v3856_v4, %v3526_v0  ;;  %v3858_v60 = vpop.f32.mrf.mxu0 }
 0x50d   : > { %5428 = vst [vmem:[%s6950_s13 + $0xe8] sm:$0xff] %v5386_v19   ;;  %v3994_v11 = vadd.f32 %v7438_v54, %v3926_v35 }
 0x50e   : > { %v2987_v20 = vpop.f32.mrf.mxu2 }
 0x50f   : > { %v3056_v38 = vadd.f32 %v2987_v20, %v2813_v24  ;;  %v3458_v26 = vpop.f32.mrf.mxu3  ;;  %v2747_v29 = vpop.f32.mrf.mxu1  ;;  %v4058_v15 = vmax.f32 %v3994_v11, 0.0 }
 0x510   : > { %v2814_v32 = vadd.f32 %v2747_v29, %v6900_v46 }
 0x511   : > { %v3527_v61 = vadd.f32 %v3458_v26, %v3056_v38  ;;  %v4506_v17 = vmul.f32 %v4429_v13, %v4058_v15 }
 0x513   : > { %v3927_v36 = vadd.f32 %v3858_v60, %v3527_v61  ;;  %v3861_v7 = vpop.f32.mrf.mxu0 }
 0x515   : > { %v3995_v51 = vadd.f32 %v7438_v54, %v3927_v36 }
 0x516   : > { %v2990_v43 = vpop.f32.mrf.mxu2 }
 0x517   : > { %v4059_v23 = vmax.f32 %v3995_v51, 0.0  ;;  %v3057_v34 = vadd.f32 %v2990_v43, %v2814_v32  ;;  %v3461_v58 = vpop.f32.mrf.mxu3  ;;  %v2749_v28 = vpop.f32.mrf.mxu1 }
 0x518   : > { %v2815_v47 = vadd.f32 %v2749_v28, %v6910_v18  ;;  %v4444_v18 = vpop.permute.xlu0 %4443 }
 0x519   : > { %v4507_v1 = vmul.f32 %v4434_v14, %v4059_v23  ;;  %v3528_v45 = vadd.f32 %v3461_v58, %v3057_v34 }
 0x51b   : > { %v5391_v57 = vpack.c.bf16 %v4507_v1, %v4506_v17  ;;  %v3928_v30 = vadd.f32 %v3861_v7, %v3528_v45  ;;  %v3863_v62 = vpop.f32.mrf.mxu0 }
 0x51d   : > { %5429 = vst [vmem:[%s6950_s13 + $0xf0] sm:$0xff] %v5391_v57   ;;  %v3996_v56 = vadd.f32 %v7438_v54, %v3928_v30 }
 0x51e   : > { %v2992_v42 = vpop.f32.mrf.mxu2 }
 0x51f   : > { %v3058_v46 = vadd.f32 %v2992_v42, %v2815_v47  ;;  %v3463_v49 = vpop.f32.mrf.mxu3  ;;  %v4060_v48 = vmax.f32 %v3996_v56, 0.0 }
 0x521   : > { %v3529_v63 = vadd.f32 %v3463_v49, %v3058_v46  ;;  %v4508_v8 = vmul.f32 %v4439_v59, %v4060_v48 }
 0x523   : > { %v3929_v41 = vadd.f32 %v3863_v62, %v3529_v63 }
 0x525   : > { %v3997_v3 = vadd.f32 %v7438_v54, %v3929_v41 }
 0x527   : > { %v4061_v5 = vmax.f32 %v3997_v3, 0.0 }
 0x529   : > { %v4509_v44 = vmul.f32 %v4444_v18, %v4061_v5 }
 0x52b   : > { %v5396_v22 = vpack.c.bf16 %v4509_v44, %v4508_v8 }
 0x52d   : > { %5430 = vst [vmem:[%s6950_s13 + $0xf8] sm:$0xff] %v5396_v22  }
 0x52e   : > { %5559 = shalt.err (!%p5556_p7)
}
 0x52f   : > { %s5597_s11 = smov 64   ;;  %s5598_s13 = smov 4  }
 0x530   : > { %5434 = dma.vmem_to_hbm [thread:$0]  (%p5667_p5), %s4652_s30, 4096, %s4654_s6, %s4639_s22, %s5597_s11, %s5597_s11, %s5598_s13  }
 0x531 PF: > { %p5440_p8 = scmp.ge.s32.totalorder %s5594_s21, 2  ;;  %s4668_s10 = sand.u32 1, %s5582_s18  }
 0x532   : > { %s4669_s16 = scalar_lea.sflag [#allocation3], %s4668_s10 }
 0x533   : > { %p5437_p9 = pnand %p5440_p8, %p5671_p6 }
 0x535   : > { %p5438_p10 = pneg %p5437_p9 }
 0x537   : > { %5577 = dma.done.wait (%p5438_p10), %s4669_s16, 4096  }
 0x538   : > { %5579 = vsyncadd (%p5438_p10), %s4669_s16, 4294963200  ;;  %p15_p11 = scmp.ge.s32.totalorder %s5654_s24, 5   ;;  %s7907_s18 = smov %s5586_s19 }
 0x539   : > { %s7908_s19 = smov %s5590_s20  ;;  %s7909_s20 = smov %s5665_s27 }
 0x53a   : > { %s7910_s21 = smov %s5654_s24  ;;  %17 = sbr.rel (!%p15_p11) target bundleno = 3 (0x3), region = 89 }
 0x53f   :  { %4675 = vsyncpa [#allocation3], 1 }
 0x540   :  { %4677 = vsyncpa [#allocation3 + $0x1], 1 }

</bundles_post_ra>
